<compile_context>
chip_gen: v6e
topology: v6e:2x2x1
jax: 0.10.0
libtpu: 0.0.40
codegen_flags: <defaults>
</compile_context>

<pallas_src>
import jax
import jax.numpy as jnp
from jax import lax
from jax.experimental import pallas as pl
from jax.experimental.pallas import tpu as pltpu


def _round_up(x, m):
    return (x + m - 1) // m * m


def _bigru_kernel(x_ref, lens_ref,
                  wihf_ref, wihb_ref, bihf_ref, bihb_ref,
                  whhf_ref, bhnf_ref, whhb_ref, bhnb_ref,
                  out_ref, hid_ref,
                  xpf_ref, xpb_ref, outb_ref):
    """Fused bidirectional GRU recurrence + fwd/bwd averaging (Hp = 128-padded hidden).

    x_ref     : (T*B, E)     bf16 embedded tokens, time-major, flattened (sublane-dense)
    lens_ref  : (B, Hp)      int32 lengths broadcast across lanes
    wih*_ref  : (E, 3*Hp)    bf16 per-direction input->gate weights (gates on 128-lane blocks)
    bih*_ref  : (1, 3*Hp)    f32 per-direction input biases with r/z hidden biases folded in
    whh*_ref  : (Hp, 3*Hp)   bf16 hidden->gate weights
    bhn*_ref  : (1, Hp)      f32 n-gate hidden bias (must stay inside r*(...))
    out_ref   : (T, B, Hp)   f32 averaged (fwd+bwd)/2 outputs
    hid_ref   : (B, Hp)      f32 averaged (h_fwd+h_bwd)/2 final hidden
    xp*_ref   : (T, B, 3*Hp) bf16 scratch: per-direction input projections
    outb_ref  : (T, B, Hp)   bf16 scratch: backward per-step masked outputs
    """
    TB, E = x_ref.shape
    B, Hp = lens_ref.shape
    T = TB // B
    H3 = 3 * Hp

    # --- whole-sequence input projections (MXU, bf16 in / f32 acc), one direction at a time
    #     so the f32 intermediate is bounded to (T*B, 3Hp).
    projf = jnp.dot(x_ref[...], wihf_ref[...],
                    preferred_element_type=jnp.float32) + bihf_ref[...]
    xpf_ref[...] = projf.astype(jnp.bfloat16).reshape(T, B, H3)
    projb = jnp.dot(x_ref[...], wihb_ref[...],
                    preferred_element_type=jnp.float32) + bihb_ref[...]
    xpb_ref[...] = projb.astype(jnp.bfloat16).reshape(T, B, H3)

    lens = lens_ref[...]                                   # (B, Hp) int32, loop-invariant
    bhn_f = jnp.broadcast_to(bhnf_ref[...], (B, Hp))       # hoisted broadcasts (no per-iter
    bhn_b = jnp.broadcast_to(bhnb_ref[...], (B, Hp))       # broadcast_in_dim re-emission)

    def cell(gx, h, whh_ref_, bhn):
        # PyTorch GRU cell, gates [r, z, n]; r/z biases already folded into gx.
        gh = jnp.dot(h.astype(jnp.bfloat16), whh_ref_[...],
                     preferred_element_type=jnp.float32)
        r = jax.nn.sigmoid(gx[:, 0 * Hp:1 * Hp] + gh[:, 0 * Hp:1 * Hp])
        z = jax.nn.sigmoid(gx[:, 1 * Hp:2 * Hp] + gh[:, 1 * Hp:2 * Hp])
        n = jnp.tanh(gx[:, 2 * Hp:3 * Hp] + r * (gh[:, 2 * Hp:3 * Hp] + bhn))
        return n + z * (h - n)                              # == (1 - z) * n + z * h

    h0 = jnp.zeros((B, Hp), jnp.float32)

    # ---- fused forward/backward recurrence: fwd at t=i, bwd at t=T-1-i each iteration ----
    def step(i, carry):
        h_f, h_b = carry
        t_f = i
        t_b = T - 1 - i
        m_f = (t_f < lens).astype(jnp.float32)              # (B, Hp), lane-dense
        m_b = (t_b < lens).astype(jnp.float32)
        gx_f = xpf_ref[t_f].astype(jnp.float32)             # (B, 3*Hp)
        gx_b = xpb_ref[t_b].astype(jnp.float32)
        hf_new = cell(gx_f, h_f, whhf_ref, bhn_f)           # independent chains -> the
        hb_new = cell(gx_b, h_b, whhb_ref, bhn_b)           # scheduler interleaves them
        h_f = h_f + m_f * (hf_new - h_f)                    # freeze past length
        h_b = h_b + m_b * (hb_new - h_b)
        out_ref[t_f] = h_f * m_f                            # fwd written once, directly
        outb_ref[t_b] = (h_b * m_b).astype(jnp.bfloat16)    # bwd to bf16 scratch
        return (h_f, h_b)

    unroll = True if T <= 16 else 4
    h_f, h_b = lax.fori_loop(0, T, step, (h0, h0), unroll=unroll)

    # single vectorized combine pass: out = (fwd + bwd) / 2
    out_ref[...] = (out_ref[...] + outb_ref[...].astype(jnp.float32)) * 0.5
    hid_ref[...] = (h_f + h_b) * 0.5


def make_encoder_params(key, words_number, emb_size, hidden_size):
    ks = jax.random.split(key, 9)
    s = 0.1
    H, E = hidden_size, emb_size
    return {
        "embedding": s * jax.random.normal(ks[0], (words_number, E), jnp.float32),
        "w_ih_f": s * jax.random.normal(ks[1], (3 * H, E), jnp.float32),
        "w_hh_f": s * jax.random.normal(ks[2], (3 * H, H), jnp.float32),
        "b_ih_f": s * jax.random.normal(ks[3], (3 * H,), jnp.float32),
        "b_hh_f": s * jax.random.normal(ks[4], (3 * H,), jnp.float32),
        "w_ih_b": s * jax.random.normal(ks[5], (3 * H, E), jnp.float32),
        "w_hh_b": s * jax.random.normal(ks[6], (3 * H, H), jnp.float32),
        "b_ih_b": s * jax.random.normal(ks[7], (3 * H,), jnp.float32),
        "b_hh_b": s * jax.random.normal(ks[8], (3 * H,), jnp.float32),
    }


def _prep_params(params, H, Hp):
    """Pad each [r,z,n] gate block from H to Hp (multiple of 128 lanes), lay GRU weights out
    MXU-friendly (inputs on rows, gates on 128-aligned lane blocks, bf16 operands), and fold
    the r/z hidden biases into the packed input bias.  All padding is exact zero per gate
    block, so padded hidden lanes provably stay zero through the recurrence."""

    def pad_gate_rows(w):
        # (3H, ...) -> (3Hp, ...), zero-padding each gate block independently.
        pad = [(0, Hp - H)] + [(0, 0)] * (w.ndim - 1)
        return jnp.concatenate([jnp.pad(w[g * H:(g + 1) * H], pad) for g in range(3)], axis=0)

    def prep_ih(w):       # (3H, E) -> (E, 3Hp)
        return pad_gate_rows(w).T

    def prep_hh(w):       # (3H, H) -> (Hp, 3Hp)
        w = jnp.pad(w, ((0, 0), (0, Hp - H)))
        return pad_gate_rows(w).T

    def prep_bih_folded(b_ih, b_hh):   # (3H,),(3H,) -> (1, 3Hp)
        # r/z: b_i + b_h (both outside the r*() term); n: only b_in, b_hn stays separate.
        folded = jnp.concatenate([b_ih[:2 * H] + b_hh[:2 * H], b_ih[2 * H:]], axis=0)
        return pad_gate_rows(folded).reshape(1, 3 * Hp)

    def prep_bhn(b_hh):   # (3H,) -> (1, Hp) n-gate hidden bias, zero-padded lanes
        return jnp.pad(b_hh[2 * H:], (0, Hp - H)).reshape(1, Hp)

    return dict(
        wih_f=prep_ih(params["w_ih_f"]).astype(jnp.bfloat16),          # (E, 3Hp)
        wih_b=prep_ih(params["w_ih_b"]).astype(jnp.bfloat16),
        bih_f=prep_bih_folded(params["b_ih_f"], params["b_hh_f"]).astype(jnp.float32),
        bih_b=prep_bih_folded(params["b_ih_b"], params["b_hh_b"]).astype(jnp.float32),
        whh_f=prep_hh(params["w_hh_f"]).astype(jnp.bfloat16),          # (Hp, 3Hp)
        whh_b=prep_hh(params["w_hh_b"]).astype(jnp.bfloat16),
        bhn_f=prep_bhn(params["b_hh_f"]).astype(jnp.float32),          # (1, Hp)
        bhn_b=prep_bhn(params["b_hh_b"]).astype(jnp.float32),
    )


def _vmem_limit_bytes(T, B, Hp, E):
    """Right-size the scoped VMEM limit per chip generation (leave headroom on v7x)."""
    Bp = _round_up(max(B, 8), 8)
    H3 = 3 * Hp
    need = (
        T * Bp * E * 2                    # x bf16
        + 2 * E * H3 * 2                  # wih f/b bf16
        + 2 * H3 * 4 + 2 * Hp * 4         # biases f32
        + 2 * Hp * H3 * 2                 # whh f/b bf16
        + 2 * T * Bp * H3 * 2             # xpf/xpb scratches bf16
        + T * Bp * Hp * 2                 # outb scratch bf16
        + T * Bp * Hp * 4                 # out f32
        + 2 * Bp * Hp * 4                 # hid + lens
    )
    try:
        cap = int(pltpu.get_tpu_info().vmem_capacity_bytes)
    except Exception:  # pragma: no cover - conservative fallback
        cap = 64 * 1024 * 1024
    want = max(4 * need, 32 * 1024 * 1024)          # headroom for compiler scratch / buffering
    return int(min(want, int(cap * 0.75)))


def encoder_forward(sentence, lengths, params):
    """sentence: (B, T) int tokens; lengths: (B,) ints (descending, like PyTorch).
    Returns (output (B, T, H), hidden (1, B, H)) matching the PyTorch encoder."""
    emb = params["embedding"]
    H = params["w_hh_f"].shape[1]
    E = emb.shape[1]
    B, T = sentence.shape
    Hp = _round_up(H, 128)

    # Embedding gather done directly in time-major, flattened to a 2-D (T*B, E) slab.
    # TODO(synk): at production sizes, fuse this gather into the kernel (scalar-prefetch token
    #             ids + pl.ANY embedding table) to remove the extra HBM round-trip.
    tok_tm = jnp.transpose(sentence.astype(jnp.int32))                 # (T, B)
    x = jnp.take(emb, tok_tm, axis=0).reshape(T * B, E)
    x = x.astype(jnp.bfloat16)                                         # MXU operands in bf16

    lengths = jnp.asarray(lengths, jnp.int32)
    lens_bh = jnp.broadcast_to(lengths[:, None], (B, Hp)).astype(jnp.int32)

    p = _prep_params(params, H, Hp)

    vmem = pl.BlockSpec(memory_space=pltpu.MemorySpace.VMEM)
    out_tm, hid = pl.pallas_call(
        _bigru_kernel,
        out_shape=(jax.ShapeDtypeStruct((T, B, Hp), jnp.float32),
                   jax.ShapeDtypeStruct((B, Hp), jnp.float32)),
        in_specs=[vmem] * 10,
        out_specs=(vmem, vmem),
        scratch_shapes=[pltpu.VMEM((T, B, 3 * Hp), jnp.bfloat16),
                        pltpu.VMEM((T, B, 3 * Hp), jnp.bfloat16),
                        pltpu.VMEM((T, B, Hp), jnp.bfloat16)],
        compiler_params=pltpu.CompilerParams(
            vmem_limit_bytes=_vmem_limit_bytes(T, B, Hp, E)),
    )(x, lens_bh,
      p["wih_f"], p["wih_b"], p["bih_f"], p["bih_b"],
      p["whh_f"], p["bhn_f"], p["whh_b"], p["bhn_b"])

    output = jnp.transpose(out_tm[:, :, :H], (1, 0, 2))                # (B, T, H)
    hidden = hid[None, :, :H]                                          # (1, B, H)
    return output, hidden


def _encoder_ref(sentence, lengths, params):
    """Pure-JAX f32 reference with identical packed-GRU semantics (for checking)."""
    emb = params["embedding"]
    H = params["w_hh_f"].shape[1]
    x = jnp.take(emb, sentence.astype(jnp.int32), axis=0)
    B, T, E = x.shape
    lengths = jnp.asarray(lengths, jnp.int32)
    mask = (jnp.arange(T)[:, None] < lengths[None, :]).astype(jnp.float32)[:, :, None]

    def cell(xt, h, w_ih, w_hh, b_ih, b_hh):
        gx = xt @ w_ih.T + b_ih
        gh = h @ w_hh.T + b_hh
        r = jax.nn.sigmoid(gx[:, :H] + gh[:, :H])
        z = jax.nn.sigmoid(gx[:, H:2 * H] + gh[:, H:2 * H])
        n = jnp.tanh(gx[:, 2 * H:] + r * gh[:, 2 * H:])
        return (1.0 - z) * n + z * h

    x_tm = jnp.transpose(x, (1, 0, 2))
    h0 = jnp.zeros((B, H), jnp.float32)

    def fwd_step(h, inp):
        xt, m = inp
        h_new = cell(xt, h, params["w_ih_f"], params["w_hh_f"],
                     params["b_ih_f"], params["b_hh_f"])
        h = m * h_new + (1.0 - m) * h
        return h, h * m

    h_f, out_f = lax.scan(fwd_step, h0, (x_tm, mask))

    def bwd_step(h, inp):
        xt, m = inp
        h_new = cell(xt, h, params["w_ih_b"], params["w_hh_b"],
                     params["b_ih_b"], params["b_hh_b"])
        h = m * h_new + (1.0 - m) * h
        return h, h * m

    h_b, out_b = lax.scan(bwd_step, h0, (x_tm[::-1], mask[::-1]))
    out_b = out_b[::-1]

    output = jnp.transpose((out_f + out_b) * 0.5, (1, 0, 2))
    hidden = ((h_f + h_b) * 0.5)[None, :, :]
    return output, hidden


if __name__ == "__main__":
    # Small config consistent with the module: words_number, emb_size, hidden, maxlen.
    WORDS, EMB, HIDDEN, MAXLEN, BATCH = 50, 32, 32, 8, 2

    key = jax.random.PRNGKey(0)
    pkey, skey = jax.random.split(key)
    params = make_encoder_params(pkey, WORDS, EMB, HIDDEN)

    sentence = jax.random.randint(skey, (BATCH, MAXLEN), 0, WORDS, dtype=jnp.int32)
    lengths = [8, 5]  # descending, as pack_padded_sequence requires

    output, hidden = encoder_forward(sentence, lengths, params)
    output = jax.block_until_ready(output)
    hidden = jax.block_until_ready(hidden)

    assert output.shape == (BATCH, MAXLEN, HIDDEN)
    assert hidden.shape == (1, BATCH, HIDDEN)

    # Check against a pure-f32 JAX reference. The kernel uses bf16 MXU operands / bf16 gate
    # and backward-output scratches with f32 accumulation and f32 gate math, so allow a
    # loose-ish tolerance (observed error is O(1e-3) at these magnitudes).
    out_ref, hid_ref = _encoder_ref(sentence, lengths, params)
    assert jnp.allclose(output, out_ref, atol=2e-2, rtol=2e-2), \
        float(jnp.max(jnp.abs(output - out_ref)))
    assert jnp.allclose(hidden, hid_ref, atol=2e-2, rtol=2e-2), \
        float(jnp.max(jnp.abs(hidden - hid_ref)))

    print("KERNEL_OK")
</pallas_src>

<mosaic_0001>
module attributes {stable_mosaic.version = 11 : i64} {
  func.func @_bigru_kernel(%arg0: memref<16x32xbf16, #tpu.memory_space<vmem>>, %arg1: memref<2x128xi32, #tpu.memory_space<vmem>>, %arg2: memref<32x384xbf16, #tpu.memory_space<vmem>>, %arg3: memref<32x384xbf16, #tpu.memory_space<vmem>>, %arg4: memref<1x384xf32, #tpu.memory_space<vmem>>, %arg5: memref<1x384xf32, #tpu.memory_space<vmem>>, %arg6: memref<128x384xbf16, #tpu.memory_space<vmem>>, %arg7: memref<1x128xf32, #tpu.memory_space<vmem>>, %arg8: memref<128x384xbf16, #tpu.memory_space<vmem>>, %arg9: memref<1x128xf32, #tpu.memory_space<vmem>>, %arg10: memref<8x2x128xf32, #tpu.memory_space<vmem>>, %arg11: memref<2x128xf32, #tpu.memory_space<vmem>>, %arg12: memref<8x2x384xbf16, #tpu.memory_space<vmem>>, %arg13: memref<8x2x384xbf16, #tpu.memory_space<vmem>>, %arg14: memref<8x2x128xbf16, #tpu.memory_space<vmem>>) attributes {dimension_semantics = [], scalar_prefetch = 0 : i64, scratch_operands = 3 : i64, tpu.core_type = #tpu.core_type<tc>} {
    %c0 = arith.constant 0 : index
    %c0_0 = arith.constant 0 : index
    %0 = vector.load %arg0[%c0, %c0_0] : memref<16x32xbf16, #tpu.memory_space<vmem>>, vector<16x32xbf16>
    %c0_1 = arith.constant 0 : index
    %c0_2 = arith.constant 0 : index
    %1 = vector.load %arg2[%c0_1, %c0_2] : memref<32x384xbf16, #tpu.memory_space<vmem>>, vector<32x384xbf16>
    %cst = arith.constant dense<0.000000e+00> : vector<16x384xf32>
    %2 = tpu.matmul %0, %1, %cst {dimension_numbers = #tpu.dot_dimension_numbers<[1], [0], [0], [1], [0, 0, 1, 1], [], []>} : vector<16x32xbf16>, vector<32x384xbf16>, vector<16x384xf32> -> vector<16x384xf32>
    %c0_3 = arith.constant 0 : index
    %c0_4 = arith.constant 0 : index
    %3 = vector.load %arg4[%c0_3, %c0_4] : memref<1x384xf32, #tpu.memory_space<vmem>>, vector<1x384xf32>
    %4 = vector.broadcast %3 : vector<1x384xf32> to vector<16x384xf32>
    %5 = arith.addf %2, %4 : vector<16x384xf32>
    %6 = arith.truncf %5 : vector<16x384xf32> to vector<16x384xbf16>
    %7 = vector.shape_cast %6 : vector<16x384xbf16> to vector<8x2x384xbf16>
    %c0_5 = arith.constant 0 : index
    %c0_6 = arith.constant 0 : index
    %c0_7 = arith.constant 0 : index
    %8 = vector.load %arg12[%c0_5, %c0_6, %c0_7] : memref<8x2x384xbf16, #tpu.memory_space<vmem>>, vector<8x2x384xbf16>
    tpu.vector_store %arg12[%c0_5, %c0_6, %c0_7], %7 {strides = array<i32>} : memref<8x2x384xbf16, #tpu.memory_space<vmem>>, vector<8x2x384xbf16>,
    %c0_8 = arith.constant 0 : index
    %c0_9 = arith.constant 0 : index
    %9 = vector.load %arg0[%c0_8, %c0_9] : memref<16x32xbf16, #tpu.memory_space<vmem>>, vector<16x32xbf16>
    %c0_10 = arith.constant 0 : index
    %c0_11 = arith.constant 0 : index
    %10 = vector.load %arg3[%c0_10, %c0_11] : memref<32x384xbf16, #tpu.memory_space<vmem>>, vector<32x384xbf16>
    %cst_12 = arith.constant dense<0.000000e+00> : vector<16x384xf32>
    %11 = tpu.matmul %9, %10, %cst_12 {dimension_numbers = #tpu.dot_dimension_numbers<[1], [0], [0], [1], [0, 0, 1, 1], [], []>} : vector<16x32xbf16>, vector<32x384xbf16>, vector<16x384xf32> -> vector<16x384xf32>
    %c0_13 = arith.constant 0 : index
    %c0_14 = arith.constant 0 : index
    %12 = vector.load %arg5[%c0_13, %c0_14] : memref<1x384xf32, #tpu.memory_space<vmem>>, vector<1x384xf32>
    %13 = vector.broadcast %12 : vector<1x384xf32> to vector<16x384xf32>
    %14 = arith.addf %11, %13 : vector<16x384xf32>
    %15 = arith.truncf %14 : vector<16x384xf32> to vector<16x384xbf16>
    %16 = vector.shape_cast %15 : vector<16x384xbf16> to vector<8x2x384xbf16>
    %c0_15 = arith.constant 0 : index
    %c0_16 = arith.constant 0 : index
    %c0_17 = arith.constant 0 : index
    %17 = vector.load %arg13[%c0_15, %c0_16, %c0_17] : memref<8x2x384xbf16, #tpu.memory_space<vmem>>, vector<8x2x384xbf16>
    tpu.vector_store %arg13[%c0_15, %c0_16, %c0_17], %16 {strides = array<i32>} : memref<8x2x384xbf16, #tpu.memory_space<vmem>>, vector<8x2x384xbf16>,
    %c0_18 = arith.constant 0 : index
    %c0_19 = arith.constant 0 : index
    %18 = vector.load %arg1[%c0_18, %c0_19] : memref<2x128xi32, #tpu.memory_space<vmem>>, vector<2x128xi32>
    %c0_20 = arith.constant 0 : index
    %c0_21 = arith.constant 0 : index
    %19 = vector.load %arg7[%c0_20, %c0_21] : memref<1x128xf32, #tpu.memory_space<vmem>>, vector<1x128xf32>
    %20 = vector.shape_cast %19 : vector<1x128xf32> to vector<1x128xf32>
    %21 = vector.broadcast %20 : vector<1x128xf32> to vector<2x128xf32>
    %c0_22 = arith.constant 0 : index
    %c0_23 = arith.constant 0 : index
    %22 = vector.load %arg9[%c0_22, %c0_23] : memref<1x128xf32, #tpu.memory_space<vmem>>, vector<1x128xf32>
    %23 = vector.shape_cast %22 : vector<1x128xf32> to vector<1x128xf32>
    %24 = vector.broadcast %23 : vector<1x128xf32> to vector<2x128xf32>
    %cst_24 = arith.constant 0.000000e+00 : f32
    %25 = vector.broadcast %cst_24 : f32 to vector<2x128xf32>
    %c0_i32 = arith.constant 0 : i32
    %c7_i32 = arith.constant 7 : i32
    %26 = arith.subi %c7_i32, %c0_i32 : i32
    %27 = vector.broadcast %c0_i32 : i32 to vector<2x128xi32>
    %28 = arith.cmpi slt, %27, %18 : vector<2x128xi32>
    %29 = arith.extui %28 : vector<2x128xi1> to vector<2x128xi32>
    %30 = arith.sitofp %29 : vector<2x128xi32> to vector<2x128xf32>
    %31 = vector.broadcast %26 : i32 to vector<2x128xi32>
    %32 = arith.cmpi slt, %31, %18 : vector<2x128xi32>
    %33 = arith.extui %32 : vector<2x128xi1> to vector<2x128xi32>
    %34 = arith.sitofp %33 : vector<2x128xi32> to vector<2x128xf32>
    %35 = arith.index_cast %c0_i32 : i32 to index
    %c0_25 = arith.constant 0 : index
    %c0_26 = arith.constant 0 : index
    %36 = vector.load %arg12[%35, %c0_25, %c0_26] : memref<8x2x384xbf16, #tpu.memory_space<vmem>>, vector<1x2x384xbf16>
    %37 = vector.shape_cast %36 : vector<1x2x384xbf16> to vector<2x384xbf16>
    %38 = arith.extf %37 : vector<2x384xbf16> to vector<2x384xf32>
    %39 = arith.index_cast %26 : i32 to index
    %c0_27 = arith.constant 0 : index
    %c0_28 = arith.constant 0 : index
    %40 = vector.load %arg13[%39, %c0_27, %c0_28] : memref<8x2x384xbf16, #tpu.memory_space<vmem>>, vector<1x2x384xbf16>
    %41 = vector.shape_cast %40 : vector<1x2x384xbf16> to vector<2x384xbf16>
    %42 = arith.extf %41 : vector<2x384xbf16> to vector<2x384xf32>
    %43 = arith.truncf %25 : vector<2x128xf32> to vector<2x128xbf16>
    %c0_29 = arith.constant 0 : index
    %c0_30 = arith.constant 0 : index
    %44 = vector.load %arg6[%c0_29, %c0_30] : memref<128x384xbf16, #tpu.memory_space<vmem>>, vector<128x384xbf16>
    %cst_31 = arith.constant dense<0.000000e+00> : vector<2x384xf32>
    %45 = tpu.matmul %43, %44, %cst_31 {dimension_numbers = #tpu.dot_dimension_numbers<[1], [0], [0], [1], [0, 0, 1, 1], [], []>} : vector<2x128xbf16>, vector<128x384xbf16>, vector<2x384xf32> -> vector<2x384xf32>
    %46 = vector.extract_strided_slice %38 {offsets = [0, 0], sizes = [2, 128], strides = [1, 1]} : vector<2x384xf32> to vector<2x128xf32>
    %47 = vector.extract_strided_slice %45 {offsets = [0, 0], sizes = [2, 128], strides = [1, 1]} : vector<2x384xf32> to vector<2x128xf32>
    %48 = arith.addf %46, %47 : vector<2x128xf32>
    %49 = arith.negf %48 : vector<2x128xf32>
    %50 = math.exp %49 : vector<2x128xf32>
    %cst_32 = arith.constant 1.000000e+00 : f32
    %51 = vector.broadcast %cst_32 : f32 to vector<2x128xf32>
    %52 = arith.addf %51, %50 : vector<2x128xf32>
    %53 = arith.divf %51, %52 : vector<2x128xf32>
    %54 = vector.extract_strided_slice %38 {offsets = [0, 128], sizes = [2, 128], strides = [1, 1]} : vector<2x384xf32> to vector<2x128xf32>
    %55 = vector.extract_strided_slice %45 {offsets = [0, 128], sizes = [2, 128], strides = [1, 1]} : vector<2x384xf32> to vector<2x128xf32>
    %56 = arith.addf %54, %55 : vector<2x128xf32>
    %57 = arith.negf %56 : vector<2x128xf32>
    %58 = math.exp %57 : vector<2x128xf32>
    %cst_33 = arith.constant 1.000000e+00 : f32
    %59 = vector.broadcast %cst_33 : f32 to vector<2x128xf32>
    %60 = arith.addf %59, %58 : vector<2x128xf32>
    %61 = arith.divf %59, %60 : vector<2x128xf32>
    %62 = vector.extract_strided_slice %38 {offsets = [0, 256], sizes = [2, 128], strides = [1, 1]} : vector<2x384xf32> to vector<2x128xf32>
    %63 = vector.extract_strided_slice %45 {offsets = [0, 256], sizes = [2, 128], strides = [1, 1]} : vector<2x384xf32> to vector<2x128xf32>
    %64 = arith.addf %63, %21 : vector<2x128xf32>
    %65 = arith.mulf %53, %64 : vector<2x128xf32>
    %66 = arith.addf %62, %65 : vector<2x128xf32>
    %67 = math.tanh %66 : vector<2x128xf32>
    %68 = arith.subf %25, %67 : vector<2x128xf32>
    %69 = arith.mulf %61, %68 : vector<2x128xf32>
    %70 = arith.addf %67, %69 : vector<2x128xf32>
    %71 = arith.truncf %25 : vector<2x128xf32> to vector<2x128xbf16>
    %c0_34 = arith.constant 0 : index
    %c0_35 = arith.constant 0 : index
    %72 = vector.load %arg8[%c0_34, %c0_35] : memref<128x384xbf16, #tpu.memory_space<vmem>>, vector<128x384xbf16>
    %cst_36 = arith.constant dense<0.000000e+00> : vector<2x384xf32>
    %73 = tpu.matmul %71, %72, %cst_36 {dimension_numbers = #tpu.dot_dimension_numbers<[1], [0], [0], [1], [0, 0, 1, 1], [], []>} : vector<2x128xbf16>, vector<128x384xbf16>, vector<2x384xf32> -> vector<2x384xf32>
    %74 = vector.extract_strided_slice %42 {offsets = [0, 0], sizes = [2, 128], strides = [1, 1]} : vector<2x384xf32> to vector<2x128xf32>
    %75 = vector.extract_strided_slice %73 {offsets = [0, 0], sizes = [2, 128], strides = [1, 1]} : vector<2x384xf32> to vector<2x128xf32>
    %76 = arith.addf %74, %75 : vector<2x128xf32>
    %77 = arith.negf %76 : vector<2x128xf32>
    %78 = math.exp %77 : vector<2x128xf32>
    %cst_37 = arith.constant 1.000000e+00 : f32
    %79 = vector.broadcast %cst_37 : f32 to vector<2x128xf32>
    %80 = arith.addf %79, %78 : vector<2x128xf32>
    %81 = arith.divf %79, %80 : vector<2x128xf32>
    %82 = vector.extract_strided_slice %42 {offsets = [0, 128], sizes = [2, 128], strides = [1, 1]} : vector<2x384xf32> to vector<2x128xf32>
    %83 = vector.extract_strided_slice %73 {offsets = [0, 128], sizes = [2, 128], strides = [1, 1]} : vector<2x384xf32> to vector<2x128xf32>
    %84 = arith.addf %82, %83 : vector<2x128xf32>
    %85 = arith.negf %84 : vector<2x128xf32>
    %86 = math.exp %85 : vector<2x128xf32>
    %cst_38 = arith.constant 1.000000e+00 : f32
    %87 = vector.broadcast %cst_38 : f32 to vector<2x128xf32>
    %88 = arith.addf %87, %86 : vector<2x128xf32>
    %89 = arith.divf %87, %88 : vector<2x128xf32>
    %90 = vector.extract_strided_slice %42 {offsets = [0, 256], sizes = [2, 128], strides = [1, 1]} : vector<2x384xf32> to vector<2x128xf32>
    %91 = vector.extract_strided_slice %73 {offsets = [0, 256], sizes = [2, 128], strides = [1, 1]} : vector<2x384xf32> to vector<2x128xf32>
    %92 = arith.addf %91, %24 : vector<2x128xf32>
    %93 = arith.mulf %81, %92 : vector<2x128xf32>
    %94 = arith.addf %90, %93 : vector<2x128xf32>
    %95 = math.tanh %94 : vector<2x128xf32>
    %96 = arith.subf %25, %95 : vector<2x128xf32>
    %97 = arith.mulf %89, %96 : vector<2x128xf32>
    %98 = arith.addf %95, %97 : vector<2x128xf32>
    %99 = arith.subf %70, %25 : vector<2x128xf32>
    %100 = arith.mulf %30, %99 : vector<2x128xf32>
    %101 = arith.addf %25, %100 : vector<2x128xf32>
    %102 = arith.subf %98, %25 : vector<2x128xf32>
    %103 = arith.mulf %34, %102 : vector<2x128xf32>
    %104 = arith.addf %25, %103 : vector<2x128xf32>
    %105 = arith.mulf %101, %30 : vector<2x128xf32>
    %106 = arith.index_cast %c0_i32 : i32 to index
    %c0_39 = arith.constant 0 : index
    %c0_40 = arith.constant 0 : index
    %107 = vector.load %arg10[%106, %c0_39, %c0_40] : memref<8x2x128xf32, #tpu.memory_space<vmem>>, vector<1x2x128xf32>
    %108 = vector.shape_cast %107 : vector<1x2x128xf32> to vector<2x128xf32>
    %109 = vector.shape_cast %105 : vector<2x128xf32> to vector<1x2x128xf32>
    tpu.vector_store %arg10[%106, %c0_39, %c0_40], %109 {strides = array<i32>} : memref<8x2x128xf32, #tpu.memory_space<vmem>>, vector<1x2x128xf32>,
    %110 = arith.mulf %104, %34 : vector<2x128xf32>
    %111 = arith.truncf %110 : vector<2x128xf32> to vector<2x128xbf16>
    %112 = arith.index_cast %26 : i32 to index
    %c0_41 = arith.constant 0 : index
    %c0_42 = arith.constant 0 : index
    %113 = vector.load %arg14[%112, %c0_41, %c0_42] : memref<8x2x128xbf16, #tpu.memory_space<vmem>>, vector<1x2x128xbf16>
    %114 = vector.shape_cast %113 : vector<1x2x128xbf16> to vector<2x128xbf16>
    %115 = vector.shape_cast %111 : vector<2x128xbf16> to vector<1x2x128xbf16>
    tpu.vector_store %arg14[%112, %c0_41, %c0_42], %115 {strides = array<i32>} : memref<8x2x128xbf16, #tpu.memory_space<vmem>>, vector<1x2x128xbf16>,
    %c1_i32 = arith.constant 1 : i32
    %c7_i32_43 = arith.constant 7 : i32
    %116 = arith.subi %c7_i32_43, %c1_i32 : i32
    %117 = vector.broadcast %c1_i32 : i32 to vector<2x128xi32>
    %118 = arith.cmpi slt, %117, %18 : vector<2x128xi32>
    %119 = arith.extui %118 : vector<2x128xi1> to vector<2x128xi32>
    %120 = arith.sitofp %119 : vector<2x128xi32> to vector<2x128xf32>
    %121 = vector.broadcast %116 : i32 to vector<2x128xi32>
    %122 = arith.cmpi slt, %121, %18 : vector<2x128xi32>
    %123 = arith.extui %122 : vector<2x128xi1> to vector<2x128xi32>
    %124 = arith.sitofp %123 : vector<2x128xi32> to vector<2x128xf32>
    %125 = arith.index_cast %c1_i32 : i32 to index
    %c0_44 = arith.constant 0 : index
    %c0_45 = arith.constant 0 : index
    %126 = vector.load %arg12[%125, %c0_44, %c0_45] : memref<8x2x384xbf16, #tpu.memory_space<vmem>>, vector<1x2x384xbf16>
    %127 = vector.shape_cast %126 : vector<1x2x384xbf16> to vector<2x384xbf16>
    %128 = arith.extf %127 : vector<2x384xbf16> to vector<2x384xf32>
    %129 = arith.index_cast %116 : i32 to index
    %c0_46 = arith.constant 0 : index
    %c0_47 = arith.constant 0 : index
    %130 = vector.load %arg13[%129, %c0_46, %c0_47] : memref<8x2x384xbf16, #tpu.memory_space<vmem>>, vector<1x2x384xbf16>
    %131 = vector.shape_cast %130 : vector<1x2x384xbf16> to vector<2x384xbf16>
    %132 = arith.extf %131 : vector<2x384xbf16> to vector<2x384xf32>
    %133 = arith.truncf %101 : vector<2x128xf32> to vector<2x128xbf16>
    %c0_48 = arith.constant 0 : index
    %c0_49 = arith.constant 0 : index
    %134 = vector.load %arg6[%c0_48, %c0_49] : memref<128x384xbf16, #tpu.memory_space<vmem>>, vector<128x384xbf16>
    %cst_50 = arith.constant dense<0.000000e+00> : vector<2x384xf32>
    %135 = tpu.matmul %133, %134, %cst_50 {dimension_numbers = #tpu.dot_dimension_numbers<[1], [0], [0], [1], [0, 0, 1, 1], [], []>} : vector<2x128xbf16>, vector<128x384xbf16>, vector<2x384xf32> -> vector<2x384xf32>
    %136 = vector.extract_strided_slice %128 {offsets = [0, 0], sizes = [2, 128], strides = [1, 1]} : vector<2x384xf32> to vector<2x128xf32>
    %137 = vector.extract_strided_slice %135 {offsets = [0, 0], sizes = [2, 128], strides = [1, 1]} : vector<2x384xf32> to vector<2x128xf32>
    %138 = arith.addf %136, %137 : vector<2x128xf32>
    %139 = arith.negf %138 : vector<2x128xf32>
    %140 = math.exp %139 : vector<2x128xf32>
    %cst_51 = arith.constant 1.000000e+00 : f32
    %141 = vector.broadcast %cst_51 : f32 to vector<2x128xf32>
    %142 = arith.addf %141, %140 : vector<2x128xf32>
    %143 = arith.divf %141, %142 : vector<2x128xf32>
    %144 = vector.extract_strided_slice %128 {offsets = [0, 128], sizes = [2, 128], strides = [1, 1]} : vector<2x384xf32> to vector<2x128xf32>
    %145 = vector.extract_strided_slice %135 {offsets = [0, 128], sizes = [2, 128], strides = [1, 1]} : vector<2x384xf32> to vector<2x128xf32>
    %146 = arith.addf %144, %145 : vector<2x128xf32>
    %147 = arith.negf %146 : vector<2x128xf32>
    %148 = math.exp %147 : vector<2x128xf32>
    %cst_52 = arith.constant 1.000000e+00 : f32
    %149 = vector.broadcast %cst_52 : f32 to vector<2x128xf32>
    %150 = arith.addf %149, %148 : vector<2x128xf32>
    %151 = arith.divf %149, %150 : vector<2x128xf32>
    %152 = vector.extract_strided_slice %128 {offsets = [0, 256], sizes = [2, 128], strides = [1, 1]} : vector<2x384xf32> to vector<2x128xf32>
    %153 = vector.extract_strided_slice %135 {offsets = [0, 256], sizes = [2, 128], strides = [1, 1]} : vector<2x384xf32> to vector<2x128xf32>
    %154 = arith.addf %153, %21 : vector<2x128xf32>
    %155 = arith.mulf %143, %154 : vector<2x128xf32>
    %156 = arith.addf %152, %155 : vector<2x128xf32>
    %157 = math.tanh %156 : vector<2x128xf32>
    %158 = arith.subf %101, %157 : vector<2x128xf32>
    %159 = arith.mulf %151, %158 : vector<2x128xf32>
    %160 = arith.addf %157, %159 : vector<2x128xf32>
    %161 = arith.truncf %104 : vector<2x128xf32> to vector<2x128xbf16>
    %c0_53 = arith.constant 0 : index
    %c0_54 = arith.constant 0 : index
    %162 = vector.load %arg8[%c0_53, %c0_54] : memref<128x384xbf16, #tpu.memory_space<vmem>>, vector<128x384xbf16>
    %cst_55 = arith.constant dense<0.000000e+00> : vector<2x384xf32>
    %163 = tpu.matmul %161, %162, %cst_55 {dimension_numbers = #tpu.dot_dimension_numbers<[1], [0], [0], [1], [0, 0, 1, 1], [], []>} : vector<2x128xbf16>, vector<128x384xbf16>, vector<2x384xf32> -> vector<2x384xf32>
    %164 = vector.extract_strided_slice %132 {offsets = [0, 0], sizes = [2, 128], strides = [1, 1]} : vector<2x384xf32> to vector<2x128xf32>
    %165 = vector.extract_strided_slice %163 {offsets = [0, 0], sizes = [2, 128], strides = [1, 1]} : vector<2x384xf32> to vector<2x128xf32>
    %166 = arith.addf %164, %165 : vector<2x128xf32>
    %167 = arith.negf %166 : vector<2x128xf32>
    %168 = math.exp %167 : vector<2x128xf32>
    %cst_56 = arith.constant 1.000000e+00 : f32
    %169 = vector.broadcast %cst_56 : f32 to vector<2x128xf32>
    %170 = arith.addf %169, %168 : vector<2x128xf32>
    %171 = arith.divf %169, %170 : vector<2x128xf32>
    %172 = vector.extract_strided_slice %132 {offsets = [0, 128], sizes = [2, 128], strides = [1, 1]} : vector<2x384xf32> to vector<2x128xf32>
    %173 = vector.extract_strided_slice %163 {offsets = [0, 128], sizes = [2, 128], strides = [1, 1]} : vector<2x384xf32> to vector<2x128xf32>
    %174 = arith.addf %172, %173 : vector<2x128xf32>
    %175 = arith.negf %174 : vector<2x128xf32>
    %176 = math.exp %175 : vector<2x128xf32>
    %cst_57 = arith.constant 1.000000e+00 : f32
    %177 = vector.broadcast %cst_57 : f32 to vector<2x128xf32>
    %178 = arith.addf %177, %176 : vector<2x128xf32>
    %179 = arith.divf %177, %178 : vector<2x128xf32>
    %180 = vector.extract_strided_slice %132 {offsets = [0, 256], sizes = [2, 128], strides = [1, 1]} : vector<2x384xf32> to vector<2x128xf32>
    %181 = vector.extract_strided_slice %163 {offsets = [0, 256], sizes = [2, 128], strides = [1, 1]} : vector<2x384xf32> to vector<2x128xf32>
    %182 = arith.addf %181, %24 : vector<2x128xf32>
    %183 = arith.mulf %171, %182 : vector<2x128xf32>
    %184 = arith.addf %180, %183 : vector<2x128xf32>
    %185 = math.tanh %184 : vector<2x128xf32>
    %186 = arith.subf %104, %185 : vector<2x128xf32>
    %187 = arith.mulf %179, %186 : vector<2x128xf32>
    %188 = arith.addf %185, %187 : vector<2x128xf32>
    %189 = arith.subf %160, %101 : vector<2x128xf32>
    %190 = arith.mulf %120, %189 : vector<2x128xf32>
    %191 = arith.addf %101, %190 : vector<2x128xf32>
    %192 = arith.subf %188, %104 : vector<2x128xf32>
    %193 = arith.mulf %124, %192 : vector<2x128xf32>
    %194 = arith.addf %104, %193 : vector<2x128xf32>
    %195 = arith.mulf %191, %120 : vector<2x128xf32>
    %196 = arith.index_cast %c1_i32 : i32 to index
    %c0_58 = arith.constant 0 : index
    %c0_59 = arith.constant 0 : index
    %197 = vector.load %arg10[%196, %c0_58, %c0_59] : memref<8x2x128xf32, #tpu.memory_space<vmem>>, vector<1x2x128xf32>
    %198 = vector.shape_cast %197 : vector<1x2x128xf32> to vector<2x128xf32>
    %199 = vector.shape_cast %195 : vector<2x128xf32> to vector<1x2x128xf32>
    tpu.vector_store %arg10[%196, %c0_58, %c0_59], %199 {strides = array<i32>} : memref<8x2x128xf32, #tpu.memory_space<vmem>>, vector<1x2x128xf32>,
    %200 = arith.mulf %194, %124 : vector<2x128xf32>
    %201 = arith.truncf %200 : vector<2x128xf32> to vector<2x128xbf16>
    %202 = arith.index_cast %116 : i32 to index
    %c0_60 = arith.constant 0 : index
    %c0_61 = arith.constant 0 : index
    %203 = vector.load %arg14[%202, %c0_60, %c0_61] : memref<8x2x128xbf16, #tpu.memory_space<vmem>>, vector<1x2x128xbf16>
    %204 = vector.shape_cast %203 : vector<1x2x128xbf16> to vector<2x128xbf16>
    %205 = vector.shape_cast %201 : vector<2x128xbf16> to vector<1x2x128xbf16>
    tpu.vector_store %arg14[%202, %c0_60, %c0_61], %205 {strides = array<i32>} : memref<8x2x128xbf16, #tpu.memory_space<vmem>>, vector<1x2x128xbf16>,
    %c2_i32 = arith.constant 2 : i32
    %c7_i32_62 = arith.constant 7 : i32
    %206 = arith.subi %c7_i32_62, %c2_i32 : i32
    %207 = vector.broadcast %c2_i32 : i32 to vector<2x128xi32>
    %208 = arith.cmpi slt, %207, %18 : vector<2x128xi32>
    %209 = arith.extui %208 : vector<2x128xi1> to vector<2x128xi32>
    %210 = arith.sitofp %209 : vector<2x128xi32> to vector<2x128xf32>
    %211 = vector.broadcast %206 : i32 to vector<2x128xi32>
    %212 = arith.cmpi slt, %211, %18 : vector<2x128xi32>
    %213 = arith.extui %212 : vector<2x128xi1> to vector<2x128xi32>
    %214 = arith.sitofp %213 : vector<2x128xi32> to vector<2x128xf32>
    %215 = arith.index_cast %c2_i32 : i32 to index
    %c0_63 = arith.constant 0 : index
    %c0_64 = arith.constant 0 : index
    %216 = vector.load %arg12[%215, %c0_63, %c0_64] : memref<8x2x384xbf16, #tpu.memory_space<vmem>>, vector<1x2x384xbf16>
    %217 = vector.shape_cast %216 : vector<1x2x384xbf16> to vector<2x384xbf16>
    %218 = arith.extf %217 : vector<2x384xbf16> to vector<2x384xf32>
    %219 = arith.index_cast %206 : i32 to index
    %c0_65 = arith.constant 0 : index
    %c0_66 = arith.constant 0 : index
    %220 = vector.load %arg13[%219, %c0_65, %c0_66] : memref<8x2x384xbf16, #tpu.memory_space<vmem>>, vector<1x2x384xbf16>
    %221 = vector.shape_cast %220 : vector<1x2x384xbf16> to vector<2x384xbf16>
    %222 = arith.extf %221 : vector<2x384xbf16> to vector<2x384xf32>
    %223 = arith.truncf %191 : vector<2x128xf32> to vector<2x128xbf16>
    %c0_67 = arith.constant 0 : index
    %c0_68 = arith.constant 0 : index
    %224 = vector.load %arg6[%c0_67, %c0_68] : memref<128x384xbf16, #tpu.memory_space<vmem>>, vector<128x384xbf16>
    %cst_69 = arith.constant dense<0.000000e+00> : vector<2x384xf32>
    %225 = tpu.matmul %223, %224, %cst_69 {dimension_numbers = #tpu.dot_dimension_numbers<[1], [0], [0], [1], [0, 0, 1, 1], [], []>} : vector<2x128xbf16>, vector<128x384xbf16>, vector<2x384xf32> -> vector<2x384xf32>
    %226 = vector.extract_strided_slice %218 {offsets = [0, 0], sizes = [2, 128], strides = [1, 1]} : vector<2x384xf32> to vector<2x128xf32>
    %227 = vector.extract_strided_slice %225 {offsets = [0, 0], sizes = [2, 128], strides = [1, 1]} : vector<2x384xf32> to vector<2x128xf32>
    %228 = arith.addf %226, %227 : vector<2x128xf32>
    %229 = arith.negf %228 : vector<2x128xf32>
    %230 = math.exp %229 : vector<2x128xf32>
    %cst_70 = arith.constant 1.000000e+00 : f32
    %231 = vector.broadcast %cst_70 : f32 to vector<2x128xf32>
    %232 = arith.addf %231, %230 : vector<2x128xf32>
    %233 = arith.divf %231, %232 : vector<2x128xf32>
    %234 = vector.extract_strided_slice %218 {offsets = [0, 128], sizes = [2, 128], strides = [1, 1]} : vector<2x384xf32> to vector<2x128xf32>
    %235 = vector.extract_strided_slice %225 {offsets = [0, 128], sizes = [2, 128], strides = [1, 1]} : vector<2x384xf32> to vector<2x128xf32>
    %236 = arith.addf %234, %235 : vector<2x128xf32>
    %237 = arith.negf %236 : vector<2x128xf32>
    %238 = math.exp %237 : vector<2x128xf32>
    %cst_71 = arith.constant 1.000000e+00 : f32
    %239 = vector.broadcast %cst_71 : f32 to vector<2x128xf32>
    %240 = arith.addf %239, %238 : vector<2x128xf32>
    %241 = arith.divf %239, %240 : vector<2x128xf32>
    %242 = vector.extract_strided_slice %218 {offsets = [0, 256], sizes = [2, 128], strides = [1, 1]} : vector<2x384xf32> to vector<2x128xf32>
    %243 = vector.extract_strided_slice %225 {offsets = [0, 256], sizes = [2, 128], strides = [1, 1]} : vector<2x384xf32> to vector<2x128xf32>
    %244 = arith.addf %243, %21 : vector<2x128xf32>
    %245 = arith.mulf %233, %244 : vector<2x128xf32>
    %246 = arith.addf %242, %245 : vector<2x128xf32>
    %247 = math.tanh %246 : vector<2x128xf32>
    %248 = arith.subf %191, %247 : vector<2x128xf32>
    %249 = arith.mulf %241, %248 : vector<2x128xf32>
    %250 = arith.addf %247, %249 : vector<2x128xf32>
    %251 = arith.truncf %194 : vector<2x128xf32> to vector<2x128xbf16>
    %c0_72 = arith.constant 0 : index
    %c0_73 = arith.constant 0 : index
    %252 = vector.load %arg8[%c0_72, %c0_73] : memref<128x384xbf16, #tpu.memory_space<vmem>>, vector<128x384xbf16>
    %cst_74 = arith.constant dense<0.000000e+00> : vector<2x384xf32>
    %253 = tpu.matmul %251, %252, %cst_74 {dimension_numbers = #tpu.dot_dimension_numbers<[1], [0], [0], [1], [0, 0, 1, 1], [], []>} : vector<2x128xbf16>, vector<128x384xbf16>, vector<2x384xf32> -> vector<2x384xf32>
    %254 = vector.extract_strided_slice %222 {offsets = [0, 0], sizes = [2, 128], strides = [1, 1]} : vector<2x384xf32> to vector<2x128xf32>
    %255 = vector.extract_strided_slice %253 {offsets = [0, 0], sizes = [2, 128], strides = [1, 1]} : vector<2x384xf32> to vector<2x128xf32>
    %256 = arith.addf %254, %255 : vector<2x128xf32>
    %257 = arith.negf %256 : vector<2x128xf32>
    %258 = math.exp %257 : vector<2x128xf32>
    %cst_75 = arith.constant 1.000000e+00 : f32
    %259 = vector.broadcast %cst_75 : f32 to vector<2x128xf32>
    %260 = arith.addf %259, %258 : vector<2x128xf32>
    %261 = arith.divf %259, %260 : vector<2x128xf32>
    %262 = vector.extract_strided_slice %222 {offsets = [0, 128], sizes = [2, 128], strides = [1, 1]} : vector<2x384xf32> to vector<2x128xf32>
    %263 = vector.extract_strided_slice %253 {offsets = [0, 128], sizes = [2, 128], strides = [1, 1]} : vector<2x384xf32> to vector<2x128xf32>
    %264 = arith.addf %262, %263 : vector<2x128xf32>
    %265 = arith.negf %264 : vector<2x128xf32>
    %266 = math.exp %265 : vector<2x128xf32>
    %cst_76 = arith.constant 1.000000e+00 : f32
    %267 = vector.broadcast %cst_76 : f32 to vector<2x128xf32>
    %268 = arith.addf %267, %266 : vector<2x128xf32>
    %269 = arith.divf %267, %268 : vector<2x128xf32>
    %270 = vector.extract_strided_slice %222 {offsets = [0, 256], sizes = [2, 128], strides = [1, 1]} : vector<2x384xf32> to vector<2x128xf32>
    %271 = vector.extract_strided_slice %253 {offsets = [0, 256], sizes = [2, 128], strides = [1, 1]} : vector<2x384xf32> to vector<2x128xf32>
    %272 = arith.addf %271, %24 : vector<2x128xf32>
    %273 = arith.mulf %261, %272 : vector<2x128xf32>
    %274 = arith.addf %270, %273 : vector<2x128xf32>
    %275 = math.tanh %274 : vector<2x128xf32>
    %276 = arith.subf %194, %275 : vector<2x128xf32>
    %277 = arith.mulf %269, %276 : vector<2x128xf32>
    %278 = arith.addf %275, %277 : vector<2x128xf32>
    %279 = arith.subf %250, %191 : vector<2x128xf32>
    %280 = arith.mulf %210, %279 : vector<2x128xf32>
    %281 = arith.addf %191, %280 : vector<2x128xf32>
    %282 = arith.subf %278, %194 : vector<2x128xf32>
    %283 = arith.mulf %214, %282 : vector<2x128xf32>
    %284 = arith.addf %194, %283 : vector<2x128xf32>
    %285 = arith.mulf %281, %210 : vector<2x128xf32>
    %286 = arith.index_cast %c2_i32 : i32 to index
    %c0_77 = arith.constant 0 : index
    %c0_78 = arith.constant 0 : index
    %287 = vector.load %arg10[%286, %c0_77, %c0_78] : memref<8x2x128xf32, #tpu.memory_space<vmem>>, vector<1x2x128xf32>
    %288 = vector.shape_cast %287 : vector<1x2x128xf32> to vector<2x128xf32>
    %289 = vector.shape_cast %285 : vector<2x128xf32> to vector<1x2x128xf32>
    tpu.vector_store %arg10[%286, %c0_77, %c0_78], %289 {strides = array<i32>} : memref<8x2x128xf32, #tpu.memory_space<vmem>>, vector<1x2x128xf32>,
    %290 = arith.mulf %284, %214 : vector<2x128xf32>
    %291 = arith.truncf %290 : vector<2x128xf32> to vector<2x128xbf16>
    %292 = arith.index_cast %206 : i32 to index
    %c0_79 = arith.constant 0 : index
    %c0_80 = arith.constant 0 : index
    %293 = vector.load %arg14[%292, %c0_79, %c0_80] : memref<8x2x128xbf16, #tpu.memory_space<vmem>>, vector<1x2x128xbf16>
    %294 = vector.shape_cast %293 : vector<1x2x128xbf16> to vector<2x128xbf16>
    %295 = vector.shape_cast %291 : vector<2x128xbf16> to vector<1x2x128xbf16>
    tpu.vector_store %arg14[%292, %c0_79, %c0_80], %295 {strides = array<i32>} : memref<8x2x128xbf16, #tpu.memory_space<vmem>>, vector<1x2x128xbf16>,
    %c3_i32 = arith.constant 3 : i32
    %c7_i32_81 = arith.constant 7 : i32
    %296 = arith.subi %c7_i32_81, %c3_i32 : i32
    %297 = vector.broadcast %c3_i32 : i32 to vector<2x128xi32>
    %298 = arith.cmpi slt, %297, %18 : vector<2x128xi32>
    %299 = arith.extui %298 : vector<2x128xi1> to vector<2x128xi32>
    %300 = arith.sitofp %299 : vector<2x128xi32> to vector<2x128xf32>
    %301 = vector.broadcast %296 : i32 to vector<2x128xi32>
    %302 = arith.cmpi slt, %301, %18 : vector<2x128xi32>
    %303 = arith.extui %302 : vector<2x128xi1> to vector<2x128xi32>
    %304 = arith.sitofp %303 : vector<2x128xi32> to vector<2x128xf32>
    %305 = arith.index_cast %c3_i32 : i32 to index
    %c0_82 = arith.constant 0 : index
    %c0_83 = arith.constant 0 : index
    %306 = vector.load %arg12[%305, %c0_82, %c0_83] : memref<8x2x384xbf16, #tpu.memory_space<vmem>>, vector<1x2x384xbf16>
    %307 = vector.shape_cast %306 : vector<1x2x384xbf16> to vector<2x384xbf16>
    %308 = arith.extf %307 : vector<2x384xbf16> to vector<2x384xf32>
    %309 = arith.index_cast %296 : i32 to index
    %c0_84 = arith.constant 0 : index
    %c0_85 = arith.constant 0 : index
    %310 = vector.load %arg13[%309, %c0_84, %c0_85] : memref<8x2x384xbf16, #tpu.memory_space<vmem>>, vector<1x2x384xbf16>
    %311 = vector.shape_cast %310 : vector<1x2x384xbf16> to vector<2x384xbf16>
    %312 = arith.extf %311 : vector<2x384xbf16> to vector<2x384xf32>
    %313 = arith.truncf %281 : vector<2x128xf32> to vector<2x128xbf16>
    %c0_86 = arith.constant 0 : index
    %c0_87 = arith.constant 0 : index
    %314 = vector.load %arg6[%c0_86, %c0_87] : memref<128x384xbf16, #tpu.memory_space<vmem>>, vector<128x384xbf16>
    %cst_88 = arith.constant dense<0.000000e+00> : vector<2x384xf32>
    %315 = tpu.matmul %313, %314, %cst_88 {dimension_numbers = #tpu.dot_dimension_numbers<[1], [0], [0], [1], [0, 0, 1, 1], [], []>} : vector<2x128xbf16>, vector<128x384xbf16>, vector<2x384xf32> -> vector<2x384xf32>
    %316 = vector.extract_strided_slice %308 {offsets = [0, 0], sizes = [2, 128], strides = [1, 1]} : vector<2x384xf32> to vector<2x128xf32>
    %317 = vector.extract_strided_slice %315 {offsets = [0, 0], sizes = [2, 128], strides = [1, 1]} : vector<2x384xf32> to vector<2x128xf32>
    %318 = arith.addf %316, %317 : vector<2x128xf32>
    %319 = arith.negf %318 : vector<2x128xf32>
    %320 = math.exp %319 : vector<2x128xf32>
    %cst_89 = arith.constant 1.000000e+00 : f32
    %321 = vector.broadcast %cst_89 : f32 to vector<2x128xf32>
    %322 = arith.addf %321, %320 : vector<2x128xf32>
    %323 = arith.divf %321, %322 : vector<2x128xf32>
    %324 = vector.extract_strided_slice %308 {offsets = [0, 128], sizes = [2, 128], strides = [1, 1]} : vector<2x384xf32> to vector<2x128xf32>
    %325 = vector.extract_strided_slice %315 {offsets = [0, 128], sizes = [2, 128], strides = [1, 1]} : vector<2x384xf32> to vector<2x128xf32>
    %326 = arith.addf %324, %325 : vector<2x128xf32>
    %327 = arith.negf %326 : vector<2x128xf32>
    %328 = math.exp %327 : vector<2x128xf32>
    %cst_90 = arith.constant 1.000000e+00 : f32
    %329 = vector.broadcast %cst_90 : f32 to vector<2x128xf32>
    %330 = arith.addf %329, %328 : vector<2x128xf32>
    %331 = arith.divf %329, %330 : vector<2x128xf32>
    %332 = vector.extract_strided_slice %308 {offsets = [0, 256], sizes = [2, 128], strides = [1, 1]} : vector<2x384xf32> to vector<2x128xf32>
    %333 = vector.extract_strided_slice %315 {offsets = [0, 256], sizes = [2, 128], strides = [1, 1]} : vector<2x384xf32> to vector<2x128xf32>
    %334 = arith.addf %333, %21 : vector<2x128xf32>
    %335 = arith.mulf %323, %334 : vector<2x128xf32>
    %336 = arith.addf %332, %335 : vector<2x128xf32>
    %337 = math.tanh %336 : vector<2x128xf32>
    %338 = arith.subf %281, %337 : vector<2x128xf32>
    %339 = arith.mulf %331, %338 : vector<2x128xf32>
    %340 = arith.addf %337, %339 : vector<2x128xf32>
    %341 = arith.truncf %284 : vector<2x128xf32> to vector<2x128xbf16>
    %c0_91 = arith.constant 0 : index
    %c0_92 = arith.constant 0 : index
    %342 = vector.load %arg8[%c0_91, %c0_92] : memref<128x384xbf16, #tpu.memory_space<vmem>>, vector<128x384xbf16>
    %cst_93 = arith.constant dense<0.000000e+00> : vector<2x384xf32>
    %343 = tpu.matmul %341, %342, %cst_93 {dimension_numbers = #tpu.dot_dimension_numbers<[1], [0], [0], [1], [0, 0, 1, 1], [], []>} : vector<2x128xbf16>, vector<128x384xbf16>, vector<2x384xf32> -> vector<2x384xf32>
    %344 = vector.extract_strided_slice %312 {offsets = [0, 0], sizes = [2, 128], strides = [1, 1]} : vector<2x384xf32> to vector<2x128xf32>
    %345 = vector.extract_strided_slice %343 {offsets = [0, 0], sizes = [2, 128], strides = [1, 1]} : vector<2x384xf32> to vector<2x128xf32>
    %346 = arith.addf %344, %345 : vector<2x128xf32>
    %347 = arith.negf %346 : vector<2x128xf32>
    %348 = math.exp %347 : vector<2x128xf32>
    %cst_94 = arith.constant 1.000000e+00 : f32
    %349 = vector.broadcast %cst_94 : f32 to vector<2x128xf32>
    %350 = arith.addf %349, %348 : vector<2x128xf32>
    %351 = arith.divf %349, %350 : vector<2x128xf32>
    %352 = vector.extract_strided_slice %312 {offsets = [0, 128], sizes = [2, 128], strides = [1, 1]} : vector<2x384xf32> to vector<2x128xf32>
    %353 = vector.extract_strided_slice %343 {offsets = [0, 128], sizes = [2, 128], strides = [1, 1]} : vector<2x384xf32> to vector<2x128xf32>
    %354 = arith.addf %352, %353 : vector<2x128xf32>
    %355 = arith.negf %354 : vector<2x128xf32>
    %356 = math.exp %355 : vector<2x128xf32>
    %cst_95 = arith.constant 1.000000e+00 : f32
    %357 = vector.broadcast %cst_95 : f32 to vector<2x128xf32>
    %358 = arith.addf %357, %356 : vector<2x128xf32>
    %359 = arith.divf %357, %358 : vector<2x128xf32>
    %360 = vector.extract_strided_slice %312 {offsets = [0, 256], sizes = [2, 128], strides = [1, 1]} : vector<2x384xf32> to vector<2x128xf32>
    %361 = vector.extract_strided_slice %343 {offsets = [0, 256], sizes = [2, 128], strides = [1, 1]} : vector<2x384xf32> to vector<2x128xf32>
    %362 = arith.addf %361, %24 : vector<2x128xf32>
    %363 = arith.mulf %351, %362 : vector<2x128xf32>
    %364 = arith.addf %360, %363 : vector<2x128xf32>
    %365 = math.tanh %364 : vector<2x128xf32>
    %366 = arith.subf %284, %365 : vector<2x128xf32>
    %367 = arith.mulf %359, %366 : vector<2x128xf32>
    %368 = arith.addf %365, %367 : vector<2x128xf32>
    %369 = arith.subf %340, %281 : vector<2x128xf32>
    %370 = arith.mulf %300, %369 : vector<2x128xf32>
    %371 = arith.addf %281, %370 : vector<2x128xf32>
    %372 = arith.subf %368, %284 : vector<2x128xf32>
    %373 = arith.mulf %304, %372 : vector<2x128xf32>
    %374 = arith.addf %284, %373 : vector<2x128xf32>
    %375 = arith.mulf %371, %300 : vector<2x128xf32>
    %376 = arith.index_cast %c3_i32 : i32 to index
    %c0_96 = arith.constant 0 : index
    %c0_97 = arith.constant 0 : index
    %377 = vector.load %arg10[%376, %c0_96, %c0_97] : memref<8x2x128xf32, #tpu.memory_space<vmem>>, vector<1x2x128xf32>
    %378 = vector.shape_cast %377 : vector<1x2x128xf32> to vector<2x128xf32>
    %379 = vector.shape_cast %375 : vector<2x128xf32> to vector<1x2x128xf32>
    tpu.vector_store %arg10[%376, %c0_96, %c0_97], %379 {strides = array<i32>} : memref<8x2x128xf32, #tpu.memory_space<vmem>>, vector<1x2x128xf32>,
    %380 = arith.mulf %374, %304 : vector<2x128xf32>
    %381 = arith.truncf %380 : vector<2x128xf32> to vector<2x128xbf16>
    %382 = arith.index_cast %296 : i32 to index
    %c0_98 = arith.constant 0 : index
    %c0_99 = arith.constant 0 : index
    %383 = vector.load %arg14[%382, %c0_98, %c0_99] : memref<8x2x128xbf16, #tpu.memory_space<vmem>>, vector<1x2x128xbf16>
    %384 = vector.shape_cast %383 : vector<1x2x128xbf16> to vector<2x128xbf16>
    %385 = vector.shape_cast %381 : vector<2x128xbf16> to vector<1x2x128xbf16>
    tpu.vector_store %arg14[%382, %c0_98, %c0_99], %385 {strides = array<i32>} : memref<8x2x128xbf16, #tpu.memory_space<vmem>>, vector<1x2x128xbf16>,
    %c4_i32 = arith.constant 4 : i32
    %c7_i32_100 = arith.constant 7 : i32
    %386 = arith.subi %c7_i32_100, %c4_i32 : i32
    %387 = vector.broadcast %c4_i32 : i32 to vector<2x128xi32>
    %388 = arith.cmpi slt, %387, %18 : vector<2x128xi32>
    %389 = arith.extui %388 : vector<2x128xi1> to vector<2x128xi32>
    %390 = arith.sitofp %389 : vector<2x128xi32> to vector<2x128xf32>
    %391 = vector.broadcast %386 : i32 to vector<2x128xi32>
    %392 = arith.cmpi slt, %391, %18 : vector<2x128xi32>
    %393 = arith.extui %392 : vector<2x128xi1> to vector<2x128xi32>
    %394 = arith.sitofp %393 : vector<2x128xi32> to vector<2x128xf32>
    %395 = arith.index_cast %c4_i32 : i32 to index
    %c0_101 = arith.constant 0 : index
    %c0_102 = arith.constant 0 : index
    %396 = vector.load %arg12[%395, %c0_101, %c0_102] : memref<8x2x384xbf16, #tpu.memory_space<vmem>>, vector<1x2x384xbf16>
    %397 = vector.shape_cast %396 : vector<1x2x384xbf16> to vector<2x384xbf16>
    %398 = arith.extf %397 : vector<2x384xbf16> to vector<2x384xf32>
    %399 = arith.index_cast %386 : i32 to index
    %c0_103 = arith.constant 0 : index
    %c0_104 = arith.constant 0 : index
    %400 = vector.load %arg13[%399, %c0_103, %c0_104] : memref<8x2x384xbf16, #tpu.memory_space<vmem>>, vector<1x2x384xbf16>
    %401 = vector.shape_cast %400 : vector<1x2x384xbf16> to vector<2x384xbf16>
    %402 = arith.extf %401 : vector<2x384xbf16> to vector<2x384xf32>
    %403 = arith.truncf %371 : vector<2x128xf32> to vector<2x128xbf16>
    %c0_105 = arith.constant 0 : index
    %c0_106 = arith.constant 0 : index
    %404 = vector.load %arg6[%c0_105, %c0_106] : memref<128x384xbf16, #tpu.memory_space<vmem>>, vector<128x384xbf16>
    %cst_107 = arith.constant dense<0.000000e+00> : vector<2x384xf32>
    %405 = tpu.matmul %403, %404, %cst_107 {dimension_numbers = #tpu.dot_dimension_numbers<[1], [0], [0], [1], [0, 0, 1, 1], [], []>} : vector<2x128xbf16>, vector<128x384xbf16>, vector<2x384xf32> -> vector<2x384xf32>
    %406 = vector.extract_strided_slice %398 {offsets = [0, 0], sizes = [2, 128], strides = [1, 1]} : vector<2x384xf32> to vector<2x128xf32>
    %407 = vector.extract_strided_slice %405 {offsets = [0, 0], sizes = [2, 128], strides = [1, 1]} : vector<2x384xf32> to vector<2x128xf32>
    %408 = arith.addf %406, %407 : vector<2x128xf32>
    %409 = arith.negf %408 : vector<2x128xf32>
    %410 = math.exp %409 : vector<2x128xf32>
    %cst_108 = arith.constant 1.000000e+00 : f32
    %411 = vector.broadcast %cst_108 : f32 to vector<2x128xf32>
    %412 = arith.addf %411, %410 : vector<2x128xf32>
    %413 = arith.divf %411, %412 : vector<2x128xf32>
    %414 = vector.extract_strided_slice %398 {offsets = [0, 128], sizes = [2, 128], strides = [1, 1]} : vector<2x384xf32> to vector<2x128xf32>
    %415 = vector.extract_strided_slice %405 {offsets = [0, 128], sizes = [2, 128], strides = [1, 1]} : vector<2x384xf32> to vector<2x128xf32>
    %416 = arith.addf %414, %415 : vector<2x128xf32>
    %417 = arith.negf %416 : vector<2x128xf32>
    %418 = math.exp %417 : vector<2x128xf32>
    %cst_109 = arith.constant 1.000000e+00 : f32
    %419 = vector.broadcast %cst_109 : f32 to vector<2x128xf32>
    %420 = arith.addf %419, %418 : vector<2x128xf32>
    %421 = arith.divf %419, %420 : vector<2x128xf32>
    %422 = vector.extract_strided_slice %398 {offsets = [0, 256], sizes = [2, 128], strides = [1, 1]} : vector<2x384xf32> to vector<2x128xf32>
    %423 = vector.extract_strided_slice %405 {offsets = [0, 256], sizes = [2, 128], strides = [1, 1]} : vector<2x384xf32> to vector<2x128xf32>
    %424 = arith.addf %423, %21 : vector<2x128xf32>
    %425 = arith.mulf %413, %424 : vector<2x128xf32>
    %426 = arith.addf %422, %425 : vector<2x128xf32>
    %427 = math.tanh %426 : vector<2x128xf32>
    %428 = arith.subf %371, %427 : vector<2x128xf32>
    %429 = arith.mulf %421, %428 : vector<2x128xf32>
    %430 = arith.addf %427, %429 : vector<2x128xf32>
    %431 = arith.truncf %374 : vector<2x128xf32> to vector<2x128xbf16>
    %c0_110 = arith.constant 0 : index
    %c0_111 = arith.constant 0 : index
    %432 = vector.load %arg8[%c0_110, %c0_111] : memref<128x384xbf16, #tpu.memory_space<vmem>>, vector<128x384xbf16>
    %cst_112 = arith.constant dense<0.000000e+00> : vector<2x384xf32>
    %433 = tpu.matmul %431, %432, %cst_112 {dimension_numbers = #tpu.dot_dimension_numbers<[1], [0], [0], [1], [0, 0, 1, 1], [], []>} : vector<2x128xbf16>, vector<128x384xbf16>, vector<2x384xf32> -> vector<2x384xf32>
    %434 = vector.extract_strided_slice %402 {offsets = [0, 0], sizes = [2, 128], strides = [1, 1]} : vector<2x384xf32> to vector<2x128xf32>
    %435 = vector.extract_strided_slice %433 {offsets = [0, 0], sizes = [2, 128], strides = [1, 1]} : vector<2x384xf32> to vector<2x128xf32>
    %436 = arith.addf %434, %435 : vector<2x128xf32>
    %437 = arith.negf %436 : vector<2x128xf32>
    %438 = math.exp %437 : vector<2x128xf32>
    %cst_113 = arith.constant 1.000000e+00 : f32
    %439 = vector.broadcast %cst_113 : f32 to vector<2x128xf32>
    %440 = arith.addf %439, %438 : vector<2x128xf32>
    %441 = arith.divf %439, %440 : vector<2x128xf32>
    %442 = vector.extract_strided_slice %402 {offsets = [0, 128], sizes = [2, 128], strides = [1, 1]} : vector<2x384xf32> to vector<2x128xf32>
    %443 = vector.extract_strided_slice %433 {offsets = [0, 128], sizes = [2, 128], strides = [1, 1]} : vector<2x384xf32> to vector<2x128xf32>
    %444 = arith.addf %442, %443 : vector<2x128xf32>
    %445 = arith.negf %444 : vector<2x128xf32>
    %446 = math.exp %445 : vector<2x128xf32>
    %cst_114 = arith.constant 1.000000e+00 : f32
    %447 = vector.broadcast %cst_114 : f32 to vector<2x128xf32>
    %448 = arith.addf %447, %446 : vector<2x128xf32>
    %449 = arith.divf %447, %448 : vector<2x128xf32>
    %450 = vector.extract_strided_slice %402 {offsets = [0, 256], sizes = [2, 128], strides = [1, 1]} : vector<2x384xf32> to vector<2x128xf32>
    %451 = vector.extract_strided_slice %433 {offsets = [0, 256], sizes = [2, 128], strides = [1, 1]} : vector<2x384xf32> to vector<2x128xf32>
    %452 = arith.addf %451, %24 : vector<2x128xf32>
    %453 = arith.mulf %441, %452 : vector<2x128xf32>
    %454 = arith.addf %450, %453 : vector<2x128xf32>
    %455 = math.tanh %454 : vector<2x128xf32>
    %456 = arith.subf %374, %455 : vector<2x128xf32>
    %457 = arith.mulf %449, %456 : vector<2x128xf32>
    %458 = arith.addf %455, %457 : vector<2x128xf32>
    %459 = arith.subf %430, %371 : vector<2x128xf32>
    %460 = arith.mulf %390, %459 : vector<2x128xf32>
    %461 = arith.addf %371, %460 : vector<2x128xf32>
    %462 = arith.subf %458, %374 : vector<2x128xf32>
    %463 = arith.mulf %394, %462 : vector<2x128xf32>
    %464 = arith.addf %374, %463 : vector<2x128xf32>
    %465 = arith.mulf %461, %390 : vector<2x128xf32>
    %466 = arith.index_cast %c4_i32 : i32 to index
    %c0_115 = arith.constant 0 : index
    %c0_116 = arith.constant 0 : index
    %467 = vector.load %arg10[%466, %c0_115, %c0_116] : memref<8x2x128xf32, #tpu.memory_space<vmem>>, vector<1x2x128xf32>
    %468 = vector.shape_cast %467 : vector<1x2x128xf32> to vector<2x128xf32>
    %469 = vector.shape_cast %465 : vector<2x128xf32> to vector<1x2x128xf32>
    tpu.vector_store %arg10[%466, %c0_115, %c0_116], %469 {strides = array<i32>} : memref<8x2x128xf32, #tpu.memory_space<vmem>>, vector<1x2x128xf32>,
    %470 = arith.mulf %464, %394 : vector<2x128xf32>
    %471 = arith.truncf %470 : vector<2x128xf32> to vector<2x128xbf16>
    %472 = arith.index_cast %386 : i32 to index
    %c0_117 = arith.constant 0 : index
    %c0_118 = arith.constant 0 : index
    %473 = vector.load %arg14[%472, %c0_117, %c0_118] : memref<8x2x128xbf16, #tpu.memory_space<vmem>>, vector<1x2x128xbf16>
    %474 = vector.shape_cast %473 : vector<1x2x128xbf16> to vector<2x128xbf16>
    %475 = vector.shape_cast %471 : vector<2x128xbf16> to vector<1x2x128xbf16>
    tpu.vector_store %arg14[%472, %c0_117, %c0_118], %475 {strides = array<i32>} : memref<8x2x128xbf16, #tpu.memory_space<vmem>>, vector<1x2x128xbf16>,
    %c5_i32 = arith.constant 5 : i32
    %c7_i32_119 = arith.constant 7 : i32
    %476 = arith.subi %c7_i32_119, %c5_i32 : i32
    %477 = vector.broadcast %c5_i32 : i32 to vector<2x128xi32>
    %478 = arith.cmpi slt, %477, %18 : vector<2x128xi32>
    %479 = arith.extui %478 : vector<2x128xi1> to vector<2x128xi32>
    %480 = arith.sitofp %479 : vector<2x128xi32> to vector<2x128xf32>
    %481 = vector.broadcast %476 : i32 to vector<2x128xi32>
    %482 = arith.cmpi slt, %481, %18 : vector<2x128xi32>
    %483 = arith.extui %482 : vector<2x128xi1> to vector<2x128xi32>
    %484 = arith.sitofp %483 : vector<2x128xi32> to vector<2x128xf32>
    %485 = arith.index_cast %c5_i32 : i32 to index
    %c0_120 = arith.constant 0 : index
    %c0_121 = arith.constant 0 : index
    %486 = vector.load %arg12[%485, %c0_120, %c0_121] : memref<8x2x384xbf16, #tpu.memory_space<vmem>>, vector<1x2x384xbf16>
    %487 = vector.shape_cast %486 : vector<1x2x384xbf16> to vector<2x384xbf16>
    %488 = arith.extf %487 : vector<2x384xbf16> to vector<2x384xf32>
    %489 = arith.index_cast %476 : i32 to index
    %c0_122 = arith.constant 0 : index
    %c0_123 = arith.constant 0 : index
    %490 = vector.load %arg13[%489, %c0_122, %c0_123] : memref<8x2x384xbf16, #tpu.memory_space<vmem>>, vector<1x2x384xbf16>
    %491 = vector.shape_cast %490 : vector<1x2x384xbf16> to vector<2x384xbf16>
    %492 = arith.extf %491 : vector<2x384xbf16> to vector<2x384xf32>
    %493 = arith.truncf %461 : vector<2x128xf32> to vector<2x128xbf16>
    %c0_124 = arith.constant 0 : index
    %c0_125 = arith.constant 0 : index
    %494 = vector.load %arg6[%c0_124, %c0_125] : memref<128x384xbf16, #tpu.memory_space<vmem>>, vector<128x384xbf16>
    %cst_126 = arith.constant dense<0.000000e+00> : vector<2x384xf32>
    %495 = tpu.matmul %493, %494, %cst_126 {dimension_numbers = #tpu.dot_dimension_numbers<[1], [0], [0], [1], [0, 0, 1, 1], [], []>} : vector<2x128xbf16>, vector<128x384xbf16>, vector<2x384xf32> -> vector<2x384xf32>
    %496 = vector.extract_strided_slice %488 {offsets = [0, 0], sizes = [2, 128], strides = [1, 1]} : vector<2x384xf32> to vector<2x128xf32>
    %497 = vector.extract_strided_slice %495 {offsets = [0, 0], sizes = [2, 128], strides = [1, 1]} : vector<2x384xf32> to vector<2x128xf32>
    %498 = arith.addf %496, %497 : vector<2x128xf32>
    %499 = arith.negf %498 : vector<2x128xf32>
    %500 = math.exp %499 : vector<2x128xf32>
    %cst_127 = arith.constant 1.000000e+00 : f32
    %501 = vector.broadcast %cst_127 : f32 to vector<2x128xf32>
    %502 = arith.addf %501, %500 : vector<2x128xf32>
    %503 = arith.divf %501, %502 : vector<2x128xf32>
    %504 = vector.extract_strided_slice %488 {offsets = [0, 128], sizes = [2, 128], strides = [1, 1]} : vector<2x384xf32> to vector<2x128xf32>
    %505 = vector.extract_strided_slice %495 {offsets = [0, 128], sizes = [2, 128], strides = [1, 1]} : vector<2x384xf32> to vector<2x128xf32>
    %506 = arith.addf %504, %505 : vector<2x128xf32>
    %507 = arith.negf %506 : vector<2x128xf32>
    %508 = math.exp %507 : vector<2x128xf32>
    %cst_128 = arith.constant 1.000000e+00 : f32
    %509 = vector.broadcast %cst_128 : f32 to vector<2x128xf32>
    %510 = arith.addf %509, %508 : vector<2x128xf32>
    %511 = arith.divf %509, %510 : vector<2x128xf32>
    %512 = vector.extract_strided_slice %488 {offsets = [0, 256], sizes = [2, 128], strides = [1, 1]} : vector<2x384xf32> to vector<2x128xf32>
    %513 = vector.extract_strided_slice %495 {offsets = [0, 256], sizes = [2, 128], strides = [1, 1]} : vector<2x384xf32> to vector<2x128xf32>
    %514 = arith.addf %513, %21 : vector<2x128xf32>
    %515 = arith.mulf %503, %514 : vector<2x128xf32>
    %516 = arith.addf %512, %515 : vector<2x128xf32>
    %517 = math.tanh %516 : vector<2x128xf32>
    %518 = arith.subf %461, %517 : vector<2x128xf32>
    %519 = arith.mulf %511, %518 : vector<2x128xf32>
    %520 = arith.addf %517, %519 : vector<2x128xf32>
    %521 = arith.truncf %464 : vector<2x128xf32> to vector<2x128xbf16>
    %c0_129 = arith.constant 0 : index
    %c0_130 = arith.constant 0 : index
    %522 = vector.load %arg8[%c0_129, %c0_130] : memref<128x384xbf16, #tpu.memory_space<vmem>>, vector<128x384xbf16>
    %cst_131 = arith.constant dense<0.000000e+00> : vector<2x384xf32>
    %523 = tpu.matmul %521, %522, %cst_131 {dimension_numbers = #tpu.dot_dimension_numbers<[1], [0], [0], [1], [0, 0, 1, 1], [], []>} : vector<2x128xbf16>, vector<128x384xbf16>, vector<2x384xf32> -> vector<2x384xf32>
    %524 = vector.extract_strided_slice %492 {offsets = [0, 0], sizes = [2, 128], strides = [1, 1]} : vector<2x384xf32> to vector<2x128xf32>
    %525 = vector.extract_strided_slice %523 {offsets = [0, 0], sizes = [2, 128], strides = [1, 1]} : vector<2x384xf32> to vector<2x128xf32>
    %526 = arith.addf %524, %525 : vector<2x128xf32>
    %527 = arith.negf %526 : vector<2x128xf32>
    %528 = math.exp %527 : vector<2x128xf32>
    %cst_132 = arith.constant 1.000000e+00 : f32
    %529 = vector.broadcast %cst_132 : f32 to vector<2x128xf32>
    %530 = arith.addf %529, %528 : vector<2x128xf32>
    %531 = arith.divf %529, %530 : vector<2x128xf32>
    %532 = vector.extract_strided_slice %492 {offsets = [0, 128], sizes = [2, 128], strides = [1, 1]} : vector<2x384xf32> to vector<2x128xf32>
    %533 = vector.extract_strided_slice %523 {offsets = [0, 128], sizes = [2, 128], strides = [1, 1]} : vector<2x384xf32> to vector<2x128xf32>
    %534 = arith.addf %532, %533 : vector<2x128xf32>
    %535 = arith.negf %534 : vector<2x128xf32>
    %536 = math.exp %535 : vector<2x128xf32>
    %cst_133 = arith.constant 1.000000e+00 : f32
    %537 = vector.broadcast %cst_133 : f32 to vector<2x128xf32>
    %538 = arith.addf %537, %536 : vector<2x128xf32>
    %539 = arith.divf %537, %538 : vector<2x128xf32>
    %540 = vector.extract_strided_slice %492 {offsets = [0, 256], sizes = [2, 128], strides = [1, 1]} : vector<2x384xf32> to vector<2x128xf32>
    %541 = vector.extract_strided_slice %523 {offsets = [0, 256], sizes = [2, 128], strides = [1, 1]} : vector<2x384xf32> to vector<2x128xf32>
    %542 = arith.addf %541, %24 : vector<2x128xf32>
    %543 = arith.mulf %531, %542 : vector<2x128xf32>
    %544 = arith.addf %540, %543 : vector<2x128xf32>
    %545 = math.tanh %544 : vector<2x128xf32>
    %546 = arith.subf %464, %545 : vector<2x128xf32>
    %547 = arith.mulf %539, %546 : vector<2x128xf32>
    %548 = arith.addf %545, %547 : vector<2x128xf32>
    %549 = arith.subf %520, %461 : vector<2x128xf32>
    %550 = arith.mulf %480, %549 : vector<2x128xf32>
    %551 = arith.addf %461, %550 : vector<2x128xf32>
    %552 = arith.subf %548, %464 : vector<2x128xf32>
    %553 = arith.mulf %484, %552 : vector<2x128xf32>
    %554 = arith.addf %464, %553 : vector<2x128xf32>
    %555 = arith.mulf %551, %480 : vector<2x128xf32>
    %556 = arith.index_cast %c5_i32 : i32 to index
    %c0_134 = arith.constant 0 : index
    %c0_135 = arith.constant 0 : index
    %557 = vector.load %arg10[%556, %c0_134, %c0_135] : memref<8x2x128xf32, #tpu.memory_space<vmem>>, vector<1x2x128xf32>
    %558 = vector.shape_cast %557 : vector<1x2x128xf32> to vector<2x128xf32>
    %559 = vector.shape_cast %555 : vector<2x128xf32> to vector<1x2x128xf32>
    tpu.vector_store %arg10[%556, %c0_134, %c0_135], %559 {strides = array<i32>} : memref<8x2x128xf32, #tpu.memory_space<vmem>>, vector<1x2x128xf32>,
    %560 = arith.mulf %554, %484 : vector<2x128xf32>
    %561 = arith.truncf %560 : vector<2x128xf32> to vector<2x128xbf16>
    %562 = arith.index_cast %476 : i32 to index
    %c0_136 = arith.constant 0 : index
    %c0_137 = arith.constant 0 : index
    %563 = vector.load %arg14[%562, %c0_136, %c0_137] : memref<8x2x128xbf16, #tpu.memory_space<vmem>>, vector<1x2x128xbf16>
    %564 = vector.shape_cast %563 : vector<1x2x128xbf16> to vector<2x128xbf16>
    %565 = vector.shape_cast %561 : vector<2x128xbf16> to vector<1x2x128xbf16>
    tpu.vector_store %arg14[%562, %c0_136, %c0_137], %565 {strides = array<i32>} : memref<8x2x128xbf16, #tpu.memory_space<vmem>>, vector<1x2x128xbf16>,
    %c6_i32 = arith.constant 6 : i32
    %c7_i32_138 = arith.constant 7 : i32
    %566 = arith.subi %c7_i32_138, %c6_i32 : i32
    %567 = vector.broadcast %c6_i32 : i32 to vector<2x128xi32>
    %568 = arith.cmpi slt, %567, %18 : vector<2x128xi32>
    %569 = arith.extui %568 : vector<2x128xi1> to vector<2x128xi32>
    %570 = arith.sitofp %569 : vector<2x128xi32> to vector<2x128xf32>
    %571 = vector.broadcast %566 : i32 to vector<2x128xi32>
    %572 = arith.cmpi slt, %571, %18 : vector<2x128xi32>
    %573 = arith.extui %572 : vector<2x128xi1> to vector<2x128xi32>
    %574 = arith.sitofp %573 : vector<2x128xi32> to vector<2x128xf32>
    %575 = arith.index_cast %c6_i32 : i32 to index
    %c0_139 = arith.constant 0 : index
    %c0_140 = arith.constant 0 : index
    %576 = vector.load %arg12[%575, %c0_139, %c0_140] : memref<8x2x384xbf16, #tpu.memory_space<vmem>>, vector<1x2x384xbf16>
    %577 = vector.shape_cast %576 : vector<1x2x384xbf16> to vector<2x384xbf16>
    %578 = arith.extf %577 : vector<2x384xbf16> to vector<2x384xf32>
    %579 = arith.index_cast %566 : i32 to index
    %c0_141 = arith.constant 0 : index
    %c0_142 = arith.constant 0 : index
    %580 = vector.load %arg13[%579, %c0_141, %c0_142] : memref<8x2x384xbf16, #tpu.memory_space<vmem>>, vector<1x2x384xbf16>
    %581 = vector.shape_cast %580 : vector<1x2x384xbf16> to vector<2x384xbf16>
    %582 = arith.extf %581 : vector<2x384xbf16> to vector<2x384xf32>
    %583 = arith.truncf %551 : vector<2x128xf32> to vector<2x128xbf16>
    %c0_143 = arith.constant 0 : index
    %c0_144 = arith.constant 0 : index
    %584 = vector.load %arg6[%c0_143, %c0_144] : memref<128x384xbf16, #tpu.memory_space<vmem>>, vector<128x384xbf16>
    %cst_145 = arith.constant dense<0.000000e+00> : vector<2x384xf32>
    %585 = tpu.matmul %583, %584, %cst_145 {dimension_numbers = #tpu.dot_dimension_numbers<[1], [0], [0], [1], [0, 0, 1, 1], [], []>} : vector<2x128xbf16>, vector<128x384xbf16>, vector<2x384xf32> -> vector<2x384xf32>
    %586 = vector.extract_strided_slice %578 {offsets = [0, 0], sizes = [2, 128], strides = [1, 1]} : vector<2x384xf32> to vector<2x128xf32>
    %587 = vector.extract_strided_slice %585 {offsets = [0, 0], sizes = [2, 128], strides = [1, 1]} : vector<2x384xf32> to vector<2x128xf32>
    %588 = arith.addf %586, %587 : vector<2x128xf32>
    %589 = arith.negf %588 : vector<2x128xf32>
    %590 = math.exp %589 : vector<2x128xf32>
    %cst_146 = arith.constant 1.000000e+00 : f32
    %591 = vector.broadcast %cst_146 : f32 to vector<2x128xf32>
    %592 = arith.addf %591, %590 : vector<2x128xf32>
    %593 = arith.divf %591, %592 : vector<2x128xf32>
    %594 = vector.extract_strided_slice %578 {offsets = [0, 128], sizes = [2, 128], strides = [1, 1]} : vector<2x384xf32> to vector<2x128xf32>
    %595 = vector.extract_strided_slice %585 {offsets = [0, 128], sizes = [2, 128], strides = [1, 1]} : vector<2x384xf32> to vector<2x128xf32>
    %596 = arith.addf %594, %595 : vector<2x128xf32>
    %597 = arith.negf %596 : vector<2x128xf32>
    %598 = math.exp %597 : vector<2x128xf32>
    %cst_147 = arith.constant 1.000000e+00 : f32
    %599 = vector.broadcast %cst_147 : f32 to vector<2x128xf32>
    %600 = arith.addf %599, %598 : vector<2x128xf32>
    %601 = arith.divf %599, %600 : vector<2x128xf32>
    %602 = vector.extract_strided_slice %578 {offsets = [0, 256], sizes = [2, 128], strides = [1, 1]} : vector<2x384xf32> to vector<2x128xf32>
    %603 = vector.extract_strided_slice %585 {offsets = [0, 256], sizes = [2, 128], strides = [1, 1]} : vector<2x384xf32> to vector<2x128xf32>
    %604 = arith.addf %603, %21 : vector<2x128xf32>
    %605 = arith.mulf %593, %604 : vector<2x128xf32>
    %606 = arith.addf %602, %605 : vector<2x128xf32>
    %607 = math.tanh %606 : vector<2x128xf32>
    %608 = arith.subf %551, %607 : vector<2x128xf32>
    %609 = arith.mulf %601, %608 : vector<2x128xf32>
    %610 = arith.addf %607, %609 : vector<2x128xf32>
    %611 = arith.truncf %554 : vector<2x128xf32> to vector<2x128xbf16>
    %c0_148 = arith.constant 0 : index
    %c0_149 = arith.constant 0 : index
    %612 = vector.load %arg8[%c0_148, %c0_149] : memref<128x384xbf16, #tpu.memory_space<vmem>>, vector<128x384xbf16>
    %cst_150 = arith.constant dense<0.000000e+00> : vector<2x384xf32>
    %613 = tpu.matmul %611, %612, %cst_150 {dimension_numbers = #tpu.dot_dimension_numbers<[1], [0], [0], [1], [0, 0, 1, 1], [], []>} : vector<2x128xbf16>, vector<128x384xbf16>, vector<2x384xf32> -> vector<2x384xf32>
    %614 = vector.extract_strided_slice %582 {offsets = [0, 0], sizes = [2, 128], strides = [1, 1]} : vector<2x384xf32> to vector<2x128xf32>
    %615 = vector.extract_strided_slice %613 {offsets = [0, 0], sizes = [2, 128], strides = [1, 1]} : vector<2x384xf32> to vector<2x128xf32>
    %616 = arith.addf %614, %615 : vector<2x128xf32>
    %617 = arith.negf %616 : vector<2x128xf32>
    %618 = math.exp %617 : vector<2x128xf32>
    %cst_151 = arith.constant 1.000000e+00 : f32
    %619 = vector.broadcast %cst_151 : f32 to vector<2x128xf32>
    %620 = arith.addf %619, %618 : vector<2x128xf32>
    %621 = arith.divf %619, %620 : vector<2x128xf32>
    %622 = vector.extract_strided_slice %582 {offsets = [0, 128], sizes = [2, 128], strides = [1, 1]} : vector<2x384xf32> to vector<2x128xf32>
    %623 = vector.extract_strided_slice %613 {offsets = [0, 128], sizes = [2, 128], strides = [1, 1]} : vector<2x384xf32> to vector<2x128xf32>
    %624 = arith.addf %622, %623 : vector<2x128xf32>
    %625 = arith.negf %624 : vector<2x128xf32>
    %626 = math.exp %625 : vector<2x128xf32>
    %cst_152 = arith.constant 1.000000e+00 : f32
    %627 = vector.broadcast %cst_152 : f32 to vector<2x128xf32>
    %628 = arith.addf %627, %626 : vector<2x128xf32>
    %629 = arith.divf %627, %628 : vector<2x128xf32>
    %630 = vector.extract_strided_slice %582 {offsets = [0, 256], sizes = [2, 128], strides = [1, 1]} : vector<2x384xf32> to vector<2x128xf32>
    %631 = vector.extract_strided_slice %613 {offsets = [0, 256], sizes = [2, 128], strides = [1, 1]} : vector<2x384xf32> to vector<2x128xf32>
    %632 = arith.addf %631, %24 : vector<2x128xf32>
    %633 = arith.mulf %621, %632 : vector<2x128xf32>
    %634 = arith.addf %630, %633 : vector<2x128xf32>
    %635 = math.tanh %634 : vector<2x128xf32>
    %636 = arith.subf %554, %635 : vector<2x128xf32>
    %637 = arith.mulf %629, %636 : vector<2x128xf32>
    %638 = arith.addf %635, %637 : vector<2x128xf32>
    %639 = arith.subf %610, %551 : vector<2x128xf32>
    %640 = arith.mulf %570, %639 : vector<2x128xf32>
    %641 = arith.addf %551, %640 : vector<2x128xf32>
    %642 = arith.subf %638, %554 : vector<2x128xf32>
    %643 = arith.mulf %574, %642 : vector<2x128xf32>
    %644 = arith.addf %554, %643 : vector<2x128xf32>
    %645 = arith.mulf %641, %570 : vector<2x128xf32>
    %646 = arith.index_cast %c6_i32 : i32 to index
    %c0_153 = arith.constant 0 : index
    %c0_154 = arith.constant 0 : index
    %647 = vector.load %arg10[%646, %c0_153, %c0_154] : memref<8x2x128xf32, #tpu.memory_space<vmem>>, vector<1x2x128xf32>
    %648 = vector.shape_cast %647 : vector<1x2x128xf32> to vector<2x128xf32>
    %649 = vector.shape_cast %645 : vector<2x128xf32> to vector<1x2x128xf32>
    tpu.vector_store %arg10[%646, %c0_153, %c0_154], %649 {strides = array<i32>} : memref<8x2x128xf32, #tpu.memory_space<vmem>>, vector<1x2x128xf32>,
    %650 = arith.mulf %644, %574 : vector<2x128xf32>
    %651 = arith.truncf %650 : vector<2x128xf32> to vector<2x128xbf16>
    %652 = arith.index_cast %566 : i32 to index
    %c0_155 = arith.constant 0 : index
    %c0_156 = arith.constant 0 : index
    %653 = vector.load %arg14[%652, %c0_155, %c0_156] : memref<8x2x128xbf16, #tpu.memory_space<vmem>>, vector<1x2x128xbf16>
    %654 = vector.shape_cast %653 : vector<1x2x128xbf16> to vector<2x128xbf16>
    %655 = vector.shape_cast %651 : vector<2x128xbf16> to vector<1x2x128xbf16>
    tpu.vector_store %arg14[%652, %c0_155, %c0_156], %655 {strides = array<i32>} : memref<8x2x128xbf16, #tpu.memory_space<vmem>>, vector<1x2x128xbf16>,
    %c7_i32_157 = arith.constant 7 : i32
    %c7_i32_158 = arith.constant 7 : i32
    %656 = arith.subi %c7_i32_158, %c7_i32_157 : i32
    %657 = vector.broadcast %c7_i32_157 : i32 to vector<2x128xi32>
    %658 = arith.cmpi slt, %657, %18 : vector<2x128xi32>
    %659 = arith.extui %658 : vector<2x128xi1> to vector<2x128xi32>
    %660 = arith.sitofp %659 : vector<2x128xi32> to vector<2x128xf32>
    %661 = vector.broadcast %656 : i32 to vector<2x128xi32>
    %662 = arith.cmpi slt, %661, %18 : vector<2x128xi32>
    %663 = arith.extui %662 : vector<2x128xi1> to vector<2x128xi32>
    %664 = arith.sitofp %663 : vector<2x128xi32> to vector<2x128xf32>
    %665 = arith.index_cast %c7_i32_157 : i32 to index
    %c0_159 = arith.constant 0 : index
    %c0_160 = arith.constant 0 : index
    %666 = vector.load %arg12[%665, %c0_159, %c0_160] : memref<8x2x384xbf16, #tpu.memory_space<vmem>>, vector<1x2x384xbf16>
    %667 = vector.shape_cast %666 : vector<1x2x384xbf16> to vector<2x384xbf16>
    %668 = arith.extf %667 : vector<2x384xbf16> to vector<2x384xf32>
    %669 = arith.index_cast %656 : i32 to index
    %c0_161 = arith.constant 0 : index
    %c0_162 = arith.constant 0 : index
    %670 = vector.load %arg13[%669, %c0_161, %c0_162] : memref<8x2x384xbf16, #tpu.memory_space<vmem>>, vector<1x2x384xbf16>
    %671 = vector.shape_cast %670 : vector<1x2x384xbf16> to vector<2x384xbf16>
    %672 = arith.extf %671 : vector<2x384xbf16> to vector<2x384xf32>
    %673 = arith.truncf %641 : vector<2x128xf32> to vector<2x128xbf16>
    %c0_163 = arith.constant 0 : index
    %c0_164 = arith.constant 0 : index
    %674 = vector.load %arg6[%c0_163, %c0_164] : memref<128x384xbf16, #tpu.memory_space<vmem>>, vector<128x384xbf16>
    %cst_165 = arith.constant dense<0.000000e+00> : vector<2x384xf32>
    %675 = tpu.matmul %673, %674, %cst_165 {dimension_numbers = #tpu.dot_dimension_numbers<[1], [0], [0], [1], [0, 0, 1, 1], [], []>} : vector<2x128xbf16>, vector<128x384xbf16>, vector<2x384xf32> -> vector<2x384xf32>
    %676 = vector.extract_strided_slice %668 {offsets = [0, 0], sizes = [2, 128], strides = [1, 1]} : vector<2x384xf32> to vector<2x128xf32>
    %677 = vector.extract_strided_slice %675 {offsets = [0, 0], sizes = [2, 128], strides = [1, 1]} : vector<2x384xf32> to vector<2x128xf32>
    %678 = arith.addf %676, %677 : vector<2x128xf32>
    %679 = arith.negf %678 : vector<2x128xf32>
    %680 = math.exp %679 : vector<2x128xf32>
    %cst_166 = arith.constant 1.000000e+00 : f32
    %681 = vector.broadcast %cst_166 : f32 to vector<2x128xf32>
    %682 = arith.addf %681, %680 : vector<2x128xf32>
    %683 = arith.divf %681, %682 : vector<2x128xf32>
    %684 = vector.extract_strided_slice %668 {offsets = [0, 128], sizes = [2, 128], strides = [1, 1]} : vector<2x384xf32> to vector<2x128xf32>
    %685 = vector.extract_strided_slice %675 {offsets = [0, 128], sizes = [2, 128], strides = [1, 1]} : vector<2x384xf32> to vector<2x128xf32>
    %686 = arith.addf %684, %685 : vector<2x128xf32>
    %687 = arith.negf %686 : vector<2x128xf32>
    %688 = math.exp %687 : vector<2x128xf32>
    %cst_167 = arith.constant 1.000000e+00 : f32
    %689 = vector.broadcast %cst_167 : f32 to vector<2x128xf32>
    %690 = arith.addf %689, %688 : vector<2x128xf32>
    %691 = arith.divf %689, %690 : vector<2x128xf32>
    %692 = vector.extract_strided_slice %668 {offsets = [0, 256], sizes = [2, 128], strides = [1, 1]} : vector<2x384xf32> to vector<2x128xf32>
    %693 = vector.extract_strided_slice %675 {offsets = [0, 256], sizes = [2, 128], strides = [1, 1]} : vector<2x384xf32> to vector<2x128xf32>
    %694 = arith.addf %693, %21 : vector<2x128xf32>
    %695 = arith.mulf %683, %694 : vector<2x128xf32>
    %696 = arith.addf %692, %695 : vector<2x128xf32>
    %697 = math.tanh %696 : vector<2x128xf32>
    %698 = arith.subf %641, %697 : vector<2x128xf32>
    %699 = arith.mulf %691, %698 : vector<2x128xf32>
    %700 = arith.addf %697, %699 : vector<2x128xf32>
    %701 = arith.truncf %644 : vector<2x128xf32> to vector<2x128xbf16>
    %c0_168 = arith.constant 0 : index
    %c0_169 = arith.constant 0 : index
    %702 = vector.load %arg8[%c0_168, %c0_169] : memref<128x384xbf16, #tpu.memory_space<vmem>>, vector<128x384xbf16>
    %cst_170 = arith.constant dense<0.000000e+00> : vector<2x384xf32>
    %703 = tpu.matmul %701, %702, %cst_170 {dimension_numbers = #tpu.dot_dimension_numbers<[1], [0], [0], [1], [0, 0, 1, 1], [], []>} : vector<2x128xbf16>, vector<128x384xbf16>, vector<2x384xf32> -> vector<2x384xf32>
    %704 = vector.extract_strided_slice %672 {offsets = [0, 0], sizes = [2, 128], strides = [1, 1]} : vector<2x384xf32> to vector<2x128xf32>
    %705 = vector.extract_strided_slice %703 {offsets = [0, 0], sizes = [2, 128], strides = [1, 1]} : vector<2x384xf32> to vector<2x128xf32>
    %706 = arith.addf %704, %705 : vector<2x128xf32>
    %707 = arith.negf %706 : vector<2x128xf32>
    %708 = math.exp %707 : vector<2x128xf32>
    %cst_171 = arith.constant 1.000000e+00 : f32
    %709 = vector.broadcast %cst_171 : f32 to vector<2x128xf32>
    %710 = arith.addf %709, %708 : vector<2x128xf32>
    %711 = arith.divf %709, %710 : vector<2x128xf32>
    %712 = vector.extract_strided_slice %672 {offsets = [0, 128], sizes = [2, 128], strides = [1, 1]} : vector<2x384xf32> to vector<2x128xf32>
    %713 = vector.extract_strided_slice %703 {offsets = [0, 128], sizes = [2, 128], strides = [1, 1]} : vector<2x384xf32> to vector<2x128xf32>
    %714 = arith.addf %712, %713 : vector<2x128xf32>
    %715 = arith.negf %714 : vector<2x128xf32>
    %716 = math.exp %715 : vector<2x128xf32>
    %cst_172 = arith.constant 1.000000e+00 : f32
    %717 = vector.broadcast %cst_172 : f32 to vector<2x128xf32>
    %718 = arith.addf %717, %716 : vector<2x128xf32>
    %719 = arith.divf %717, %718 : vector<2x128xf32>
    %720 = vector.extract_strided_slice %672 {offsets = [0, 256], sizes = [2, 128], strides = [1, 1]} : vector<2x384xf32> to vector<2x128xf32>
    %721 = vector.extract_strided_slice %703 {offsets = [0, 256], sizes = [2, 128], strides = [1, 1]} : vector<2x384xf32> to vector<2x128xf32>
    %722 = arith.addf %721, %24 : vector<2x128xf32>
    %723 = arith.mulf %711, %722 : vector<2x128xf32>
    %724 = arith.addf %720, %723 : vector<2x128xf32>
    %725 = math.tanh %724 : vector<2x128xf32>
    %726 = arith.subf %644, %725 : vector<2x128xf32>
    %727 = arith.mulf %719, %726 : vector<2x128xf32>
    %728 = arith.addf %725, %727 : vector<2x128xf32>
    %729 = arith.subf %700, %641 : vector<2x128xf32>
    %730 = arith.mulf %660, %729 : vector<2x128xf32>
    %731 = arith.addf %641, %730 : vector<2x128xf32>
    %732 = arith.subf %728, %644 : vector<2x128xf32>
    %733 = arith.mulf %664, %732 : vector<2x128xf32>
    %734 = arith.addf %644, %733 : vector<2x128xf32>
    %735 = arith.mulf %731, %660 : vector<2x128xf32>
    %736 = arith.index_cast %c7_i32_157 : i32 to index
    %c0_173 = arith.constant 0 : index
    %c0_174 = arith.constant 0 : index
    %737 = vector.load %arg10[%736, %c0_173, %c0_174] : memref<8x2x128xf32, #tpu.memory_space<vmem>>, vector<1x2x128xf32>
    %738 = vector.shape_cast %737 : vector<1x2x128xf32> to vector<2x128xf32>
    %739 = vector.shape_cast %735 : vector<2x128xf32> to vector<1x2x128xf32>
    tpu.vector_store %arg10[%736, %c0_173, %c0_174], %739 {strides = array<i32>} : memref<8x2x128xf32, #tpu.memory_space<vmem>>, vector<1x2x128xf32>,
    %740 = arith.mulf %734, %664 : vector<2x128xf32>
    %741 = arith.truncf %740 : vector<2x128xf32> to vector<2x128xbf16>
    %742 = arith.index_cast %656 : i32 to index
    %c0_175 = arith.constant 0 : index
    %c0_176 = arith.constant 0 : index
    %743 = vector.load %arg14[%742, %c0_175, %c0_176] : memref<8x2x128xbf16, #tpu.memory_space<vmem>>, vector<1x2x128xbf16>
    %744 = vector.shape_cast %743 : vector<1x2x128xbf16> to vector<2x128xbf16>
    %745 = vector.shape_cast %741 : vector<2x128xbf16> to vector<1x2x128xbf16>
    tpu.vector_store %arg14[%742, %c0_175, %c0_176], %745 {strides = array<i32>} : memref<8x2x128xbf16, #tpu.memory_space<vmem>>, vector<1x2x128xbf16>,
    %c8_i32 = arith.constant 8 : i32
    %c0_177 = arith.constant 0 : index
    %c0_178 = arith.constant 0 : index
    %c0_179 = arith.constant 0 : index
    %746 = vector.load %arg10[%c0_177, %c0_178, %c0_179] : memref<8x2x128xf32, #tpu.memory_space<vmem>>, vector<8x2x128xf32>
    %c0_180 = arith.constant 0 : index
    %c0_181 = arith.constant 0 : index
    %c0_182 = arith.constant 0 : index
    %747 = vector.load %arg14[%c0_180, %c0_181, %c0_182] : memref<8x2x128xbf16, #tpu.memory_space<vmem>>, vector<8x2x128xbf16>
    %748 = arith.extf %747 : vector<8x2x128xbf16> to vector<8x2x128xf32>
    %749 = arith.addf %746, %748 : vector<8x2x128xf32>
    %cst_183 = arith.constant 5.000000e-01 : f32
    %750 = vector.broadcast %cst_183 : f32 to vector<8x2x128xf32>
    %751 = arith.mulf %749, %750 : vector<8x2x128xf32>
    %c0_184 = arith.constant 0 : index
    %c0_185 = arith.constant 0 : index
    %c0_186 = arith.constant 0 : index
    %752 = vector.load %arg10[%c0_184, %c0_185, %c0_186] : memref<8x2x128xf32, #tpu.memory_space<vmem>>, vector<8x2x128xf32>
    tpu.vector_store %arg10[%c0_184, %c0_185, %c0_186], %751 {strides = array<i32>} : memref<8x2x128xf32, #tpu.memory_space<vmem>>, vector<8x2x128xf32>,
    %753 = arith.addf %731, %734 : vector<2x128xf32>
    %cst_187 = arith.constant 5.000000e-01 : f32
    %754 = vector.broadcast %cst_187 : f32 to vector<2x128xf32>
    %755 = arith.mulf %753, %754 : vector<2x128xf32>
    %c0_188 = arith.constant 0 : index
    %c0_189 = arith.constant 0 : index
    %756 = vector.load %arg11[%c0_188, %c0_189] : memref<2x128xf32, #tpu.memory_space<vmem>>, vector<2x128xf32>
    tpu.vector_store %arg11[%c0_188, %c0_189], %755 {strides = array<i32>} : memref<2x128xf32, #tpu.memory_space<vmem>>, vector<2x128xf32>,
    return
  }
}

</mosaic_0001>

<bundles_post_ra>
// kernel: tpu_custom_call.1
= control target key start
LH: loop header
LB: loop body
LE: loop exit
PB: predicated region body
PF: predicated region fallthrough
CT: control target
= control target key end

     0   :  { %17 = vsyncpa [#allocation6], 0  ;;  %s7776_s0 = inlined_call_operand.hbm [shape: bf16[16,32], index: 0, kind: input, shape index: {}]   ;;  %s7777_s1 = inlined_call_operand.hbm [shape: s32[2,128], index: 1, kind: input, shape index: {}]   ;;  %s7778_s2 = inlined_call_operand.hbm [shape: bf16[32,384], index: 2, kind: input, shape index: {}]   ;;  %s7779_s3 = inlined_call_operand.hbm [shape: bf16[32,384], index: 3, kind: input, shape index: {}]   ;;  %s7780_s4 = inlined_call_operand.vmem [shape: f32[1,384], index: 4, kind: input, shape index: {}]   ;;  %s7781_s5 = inlined_call_operand.vmem [shape: f32[1,384], index: 5, kind: input, shape index: {}]   ;;  %s7782_s6 = inlined_call_operand.hbm [shape: bf16[128,384], index: 6, kind: input, shape index: {}]   ;;  %s7783_s7 = inlined_call_operand.vmem [shape: f32[1,128], index: 7, kind: input, shape index: {}]   ;;  %s7784_s8 = inlined_call_operand.hbm [shape: bf16[128,384], index: 8, kind: input, shape index: {}]   ;;  %s7785_s9 = inlined_call_operand.vmem [shape: f32[1,128], index: 9, kind: input, shape index: {}]   ;;  %s7786_s10 = inlined_call_operand.hbm [shape: f32[8,2,128], index: 10, kind: output, shape index: {0}]   ;;  %s7787_s11 = inlined_call_operand.hbm [shape: f32[2,128], index: 11, kind: output, shape index: {1}]  }
   0x1   :  { %18 = vsyncpa [#allocation9], 0 }
   0x2   :  { %19 = vsyncpa [#allocation12], 0 }
   0x3   :  { %20 = vsyncpa [#allocation15], 0 }
   0x4   :  { %21 = vsyncpa [#allocation7], 0 }
   0x5   :  { %22 = vsyncpa [#allocation18], 0  ;;  %s6809_s17 = smov [#allocation8]  }
   0x6   :  { %s41_s18 = sshll.u32 %s6809_s17, 4  ;;  %s42_s18 = int_to_ptr.vmem [resolvable:$true] %s41_s18 }
   0x7   :  { %s6645_s19 = scalar_lea.vmem %s42_s18, 32  ;;  %p6650_p1 = scmp.lt.s32.totalorder %s42_s18, %s42_s18 }
   0x8   :  { %p6646_p0 = scmp.ne.s32.totalorder %s42_s18, %s6645_s19  ;;  %p6651_p2 = scmp.lt.s32.totalorder %s6645_s19, %s6645_s19 }
   0xa   :  { %p6652_p3 = por %p6651_p2, %p6650_p1 }
   0xc   :  { %p6653_p4 = pnand %p6652_p3, %p6646_p0 }
   0xe   :  { %6656 = shalt.err (!%p6653_p4)
}
   0xf   :  { %44 = dma.hbm_to_vmem [thread:$0]  %s7777_s1, 32, %s42_s18, [#allocation9]  }
  0x10   :  { %s6810_s22 = smov [#allocation11]   ;;  %s6811_s24 = smov [#allocation5]  }
  0x11   :  { %s62_s23 = sshll.u32 %s6810_s22, 4  ;;  %s28_s25 = sshll.u32 %s6811_s24, 4  ;;  %s63_s23 = int_to_ptr.vmem [resolvable:$true] %s62_s23  ;;  %s29_s25 = int_to_ptr.vmem [resolvable:$true] %s28_s25 }
  0x12   :  { %s6665_s26 = scalar_lea.vmem %s63_s23, 768  ;;  %p6670_p6 = scmp.lt.s32.totalorder %s63_s23, %s63_s23 }
  0x13   :  { %p6666_p5 = scmp.ne.s32.totalorder %s63_s23, %s6665_s26  ;;  %p6671_p7 = scmp.lt.s32.totalorder %s6665_s26, %s6665_s26 }
  0x15   :  { %p6672_p8 = por %p6671_p7, %p6670_p6 }
  0x17   :  { %p6673_p9 = pnand %p6672_p8, %p6666_p5 }
  0x19   :  { %6676 = shalt.err (!%p6673_p9)
}
  0x1a   :  { %s6812_s27 = smov 192   ;;  %s6813_s28 = smov 12  }
  0x1b   :  { %68 = dma.hbm_to_vmem [thread:$0]  %s7779_s3, 768, %s63_s23, [#allocation12], %s6812_s27, %s6812_s27, %s6813_s28  }
  0x1c   :  { %s6685_s1 = scalar_lea.vmem %s29_s25, 128  ;;  %p6690_p11 = scmp.lt.s32.totalorder %s29_s25, %s29_s25 }
  0x1d   :  { %p6686_p10 = scmp.ne.s32.totalorder %s29_s25, %s6685_s1  ;;  %p6691_p12 = scmp.lt.s32.totalorder %s6685_s1, %s6685_s1 }
  0x1f   :  { %p6692_p13 = por %p6691_p12, %p6690_p11 }
  0x21   :  { %p6693_p0 = pnand %p6692_p13, %p6686_p10 }
  0x23   :  { %6696 = shalt.err (!%p6693_p0)
}
  0x24   :  { %s6814_s12 = smov 64   ;;  %s6815_s13 = smov 4  }
  0x25   :  { %34 = dma.hbm_to_vmem [thread:$0]  %s7776_s0, 128, %s29_s25, [#allocation6], %s6814_s12, %s6814_s12, %s6815_s13  }
  0x26   :  { %s6816_s16 = smov [#allocation10]   ;;  %s6817_s18 = smov [#allocation13]  }
  0x27   :  { %s50_s17 = sshll.u32 %s6816_s16, 4  ;;  %s78_s19 = sshll.u32 %s6817_s18, 4  ;;  %s51_s17 = int_to_ptr.vmem [resolvable:$true] %s50_s17  ;;  %s79_s19 = int_to_ptr.vmem [resolvable:$true] %s78_s19 }
  0x28   :  { %s6705_s3 = scalar_lea.vmem %s51_s17, 768  ;;  %p6710_p2 = scmp.lt.s32.totalorder %s51_s17, %s51_s17 }
  0x29   :  { %p6706_p1 = scmp.ne.s32.totalorder %s51_s17, %s6705_s3  ;;  %p6711_p3 = scmp.lt.s32.totalorder %s6705_s3, %s6705_s3 }
  0x2b   :  { %p6712_p4 = por %p6711_p3, %p6710_p2 }
  0x2d   :  { %p6713_p5 = pnand %p6712_p4, %p6706_p1 }
  0x2f   :  { %6716 = shalt.err (!%p6713_p5)
}
  0x30   :  { %56 = dma.hbm_to_vmem [thread:$0]  %s7778_s2, 768, %s51_s17, [#allocation9], %s6812_s27, %s6812_s27, %s6813_s28  }
  0x31   :  { %s6725_s0 = scalar_lea.vmem %s79_s19, 3072  ;;  %p6730_p7 = scmp.lt.s32.totalorder %s79_s19, %s79_s19 }
  0x32   :  { %p6726_p6 = scmp.ne.s32.totalorder %s79_s19, %s6725_s0  ;;  %p6731_p8 = scmp.lt.s32.totalorder %s6725_s0, %s6725_s0 }
  0x34   :  { %p6732_p9 = por %p6731_p8, %p6730_p7 }
  0x36   :  { %p6733_p10 = pnand %p6732_p9, %p6726_p6 }
  0x38   :  { %6736 = shalt.err (!%p6733_p10)
}
  0x39   :  { %84 = dma.hbm_to_vmem [thread:$0]  %s7782_s6, 3072, %s79_s19, [#allocation12], %s6812_s27, %s6812_s27, %s6813_s28  }
  0x3a   :  { %s6818_s24 = smov [#allocation14]  }
  0x3b   :  { %s92_s25 = sshll.u32 %s6818_s24, 4  ;;  %s93_s25 = int_to_ptr.vmem [resolvable:$true] %s92_s25 }
  0x3c   :  { %s6745_s26 = scalar_lea.vmem %s93_s25, 3072  ;;  %p6750_p12 = scmp.lt.s32.totalorder %s93_s25, %s93_s25 }
  0x3d   :  { %p6746_p11 = scmp.ne.s32.totalorder %s93_s25, %s6745_s26  ;;  %p6751_p13 = scmp.lt.s32.totalorder %s6745_s26, %s6745_s26 }
  0x3f   :  { %p6752_p0 = por %p6751_p13, %p6750_p12 }
  0x41   :  { %p6753_p1 = pnand %p6752_p0, %p6746_p11 }
  0x43   :  { %6756 = shalt.err (!%p6753_p1)
}
  0x44   :  { %98 = dma.hbm_to_vmem [thread:$0]  %s7784_s8, 3072, %s93_s25, [#allocation15], %s6812_s27, %s6812_s27, %s6813_s28  }
  0x45   :  { %6797 = dma.done.wait [#allocation6], 128  }
  0x46   :  { %6798 = vsyncadd [#allocation6], 4294967168 }
  0x47   :  { %6799 = dma.done.wait [#allocation9], 800  }
  0x48   :  { %6800 = vsyncadd [#allocation9], 4294966496 }
  0x49   :  { %6801 = dma.done.wait [#allocation12], 3840  }
  0x4a   :  { %6802 = vsyncadd [#allocation12], 4294963456 }
  0x4b   :  { %6803 = dma.done.wait [#allocation15], 3072  }
  0x4c   :  { %6804 = vsyncadd [#allocation15], 4294964224  ;;  %v7790_v0 = vmov 0.0   ;;  %vm6820_vm0 = vmmov 0   ;;  %v7788_v1 = vmov 0   ;;  %v6127_v8 = vld [vmem:[#allocation5] sm:$0xff]  }
  0x4d   :  { %5765 = vmatprep.subr.bf16.mxu1 %v7790_v0  ;;  %5769 = vmatprep.mubr.msk.bf16.mxu1 %vm6820_vm0, %v7790_v0  ;;  %v6119_v2 = vld [vmem:[#allocation10 + $0x1c] ss:$12 sps:$4 sm:$0xff]   ;;  %v6121_v3 = vld [vmem:[#allocation10 + $0x20] ss:$12 sps:$4 sm:$0xff]   ;;  %v6122_v4 = vld [vmem:[#allocation10 + $0x18] ss:$12 sps:$4 sm:$0xff]  }
  0x4e   :  { %220 = vmatprep.mubr.bf16.mxu0 %v7788_v1  ;;  %200 = vmatprep.subr.bf16.mxu0 %v6119_v2  ;;  %v6123_v5 = vld [vmem:[#allocation10 + $0x4] ss:$12 sps:$4 sm:$0xff]   ;;  %v6125_v6 = vld [vmem:[#allocation10 + $0x8] ss:$12 sps:$4 sm:$0xff]   ;;  %v6126_v7 = vld [vmem:[#allocation10] ss:$12 sps:$4 sm:$0xff]  }
  0x4f   :  { %5766 = vmatpush3.bf16.msra.mxu1 %v6121_v3  ;;  %201 = vmatpush1.bf16.msra.mxu0 %v6122_v4  ;;  %vm184_vm1 = vcmask 261120   ;;  %v6130_v9 = vld [vmem:[#allocation11 + $0x1c] ss:$12 sps:$4 sm:$0xff]   ;;  %v6131_v10 = vld [vmem:[#allocation11 + $0x20] ss:$12 sps:$4 sm:$0xff]  }
  0x50   :  { %5767 = vmatprep.subr.bf16.mxu1 %v7790_v0  ;;  %202 = vmatprep.subr.bf16.mxu0 %v6123_v5  ;;  %v6128_v11 = vld [vmem:[#allocation11 + $0x18] ss:$12 sps:$4 sm:$0xff]   ;;  %v6135_v13 = vld [vmem:[#allocation11 + $0x8] ss:$12 sps:$4 sm:$0xff]   ;;  %v6132_v14 = vld [vmem:[#allocation11] ss:$12 sps:$4 sm:$0xff]  }
  0x51   :  { %v6134_v12 = vld [vmem:[#allocation11 + $0x4] ss:$12 sps:$4 sm:$0xff]   ;;  %v6928_v15 = vld [vmem:[#allocation13 + $0xac] ss:$12 sps:$4 sm:$0xff]   ;;  %v6942_v19 = vld [vmem:[#allocation13 + $0x90] ss:$12 sps:$4 sm:$0xff]  }
  0x52   :  { %v6136_v16 = vld [vmem:[#allocation5] sm:$0xff]   ;;  %v6953_v24 = vld [vmem:[#allocation13 + $0x64] ss:$12 sps:$4 sm:$0xff]   ;;  %v6166_v25 = vld [vmem:[#allocation13 + $0x80] ss:$12 sps:$4 sm:$0xff]  }
  0x53   :  { %5768 = vmatpush3.bf16.msra.mxu1 %v6125_v6  ;;  %203 = vmatpush1.bf16.msra.mxu0 %v6126_v7  ;;  %v6931_v17 = vld [vmem:[#allocation13 + $0xa8] ss:$12 sps:$4 sm:$0xff]   ;;  %v6158_v21 = vld [vmem:[#allocation13 + $0xb0] ss:$12 sps:$4 sm:$0xff]   ;;  %v6162_v22 = vld [vmem:[#allocation13 + $0x98] ss:$12 sps:$4 sm:$0xff]  }
  0x54   :  { %5773 = vmatprep.subr.bf16.mxu1 %v7790_v0  ;;  %440 = vmatprep.subr.bf16.mxu0 %v6130_v9  ;;  %v6935_v18 = vld [vmem:[#allocation13 + $0x94] ss:$12 sps:$4 sm:$0xff]   ;;  %v6944_v20 = vld [vmem:[#allocation13 + $0x7c] ss:$12 sps:$4 sm:$0xff]   ;;  %v6949_v23 = vld [vmem:[#allocation13 + $0x78] ss:$12 sps:$4 sm:$0xff]  }
  0x55   :  { %v6956_v26 = vld [vmem:[#allocation13 + $0x60] ss:$12 sps:$4 sm:$0xff]   ;;  %v6170_v28 = vld [vmem:[#allocation13 + $0x68] ss:$12 sps:$4 sm:$0xff]   ;;  %v6174_v31 = vld [vmem:[#allocation13 + $0x50] ss:$12 sps:$4 sm:$0xff]  }
  0x56   :  { %5770 = vmatmul.mubr.msk.bf16.vlgmr.msra.gmra.mxu1 %vm184_vm1, %v6127_v8  ;;  %5164 = vmatmul.mubr.msk.bf16.vlgmr.msra.gmra.mxu0 %vm184_vm1, %v6127_v8  ;;  %v6960_v27 = vld [vmem:[#allocation13 + $0x4c] ss:$12 sps:$4 sm:$0xff]   ;;  %v6963_v29 = vld [vmem:[#allocation13 + $0x48] ss:$12 sps:$4 sm:$0xff]   ;;  %v6970_v32 = vld [vmem:[#allocation13 + $0x30] ss:$12 sps:$4 sm:$0xff]  }
  0x57   :  { %5774 = vmatpush3.bf16.msra.mxu1 %v6131_v10  ;;  %441 = vmatpush1.bf16.msra.mxu0 %v6128_v11  ;;  %v6967_v30 = vld [vmem:[#allocation13 + $0x34] ss:$12 sps:$4 sm:$0xff]   ;;  %v6974_v33 = vld [vmem:[#allocation13 + $0x1c] ss:$12 sps:$4 sm:$0xff]   ;;  %v6178_v34 = vld [vmem:[#allocation13 + $0x38] ss:$12 sps:$4 sm:$0xff]   ;;  %v132_v10 = vlaneseq }
  0x58   :  { %5775 = vmatprep.subr.bf16.mxu1 %v7790_v0  ;;  %442 = vmatprep.subr.bf16.mxu0 %v6134_v12  ;;  %v6977_v35 = vld [vmem:[#allocation13 + $0x18] ss:$12 sps:$4 sm:$0xff]   ;;  %v6182_v37 = vld [vmem:[#allocation13 + $0x20] ss:$12 sps:$4 sm:$0xff]   ;;  %v6186_v40 = vld [vmem:[#allocation13 + $0x8] ss:$12 sps:$4 sm:$0xff]  }
  0x59   :  { %5777 = vmatprep.mubr.msk.bf16.mxu1 %vm6820_vm0, %v7790_v0  ;;  %460 = vmatprep.mubr.bf16.mxu0 %v7788_v1  ;;  %v6981_v36 = vld [vmem:[#allocation13 + $0x4] ss:$12 sps:$4 sm:$0xff]   ;;  %v6984_v38 = vld [vmem:[#allocation13] ss:$12 sps:$4 sm:$0xff]   ;;  %v6163_v41 = vld [vmem:[#allocation14 + $0xa8] ss:$12 sps:$4 sm:$0xff]  }
  0x5a   :  { %v6988_v39 = vld [vmem:[#allocation14 + $0xac] ss:$12 sps:$4 sm:$0xff]   ;;  %v6169_v42 = vld [vmem:[#allocation14 + $0x94] ss:$12 sps:$4 sm:$0xff]   ;;  %v6190_v43 = vld [vmem:[#allocation14 + $0xb0] ss:$12 sps:$4 sm:$0xff]  }
  0x5b   :  { %5776 = vmatpush3.bf16.msra.mxu1 %v6135_v13  ;;  %443 = vmatpush1.bf16.msra.mxu0 %v6132_v14  ;;  %v6167_v44 = vld [vmem:[#allocation14 + $0x90] ss:$12 sps:$4 sm:$0xff]   ;;  %v6194_v46 = vld [vmem:[#allocation14 + $0x98] ss:$12 sps:$4 sm:$0xff]   ;;  %v6195_v49 = vld [vmem:[#allocation14 + $0x80] ss:$12 sps:$4 sm:$0xff]  }
  0x5c   :  { %5781 = vmatprep.subr.bf16.mxu1 %v7790_v0  ;;  %787 = vmatprep.subr.bf16.mxu0 %v6928_v15  ;;  %v6173_v45 = vld [vmem:[#allocation14 + $0x7c] ss:$12 sps:$4 sm:$0xff]   ;;  %v6171_v47 = vld [vmem:[#allocation14 + $0x78] ss:$12 sps:$4 sm:$0xff]   ;;  %v6175_v50 = vld [vmem:[#allocation14 + $0x60] ss:$12 sps:$4 sm:$0xff]  }
  0x5d   :  { %v6177_v48 = vld [vmem:[#allocation14 + $0x64] ss:$12 sps:$4 sm:$0xff]   ;;  %v6181_v51 = vld [vmem:[#allocation14 + $0x4c] ss:$12 sps:$4 sm:$0xff]   ;;  %v6196_v52 = vld [vmem:[#allocation14 + $0x68] ss:$12 sps:$4 sm:$0xff]  }
  0x5e   :  { %5778 = vmatmul.mubr.msk.bf16.vlgmr.msra.gmra.mxu1 %vm184_vm1, %v6136_v16  ;;  %5180 = vmatmul.mubr.msk.bf16.vlgmr.msra.gmra.mxu0 %vm184_vm1, %v6136_v16  ;;  %v6179_v53 = vld [vmem:[#allocation14 + $0x48] ss:$12 sps:$4 sm:$0xff]   ;;  %v6197_v55 = vld [vmem:[#allocation14 + $0x50] ss:$12 sps:$4 sm:$0xff]   ;;  %v6198_v58 = vld [vmem:[#allocation14 + $0x38] ss:$12 sps:$4 sm:$0xff]  }
  0x5f   :  { %5797 = vmatprep.mubr.msk.bf16.mxu1 %vm6820_vm0, %v7790_v0  ;;  %788 = vmatpush1.bf16.msra.mxu0 %v6931_v17  ;;  %v6185_v54 = vld [vmem:[#allocation14 + $0x34] ss:$12 sps:$4 sm:$0xff]   ;;  %v6183_v56 = vld [vmem:[#allocation14 + $0x30] ss:$12 sps:$4 sm:$0xff]   ;;  %v6187_v59 = vld [vmem:[#allocation14 + $0x18] ss:$12 sps:$4 sm:$0xff]  }
  0x60   :  { %819 = vmatprep.mubr.bf16.mxu0 %v7788_v1  ;;  %789 = vmatprep.subr.bf16.mxu0 %v6935_v18  ;;  %v6189_v57 = vld [vmem:[#allocation14 + $0x1c] ss:$12 sps:$4 sm:$0xff]   ;;  %v6193_v60 = vld [vmem:[#allocation14 + $0x4] ss:$12 sps:$4 sm:$0xff]   ;;  %v6191_v61 = vld [vmem:[#allocation14] ss:$12 sps:$4 sm:$0xff]  }
  0x61   :  { %5782 = vmatpush3.bf16.msra.mxu1 %v6158_v21  ;;  %v6199_v62 = vld [vmem:[#allocation14 + $0x20] ss:$12 sps:$4 sm:$0xff]   ;;  %v6200_v63 = vld [vmem:[#allocation14 + $0x8] ss:$12 sps:$4 sm:$0xff]   ;;  %v6201_v2 = vld [vmem:[#allocation13 + $0xb0] ss:$12 sps:$4 sm:$0xff]  }
  0x62   :  { %5783 = vmatprep.subr.bf16.mxu1 %v7790_v0  ;;  %v6202_v3 = vld [vmem:[#allocation13 + $0x98] ss:$12 sps:$4 sm:$0xff]   ;;  %v6203_v4 = vld [vmem:[#allocation13 + $0x80] ss:$12 sps:$4 sm:$0xff]   ;;  %v6204_v5 = vld [vmem:[#allocation13 + $0x68] ss:$12 sps:$4 sm:$0xff]  }
  0x63   :  { %790 = vmatpush1.bf16.msra.mxu0 %v6942_v19  ;;  %v6205_v6 = vld [vmem:[#allocation13 + $0x50] ss:$12 sps:$4 sm:$0xff]   ;;  %v6206_v7 = vld [vmem:[#allocation13 + $0x38] ss:$12 sps:$4 sm:$0xff]   ;;  %v6207_v8 = vld [vmem:[#allocation13 + $0x20] ss:$12 sps:$4 sm:$0xff]  }
  0x64   :  { %791 = vmatprep.subr.bf16.mxu0 %v6944_v20  ;;  %v6208_v9 = vld [vmem:[#allocation13 + $0x8] ss:$12 sps:$4 sm:$0xff]   ;;  %v133_v11 = vshrl.u32 %v132_v10, 7  ;;  %v130_v13 = vld [vmem:[%s7780_s4] sm:$0x7] }
  0x65   :  { %5784 = vmatpush3.bf16.msra.mxu1 %v6162_v22 }
  0x66   :  { %5785 = vmatprep.subr.bf16.mxu1 %v7790_v0  ;;  %v134_v12 = vsub.s32 0, %v133_v11  ;;  %v142_v14 = vsub.s32 2, %v133_v11 }
  0x67   :  { %792 = vmatpush1.bf16.msra.mxu0 %v6949_v23 }
  0x68   :  { %793 = vmatprep.subr.bf16.mxu0 %v6953_v24 }
  0x69   :  { %5786 = vmatpush3.bf16.msra.mxu1 %v6166_v25 }
  0x6a   :  { %5787 = vmatprep.subr.bf16.mxu1 %v7790_v0 }
  0x6b   :  { %794 = vmatpush1.bf16.msra.mxu0 %v6956_v26 }
  0x6c   :  { %795 = vmatprep.subr.bf16.mxu0 %v6960_v27 }
  0x6d   :  { %5788 = vmatpush3.bf16.msra.mxu1 %v6170_v28  ;;  %v371_v28 = vld [vmem:[%s7781_s5] sm:$0x7] }
  0x6e   :  { %5789 = vmatprep.subr.bf16.mxu1 %v7790_v0 }
  0x6f   :  { %796 = vmatpush1.bf16.msra.mxu0 %v6963_v29 }
  0x70   :  { %797 = vmatprep.subr.bf16.mxu0 %v6967_v30 }
  0x71   :  { %5790 = vmatpush3.bf16.msra.mxu1 %v6174_v31 }
  0x72   :  { %5791 = vmatprep.subr.bf16.mxu1 %v7790_v0 }
  0x73   :  { %798 = vmatpush1.bf16.msra.mxu0 %v6970_v32 }
  0x74   :  { %799 = vmatprep.subr.bf16.mxu0 %v6974_v33 }
  0x75   :  { %5792 = vmatpush3.bf16.msra.mxu1 %v6178_v34 }
  0x76   :  { %5793 = vmatprep.subr.bf16.mxu1 %v7790_v0 }
  0x77   :  { %800 = vmatpush1.bf16.msra.mxu0 %v6977_v35 }
  0x78   :  { %801 = vmatprep.subr.bf16.mxu0 %v6981_v36 }
  0x79   :  { %5794 = vmatpush3.bf16.msra.mxu1 %v6182_v37 }
  0x7a   :  { %5795 = vmatprep.subr.bf16.mxu1 %v7790_v0 }
  0x7b   :  { %802 = vmatpush1.bf16.msra.mxu0 %v6984_v38 }
  0x7c   :  { %1054 = vmatprep.subr.bf16.mxu0 %v6988_v39 }
  0x7d   :  { %5796 = vmatpush3.bf16.msra.mxu1 %v6186_v40  ;;  %v384_v40 = vrot.slane %v371_v28, %v142_v14 }
  0x7e   :  { %820 = vmatmul.mubr.bf16.vlgmr.msra.gmra.mxu0 %v7788_v1  ;;  %5801 = vmatprep.subr.bf16.mxu1 %v7790_v0 }
  0x7f   :  { %1055 = vmatpush1.bf16.msra.mxu0 %v6163_v41  ;;  %1086 = vmatprep.mubr.bf16.mxu0 %v7788_v1 }
  0x80   :  { %1056 = vmatprep.subr.bf16.mxu0 %v6169_v42  ;;  %5798 = vmatmul.mubr.bf16.vlgmr.msra.gmra.mxu1 %v7788_v1 }
  0x81   :  { %5802 = vmatpush3.bf16.msra.mxu1 %v6190_v43  ;;  %5817 = vmatprep.mubr.msk.bf16.mxu1 %vm6820_vm0, %v7790_v0 }
  0x82   :  { %5803 = vmatprep.subr.bf16.mxu1 %v7790_v0 }
  0x83   :  { %1057 = vmatpush1.bf16.msra.mxu0 %v6167_v44 }
  0x84   :  { %1058 = vmatprep.subr.bf16.mxu0 %v6173_v45 }
  0x85   :  { %5804 = vmatpush3.bf16.msra.mxu1 %v6194_v46 }
  0x86   :  { %5805 = vmatprep.subr.bf16.mxu1 %v7790_v0 }
  0x87   :  { %1059 = vmatpush1.bf16.msra.mxu0 %v6171_v47 }
  0x88   :  { %1060 = vmatprep.subr.bf16.mxu0 %v6177_v48 }
  0x89   :  { %5806 = vmatpush3.bf16.msra.mxu1 %v6195_v49 }
  0x8a   :  { %5807 = vmatprep.subr.bf16.mxu1 %v7790_v0 }
  0x8b   :  { %1061 = vmatpush1.bf16.msra.mxu0 %v6175_v50 }
  0x8c   :  { %1062 = vmatprep.subr.bf16.mxu0 %v6181_v51 }
  0x8d   :  { %5808 = vmatpush3.bf16.msra.mxu1 %v6196_v52 }
  0x8e   :  { %5809 = vmatprep.subr.bf16.mxu1 %v7790_v0 }
  0x8f   :  { %1063 = vmatpush1.bf16.msra.mxu0 %v6179_v53 }
  0x90   :  { %1064 = vmatprep.subr.bf16.mxu0 %v6185_v54 }
  0x91   :  { %5810 = vmatpush3.bf16.msra.mxu1 %v6197_v55 }
  0x92   :  { %5811 = vmatprep.subr.bf16.mxu1 %v7790_v0 }
  0x93   :  { %1065 = vmatpush1.bf16.msra.mxu0 %v6183_v56 }
  0x94   :  { %1066 = vmatprep.subr.bf16.mxu0 %v6189_v57 }
  0x95   :  { %5812 = vmatpush3.bf16.msra.mxu1 %v6198_v58 }
  0x96   :  { %5813 = vmatprep.subr.bf16.mxu1 %v7790_v0 }
  0x97   :  { %1067 = vmatpush1.bf16.msra.mxu0 %v6187_v59 }
  0x98   :  { %1068 = vmatprep.subr.bf16.mxu0 %v6193_v60 }
  0x99   :  { %5814 = vmatpush3.bf16.msra.mxu1 %v6199_v62 }
  0x9a   :  { %5815 = vmatprep.subr.bf16.mxu1 %v7790_v0 }
  0x9b   :  { %1069 = vmatpush1.bf16.msra.mxu0 %v6191_v61 }
  0x9c   :  { %1344 = vmatprep.subr.bf16.mxu0 %v6928_v15  ;;  %v6822_v15 = vmov 1966171168  }
  0x9d   :  { %5816 = vmatpush3.bf16.msra.mxu1 %v6200_v63  ;;  %v282_v16 = vunpack.c.l.s4 %v6822_v15 }
  0x9e   :  { %1087 = vmatmul.mubr.bf16.vlgmr.msra.gmra.mxu0 %v7788_v1  ;;  %5821 = vmatprep.subr.bf16.mxu1 %v7790_v0 }
  0x9f   :  { %1345 = vmatpush1.bf16.msra.mxu0 %v6931_v17  ;;  %1376 = vmatprep.mubr.bf16.mxu0 %v7788_v1  ;;  %v138_v17 = vsub.s32 1, %v133_v11  ;;  %v283_v21 = vunpack.c.0.s8 %v282_v16 }
  0xa0   :  { %1346 = vmatprep.subr.bf16.mxu0 %v6935_v18  ;;  %5818 = vmatmul.mubr.bf16.vlgmr.msra.gmra.mxu1 %v7788_v1  ;;  %v135_v18 = vrot.slane %v130_v13, %v134_v12 }
  0xa1   :  { %5837 = vmatprep.mubr.msk.bf16.mxu1 %vm6820_vm0, %v7790_v0  ;;  %5822 = vmatpush3.bf16.msra.mxu1 %v6201_v2  ;;  %v139_v22 = vrot.slane %v130_v13, %v138_v17  ;;  %v380_v45 = vrot.slane %v371_v28, %v138_v17 }
  0xa2   :  { %5823 = vmatprep.subr.bf16.mxu1 %v7790_v0 }
  0xa3   :  { %1347 = vmatpush1.bf16.msra.mxu0 %v6942_v19  ;;  %v143_v19 = vrot.slane %v130_v13, %v142_v14 }
  0xa4   :  { %1348 = vmatprep.subr.bf16.mxu0 %v6944_v20 }
  0xa5   :  { %5824 = vmatpush3.bf16.msra.mxu1 %v6202_v3 }
  0xa6   :  { %5825 = vmatprep.subr.bf16.mxu1 %v7790_v0 }
  0xa7   :  { %1349 = vmatpush1.bf16.msra.mxu0 %v6949_v23 }
  0xa8   :  { %1350 = vmatprep.subr.bf16.mxu0 %v6953_v24 }
  0xa9   :  { %5826 = vmatpush3.bf16.msra.mxu1 %v6203_v4 }
  0xaa   :  { %5827 = vmatprep.subr.bf16.mxu1 %v7790_v0 }
  0xab   :  { %1351 = vmatpush1.bf16.msra.mxu0 %v6956_v26 }
  0xac   :  { %1352 = vmatprep.subr.bf16.mxu0 %v6960_v27 }
  0xad   :  { %5828 = vmatpush3.bf16.msra.mxu1 %v6204_v5 }
  0xae   :  { %5829 = vmatprep.subr.bf16.mxu1 %v7790_v0 }
  0xaf   :  { %1353 = vmatpush1.bf16.msra.mxu0 %v6963_v29  ;;  %v7043_v29 = vsub.s32 %v283_v21, %v133_v11 }
  0xb0   :  { %1354 = vmatprep.subr.bf16.mxu0 %v6967_v30 }
  0xb1   :  { %5830 = vmatpush3.bf16.msra.mxu1 %v6205_v6 }
  0xb2   :  { %5831 = vmatprep.subr.bf16.mxu1 %v7790_v0 }
  0xb3   :  { %1355 = vmatpush1.bf16.msra.mxu0 %v6970_v32 }
  0xb4   :  { %1356 = vmatprep.subr.bf16.mxu0 %v6974_v33 }
  0xb5   :  { %5832 = vmatpush3.bf16.msra.mxu1 %v6206_v7 }
  0xb6   :  { %5833 = vmatprep.subr.bf16.mxu1 %v7790_v0 }
  0xb7   :  { %1357 = vmatpush1.bf16.msra.mxu0 %v6977_v35 }
  0xb8   :  { %1358 = vmatprep.subr.bf16.mxu0 %v6981_v36  ;;  %v376_v36 = vrot.slane %v371_v28, %v134_v12 }
  0xb9   :  { %5834 = vmatpush3.bf16.msra.mxu1 %v6207_v8 }
  0xba   :  { %5835 = vmatprep.subr.bf16.mxu1 %v7790_v0 }
  0xbb   :  { %1359 = vmatpush1.bf16.msra.mxu0 %v6984_v38 }
  0xbc   :  { %1612 = vmatprep.subr.bf16.mxu0 %v6988_v39 }
  0xbd   :  { %5836 = vmatpush3.bf16.msra.mxu1 %v6208_v9 }
  0xbe   :  { %5841 = vmatprep.subr.bf16.mxu1 %v7790_v0 }
 0x116   :  { %v265_v20 = vpop.f32.mrf.mxu1  ;;  %v222_v23 = vpop.f32.mrf.mxu0 }
 0x117   :  { %v223_v24 = vadd.f32 %v222_v23, %v135_v18  ;;  %v266_v26 = vadd.f32 %v265_v20, %v143_v19 }
 0x118   :  { %v5771_v25 = vpop.f32.mrf.mxu1  ;;  %v224_v27 = vpop.f32.mrf.mxu0 }
 0x119   :  { %v225_v30 = vadd.f32 %v224_v27, %v139_v22 }
 0x11a   :  { %v268_v31 = vpop.f32.mrf.mxu1  ;;  %v226_v33 = vpop.f32.mrf.mxu0 }
 0x11b   :  { %v269_v32 = vadd.f32 %v268_v31, %v143_v19  ;;  %v5166_v34 = vpack.c.bf16 %v225_v30, %v223_v24  ;;  %v227_v42 = vadd.f32 %v226_v33, %v135_v18 }
 0x11c   :  { %v5772_v35 = vpop.f32.mrf.mxu1  ;;  %v228_v39 = vpop.f32.mrf.mxu0 }
 0x11d   :  { %v274_v37 = vpack.c.bf16 %v269_v32, %v266_v26  ;;  %v5168_v38 = vpack.c.bf16 %v269_v32, %v269_v32  ;;  %v287_v41 = vrot.slane %v5166_v34, %v7043_v29  ;;  %v229_v43 = vadd.f32 %v228_v39, %v139_v22 }
 0x11e   :  { %v505_v44 = vpop.f32.mrf.mxu1  ;;  %v462_v47 = vpop.f32.mrf.mxu0 }
 0x11f   :  { %v301_v46 = vrot.slane %v274_v37, %v7043_v29  ;;  %v308_v48 = vrot.slane %v5168_v38, %v7043_v29  ;;  %v5167_v49 = vpack.c.bf16 %v229_v43, %v227_v42  ;;  %v463_v50 = vadd.f32 %v462_v47, %v376_v36 }
 0x120   :  { %v5779_v51 = vpop.f32.mrf.mxu1  ;;  %v506_v54 = vadd.f32 %v505_v44, %v384_v40  ;;  %v464_v55 = vpop.f32.mrf.mxu0 }
 0x121   :  { %v309_v52 = vcombine.low %v287_v41, %v301_v46  ;;  %v310_v53 = vcombine.high %v287_v41, %v301_v46  ;;  %v294_v56 = vrot.slane %v5167_v49, %v7043_v29  ;;  %v465_v57 = vadd.f32 %v464_v55, %v380_v45 }
 0x122   :  { %v508_v58 = vpop.f32.mrf.mxu1  ;;  %v466_v62 = vpop.f32.mrf.mxu0 }
 0x123   :  { %v319_v59 = vrot.slane %v309_v52, %v7043_v29  ;;  %v333_v60 = vrot.slane %v310_v53, %v7043_v29  ;;  %5169 = vst.sshfl [vmem:[#allocation2] sm:$0x15 pattern:$0x73625140] %v309_v52  ;;  %v509_v61 = vadd.f32 %v508_v58, %v384_v40  ;;  %v311_v63 = vcombine.low %v294_v56, %v308_v48 }
 0x124   :  { %5170 = vst.sshfl [vmem:[#allocation2 + $0x3] sm:$0x15 pattern:$0x73625140] %v310_v53  ;;  %v312_v2 = vcombine.high %v294_v56, %v308_v48  ;;  %v5182_v3 = vpack.c.bf16 %v465_v57, %v463_v50  ;;  %v467_v4 = vadd.f32 %v466_v62, %v376_v36  ;;  %v5780_v5 = vpop.f32.mrf.mxu1  ;;  %v468_v10 = vpop.f32.mrf.mxu0  ;;  %v7064_v50 = vld [vmem:[%s7783_s7] ss:$0 sm:$0xff] }
 0x125   :  { %v341_v6 = vcombine.high %v319_v59, %v319_v59  ;;  %v343_v7 = vcombine.high %v333_v60, %v333_v60  ;;  %v514_v8 = vpack.c.bf16 %v509_v61, %v506_v54  ;;  %v5184_v9 = vpack.c.bf16 %v509_v61, %v509_v61  ;;  %5171 = vst.sshfl [vmem:[#allocation2 + $0xc] sm:$0x15 pattern:$0x73625140] %v311_v63 }
 0x126   :  { %v326_v11 = vrot.slane %v311_v63, %v7043_v29  ;;  %v340_v12 = vrot.slane %v312_v2, %v7043_v29  ;;  %5172 = vst.sshfl [vmem:[#allocation2 + $0xf] sm:$0x15 pattern:$0x73625140] %v312_v2  ;;  %v527_v13 = vrot.slane %v5182_v3, %v7043_v29  ;;  %v469_v14 = vadd.f32 %v468_v10, %v380_v45 }
 0x127   :  { %355 = vst [vmem:[#allocation2 + $0x6] sm:$0x7] %v341_v6  ;;  %356 = vst [vmem:[#allocation2 + $0x9] sm:$0x7] %v343_v7  ;;  %v541_v15 = vrot.slane %v514_v8, %v7043_v29  ;;  %v548_v18 = vrot.slane %v5184_v9, %v7043_v29 }
 0x128   :  { %v342_v16 = vcombine.high %v326_v11, %v326_v11  ;;  %v344_v17 = vcombine.high %v340_v12, %v340_v12  ;;  %v5183_v19 = vpack.c.bf16 %v469_v14, %v467_v4  ;;  %v7071_v12 = vld [vmem:[#allocation8] sm:$0x3] }
 0x129   :  { %v549_v20 = vcombine.low %v527_v13, %v541_v15  ;;  %v550_v21 = vcombine.high %v527_v13, %v541_v15  ;;  %vm616_vm2 = vcmp.gt.s32.totalorder %v7071_v12, 0  ;;  %vm619_vm3 = vcmp.gt.s32.totalorder %v7071_v12, 7 }
 0x12a   :  { %359 = vst [vmem:[#allocation2 + $0x12] sm:$0x7] %v342_v16  ;;  %360 = vst [vmem:[#allocation2 + $0x15] sm:$0x7] %v344_v17  ;;  %v534_v22 = vrot.slane %v5183_v19, %v7043_v29  ;;  %v622_v34 = vld [vmem:[#allocation2] sm:$0x7] }
 0x12b   :  { %v559_v23 = vrot.slane %v549_v20, %v7043_v29  ;;  %v573_v24 = vrot.slane %v550_v21, %v7043_v29  ;;  %5185 = vst.sshfl [vmem:[#allocation3] sm:$0x15 pattern:$0x73625140] %v549_v20  ;;  %v623_v35 = vunpack.c.l.bf16 %v622_v34  ;;  %v6619_v34 = vld [vmem:[#allocation14 + $0x90] ss:$12 sps:$4 sm:$0xff]  }
 0x12c   :  { %5186 = vst.sshfl [vmem:[#allocation3 + $0x3] sm:$0x15 pattern:$0x73625140] %v550_v21  ;;  %v551_v25 = vcombine.low %v534_v22, %v548_v18  ;;  %v552_v26 = vcombine.high %v534_v22, %v548_v18  ;;  %v7075_v18 = vsel %vm616_vm2, 1.0, %v7790_v0  ;;  %vm1171_vm4 = vcmp.gt.s32.totalorder %v7071_v12, 1 }
 0x12d   :  { %v581_v27 = vcombine.high %v559_v23, %v559_v23  ;;  %v583_v28 = vcombine.high %v573_v24, %v573_v24  ;;  %v876_v45 = vrot.slane %v623_v35, 2  ;;  %v887_v60 = vrot.slane %v623_v35, 4  ;;  %v7083_v21 = vld [vmem:[%s7785_s9] ss:$0 sm:$0xff] }
 0x12e   :  { %v566_v30 = vrot.slane %v551_v25, %v7043_v29  ;;  %v580_v31 = vrot.slane %v552_v26, %v7043_v29  ;;  %5187 = vst.sshfl [vmem:[#allocation3 + $0xc] sm:$0x15 pattern:$0x73625140] %v551_v25  ;;  %v6209_v22 = vld [vmem:[#allocation14 + $0xb0] ss:$12 sps:$4 sm:$0xff]  }
 0x12f   :  { %5188 = vst.sshfl [vmem:[#allocation3 + $0xf] sm:$0x15 pattern:$0x73625140] %v552_v26  ;;  %595 = vst [vmem:[#allocation3 + $0x6] sm:$0x7] %v581_v27 }
 0x130   :  { %596 = vst [vmem:[#allocation3 + $0x9] sm:$0x7] %v583_v28  ;;  %v582_v32 = vcombine.high %v566_v30, %v566_v30  ;;  %v584_v33 = vcombine.high %v580_v31, %v580_v31  ;;  %v6617_v26 = vld [vmem:[#allocation14 + $0xa8] ss:$12 sps:$4 sm:$0xff]   ;;  %v6210_v27 = vld [vmem:[#allocation14 + $0x98] ss:$12 sps:$4 sm:$0xff]  }
 0x131   :  { %v6618_v30 = vld [vmem:[#allocation14 + $0x94] ss:$12 sps:$4 sm:$0xff]   ;;  %vm1174_vm5 = vcmp.gt.s32.totalorder %v7071_v12, 6  ;;  %vm1732_vm6 = vcmp.gt.s32.totalorder %v7071_v12, 2  ;;  %vm1735_vm7 = vcmp.gt.s32.totalorder %v7071_v12, 5 }
 0x132   :  { %599 = vst [vmem:[#allocation3 + $0x12] sm:$0x7] %v582_v32  ;;  %600 = vst [vmem:[#allocation3 + $0x15] sm:$0x7] %v584_v33 }
 0x139   :  { %v625_v51 = vld [vmem:[#allocation3 + $0x15] sm:$0x7] }
 0x13a   :  { %v7067_v53 = vunpack.c.l.bf16 %v625_v51 }
 0x13c   :  { %v1143_v8 = vrot.slane %v7067_v53, 2  ;;  %v1154_v33 = vrot.slane %v7067_v53, 4 }
 0x13e   :  { %v821_v36 = vpop.f32.mrf.mxu0 }
 0x13f   :  { %v868_v37 = vadd.f32 %v821_v36, %v623_v35  ;;  %v6211_v35 = vld [vmem:[#allocation14 + $0x80] ss:$12 sps:$4 sm:$0xff]  }
 0x140   :  { %v823_v38 = vpop.f32.mrf.mxu0  ;;  %v862_v40 = vpop.f32.mrf.mxu1 }
 0x141   :  { %v5217_v39 = vmul.f32 -1.442695, %v868_v37  ;;  %v878_v46 = vadd.f32 %v876_v45, %v823_v38  ;;  %v885_v52 = vadd.f32 %v7064_v50, %v862_v40  ;;  %v6620_v38 = vld [vmem:[#allocation14 + $0x7c] ss:$12 sps:$4 sm:$0xff]   ;;  %v6214_v45 = vld [vmem:[#allocation14 + $0x38] ss:$12 sps:$4 sm:$0xff]  }
 0x142   :  { %v825_v41 = vpop.f32.mrf.mxu0  ;;  %v5799_v42 = vpop.f32.mrf.mxu1  ;;  %v6212_v40 = vld [vmem:[#allocation14 + $0x68] ss:$12 sps:$4 sm:$0xff]  }
 0x143   :  { %6457 = vpow2.f32 %v5217_v39  ;;  %v5218_v47 = vmul.f32 -1.442695, %v878_v46  ;;  %v6621_v39 = vld [vmem:[#allocation14 + $0x78] ss:$12 sps:$4 sm:$0xff]   ;;  %v6623_v42 = vld [vmem:[#allocation14 + $0x60] ss:$12 sps:$4 sm:$0xff]  }
 0x144   :  { %v826_v43 = vpop.f32.mrf.mxu0  ;;  %v865_v29 = vpop.f32.mrf.mxu1  ;;  %v6622_v41 = vld [vmem:[#allocation14 + $0x64] ss:$12 sps:$4 sm:$0xff]   ;;  %v6626_v46 = vld [vmem:[#allocation14 + $0x34] ss:$12 sps:$4 sm:$0xff]  }
 0x145   :  { %6459 = vpow2.f32 %v5218_v47  ;;  %v6213_v43 = vld [vmem:[#allocation14 + $0x50] ss:$12 sps:$4 sm:$0xff]   ;;  %v6624_v29 = vld [vmem:[#allocation14 + $0x4c] ss:$12 sps:$4 sm:$0xff]  }
 0x146   :  { %v5800_v44 = vpop.f32.mrf.mxu1 }
 0x147   :  { %v6625_v44 = vld [vmem:[#allocation14 + $0x48] ss:$12 sps:$4 sm:$0xff]  }
 0x150   :  { %v6458_v48 = vpop.eup %6457 }
 0x151   :  { %v872_v49 = vadd.f32 1.0, %v6458_v48  ;;  %v6627_v48 = vld [vmem:[#allocation14 + $0x30] ss:$12 sps:$4 sm:$0xff]  }
 0x152   :  { %v6460_v55 = vpop.eup %6459 }
 0x153   :  { %6461 = vrcp.f32 %v872_v49  ;;  %v882_v2 = vadd.f32 1.0, %v6460_v55  ;;  %v6215_v49 = vld [vmem:[#allocation14 + $0x20] ss:$12 sps:$4 sm:$0xff]   ;;  %v6629_v55 = vld [vmem:[#allocation14 + $0x18] ss:$12 sps:$4 sm:$0xff]  }
 0x15e   :  { %v1088_v54 = vpop.f32.mrf.mxu0 }
 0x15f   :  { %v1135_v56 = vadd.f32 %v1088_v54, %v7067_v53 }
 0x160   :  { %v6462_v57 = vpop.eup %6461  ;;  %v1090_v58 = vpop.f32.mrf.mxu0 }
 0x161   :  { %v886_v59 = vmul.f32 %v6462_v57, %v885_v52  ;;  %v5243_v61 = vmul.f32 -1.442695, %v1135_v56  ;;  %v1129_v62 = vpop.f32.mrf.mxu1  ;;  %v1145_v9 = vadd.f32 %v1143_v8, %v1090_v58  ;;  %v6628_v52 = vld [vmem:[#allocation14 + $0x1c] ss:$12 sps:$4 sm:$0xff]   ;;  %v7102_v57 = vsel %vm619_vm3, 1.0, %v7790_v0 }
 0x162   :  { %v1092_v63 = vpop.f32.mrf.mxu0  ;;  %v1152_v25 = vadd.f32 %v7083_v21, %v1129_v62  ;;  %v6216_v56 = vld [vmem:[#allocation14 + $0x8] ss:$12 sps:$4 sm:$0xff]   ;;  %v6224_v8 = vld [vmem:[#allocation13 + $0x98] ss:$12 sps:$4 sm:$0xff]  }
 0x163   :  { %v889_v3 = vadd.f32 %v887_v60, %v886_v59  ;;  %6463 = vpow2.f32 %v5243_v61  ;;  %v5819_v4 = vpop.f32.mrf.mxu1  ;;  %v5244_v10 = vmul.f32 -1.442695, %v1145_v9  ;;  %v6630_v59 = vld [vmem:[#allocation14 + $0x4] ss:$12 sps:$4 sm:$0xff]   ;;  %v6631_v61 = vld [vmem:[#allocation14] ss:$12 sps:$4 sm:$0xff]  }
 0x164   :  { %v1093_v5 = vpop.f32.mrf.mxu0  ;;  %v7118_v4 = vld [vmem:[#allocation13 + $0xa8] ss:$12 sps:$4 sm:$0xff]  }
 0x165   :  { %6465 = vtanh.f32 %v889_v3  ;;  %v1132_v6 = vpop.f32.mrf.mxu1  ;;  %v7116_v3 = vld [vmem:[#allocation13 + $0xac] ss:$12 sps:$4 sm:$0xff]   ;;  %v6220_v5 = vld [vmem:[#allocation13 + $0xb0] ss:$12 sps:$4 sm:$0xff]  }
 0x166   :  { %6467 = vrcp.f32 %v882_v2  ;;  %v7122_v6 = vld [vmem:[#allocation13 + $0x94] ss:$12 sps:$4 sm:$0xff]   ;;  %v7129_v9 = vld [vmem:[#allocation13 + $0x7c] ss:$12 sps:$4 sm:$0xff]  }
 0x167   :  { %v5820_v7 = vpop.f32.mrf.mxu1  ;;  %6469 = vpow2.f32 %v5244_v10  ;;  %v7132_v10 = vld [vmem:[#allocation13 + $0x78] ss:$12 sps:$4 sm:$0xff]  }
 0x168   :  { %v7125_v7 = vld [vmem:[#allocation13 + $0x90] ss:$12 sps:$4 sm:$0xff]  }
 0x170   :  { %v6464_v11 = vpop.eup %6463 }
 0x171   :  { %v1139_v13 = vadd.f32 1.0, %v6464_v11  ;;  %v6228_v11 = vld [vmem:[#allocation13 + $0x80] ss:$12 sps:$4 sm:$0xff]  }
 0x172   :  { %v6466_v14 = vpop.eup %6465 }
 0x173   :  { %v891_v15 = vsub.f32 0.0, %v6466_v14  ;;  %6471 = vrcp.f32 %v1139_v13  ;;  %v6468_v16 = vpop.eup %6467  ;;  %v7136_v13 = vld [vmem:[#allocation13 + $0x64] ss:$12 sps:$4 sm:$0xff]  }
 0x174   :  { %v6470_v28 = vpop.eup %6469 }
 0x175   :  { %v892_v17 = vmul.f32 %v6468_v16, %v891_v15  ;;  %v1149_v36 = vadd.f32 1.0, %v6470_v28  ;;  %v6232_v15 = vld [vmem:[#allocation13 + $0x68] ss:$12 sps:$4 sm:$0xff]   ;;  %v7143_v16 = vld [vmem:[#allocation13 + $0x4c] ss:$12 sps:$4 sm:$0xff]  }
 0x176   :  { %v7164_v28 = vld [vmem:[#allocation13 + $0x4] ss:$12 sps:$4 sm:$0xff]  }
 0x177   :  { %v893_v19 = vadd.f32 %v6466_v14, %v892_v17  ;;  %v7139_v14 = vld [vmem:[#allocation13 + $0x60] ss:$12 sps:$4 sm:$0xff]   ;;  %v7146_v17 = vld [vmem:[#allocation13 + $0x48] ss:$12 sps:$4 sm:$0xff]  }
 0x179   :  { %v7078_v20 = vmul.f32 %v7075_v18, %v893_v19  ;;  %v6236_v19 = vld [vmem:[#allocation13 + $0x50] ss:$12 sps:$4 sm:$0xff]  }
 0x17b   :  { %v1165_v23 = vmul.f32 %v7075_v18, %v7078_v20  ;;  %v1183_v24 = vpack.c.bf16 %v7078_v20, %v7078_v20 }
 0x17d   :  { %1166 = vst [vmem:[#allocation16] sm:$0x3] %v1165_v23  ;;  %1377 = vmatmul.mubr.bf16.vlgmr.msra.gmra.mxu0 %v1183_v24  ;;  %5838 = vmatmul.mubr.bf16.vlgmr.msra.gmra.mxu1 %v1183_v24  ;;  %v7153_v23 = vld [vmem:[#allocation13 + $0x30] ss:$12 sps:$4 sm:$0xff]   ;;  %v6240_v24 = vld [vmem:[#allocation13 + $0x38] ss:$12 sps:$4 sm:$0xff]  }
 0x17e   :  { %1613 = vmatpush1.bf16.msra.mxu0 %v6617_v26  ;;  %5842 = vmatpush3.bf16.msra.mxu1 %v6209_v22  ;;  %v7150_v22 = vld [vmem:[#allocation13 + $0x34] ss:$12 sps:$4 sm:$0xff]   ;;  %v7160_v26 = vld [vmem:[#allocation13 + $0x18] ss:$12 sps:$4 sm:$0xff]  }
 0x17f   :  { %1614 = vmatprep.subr.bf16.mxu0 %v6618_v30  ;;  %5843 = vmatprep.subr.bf16.mxu1 %v7790_v0  ;;  %v7167_v30 = vld [vmem:[#allocation13] ss:$12 sps:$4 sm:$0xff]  }
 0x180   :  { %v6472_v31 = vpop.eup %6471  ;;  %1644 = vmatprep.mubr.bf16.mxu0 %v7788_v1  ;;  %5857 = vmatprep.mubr.msk.bf16.mxu1 %vm6820_vm0, %v7790_v0 }
 0x181   :  { %v1153_v32 = vmul.f32 %v6472_v31, %v1152_v25  ;;  %v7157_v25 = vld [vmem:[#allocation13 + $0x1c] ss:$12 sps:$4 sm:$0xff]  }
 0x182   :  { %1615 = vmatpush1.bf16.msra.mxu0 %v6619_v34  ;;  %5844 = vmatpush3.bf16.msra.mxu1 %v6210_v27  ;;  %v6244_v27 = vld [vmem:[#allocation13 + $0x20] ss:$12 sps:$4 sm:$0xff]   ;;  %v6248_v31 = vld [vmem:[#allocation13 + $0x8] ss:$12 sps:$4 sm:$0xff]  }
 0x183   :  { %v1156_v37 = vadd.f32 %v1154_v33, %v1153_v32  ;;  %1616 = vmatprep.subr.bf16.mxu0 %v6620_v38  ;;  %5845 = vmatprep.subr.bf16.mxu1 %v7790_v0  ;;  %v7171_v32 = vld [vmem:[#allocation14 + $0xac] ss:$12 sps:$4 sm:$0xff]   ;;  %v1178_v33 = vld [vmem:[#allocation2 + $0x3] sm:$0x7] }
 0x184   :  { %v1179_v34 = vunpack.c.l.bf16 %v1178_v33 }
 0x185   :  { %6473 = vtanh.f32 %v1156_v37 }
 0x186   :  { %1617 = vmatpush1.bf16.msra.mxu0 %v6621_v39  ;;  %5846 = vmatpush3.bf16.msra.mxu1 %v6211_v35  ;;  %6475 = vrcp.f32 %v1149_v36 }
 0x187   :  { %1618 = vmatprep.subr.bf16.mxu0 %v6622_v41  ;;  %5847 = vmatprep.subr.bf16.mxu1 %v7790_v0 }
 0x18a   :  { %1619 = vmatpush1.bf16.msra.mxu0 %v6623_v42  ;;  %5848 = vmatpush3.bf16.msra.mxu1 %v6212_v40 }
 0x18b   :  { %1620 = vmatprep.subr.bf16.mxu0 %v6624_v29  ;;  %5849 = vmatprep.subr.bf16.mxu1 %v7790_v0 }
 0x18e   :  { %1621 = vmatpush1.bf16.msra.mxu0 %v6625_v44  ;;  %5850 = vmatpush3.bf16.msra.mxu1 %v6213_v43  ;;  %v1433_v44 = vrot.slane %v1179_v34, 2 }
 0x18f   :  { %1622 = vmatprep.subr.bf16.mxu0 %v6626_v46  ;;  %5851 = vmatprep.subr.bf16.mxu1 %v7790_v0 }
 0x192   :  { %v6474_v47 = vpop.eup %6473  ;;  %1623 = vmatpush1.bf16.msra.mxu0 %v6627_v48  ;;  %5852 = vmatpush3.bf16.msra.mxu1 %v6214_v45 }
 0x193   :  { %v1158_v51 = vsub.f32 0.0, %v6474_v47  ;;  %1624 = vmatprep.subr.bf16.mxu0 %v6628_v52  ;;  %5853 = vmatprep.subr.bf16.mxu1 %v7790_v0  ;;  %v6476_v53 = vpop.eup %6475 }
 0x195   :  { %v1159_v54 = vmul.f32 %v6476_v53, %v1158_v51 }
 0x196   :  { %1625 = vmatpush1.bf16.msra.mxu0 %v6629_v55  ;;  %5854 = vmatpush3.bf16.msra.mxu1 %v6215_v49  ;;  %v1181_v49 = vld [vmem:[#allocation3 + $0x12] sm:$0x7] }
 0x197   :  { %v1160_v58 = vadd.f32 %v6474_v47, %v1159_v54  ;;  %1626 = vmatprep.subr.bf16.mxu0 %v6630_v59  ;;  %5855 = vmatprep.subr.bf16.mxu1 %v7790_v0  ;;  %v1182_v51 = vunpack.c.l.bf16 %v1181_v49 }
 0x199   :  { %v7106_v60 = vmul.f32 %v7102_v57, %v1160_v58 }
 0x19a   :  { %1627 = vmatpush1.bf16.msra.mxu0 %v6631_v61  ;;  %5856 = vmatpush3.bf16.msra.mxu1 %v6216_v56 }
 0x19b   :  { %v1167_v62 = vmul.f32 %v7102_v57, %v7106_v60  ;;  %v1451_v63 = vpack.c.bf16 %v7106_v60, %v7106_v60  ;;  %5861 = vmatprep.subr.bf16.mxu1 %v7790_v0  ;;  %1905 = vmatprep.subr.bf16.mxu0 %v7116_v3 }
 0x19d   :  { %v1168_v2 = vpack.c.bf16 %v1167_v62, %v1167_v62  ;;  %1645 = vmatmul.mubr.bf16.vlgmr.msra.gmra.mxu0 %v1451_v63  ;;  %5858 = vmatmul.mubr.bf16.vlgmr.msra.gmra.mxu1 %v1451_v63  ;;  %v1444_v63 = vrot.slane %v1179_v34, 4 }
 0x19e   :  { %1937 = vmatprep.mubr.bf16.mxu0 %v7788_v1  ;;  %5877 = vmatprep.mubr.msk.bf16.mxu1 %vm6820_vm0, %v7790_v0 }
 0x19f   :  { %1170 = vst [vmem:[#allocation4 + $0x7] sm:$0x1] %v1168_v2  ;;  %1906 = vmatpush1.bf16.msra.mxu0 %v7118_v4  ;;  %5862 = vmatpush3.bf16.msra.mxu1 %v6220_v5 }
 0x1a0   :  { %5863 = vmatprep.subr.bf16.mxu1 %v7790_v0  ;;  %1907 = vmatprep.subr.bf16.mxu0 %v7122_v6 }
 0x1a3   :  { %1908 = vmatpush1.bf16.msra.mxu0 %v7125_v7  ;;  %5864 = vmatpush3.bf16.msra.mxu1 %v6224_v8 }
 0x1a4   :  { %5865 = vmatprep.subr.bf16.mxu1 %v7790_v0  ;;  %1909 = vmatprep.subr.bf16.mxu0 %v7129_v9 }
 0x1a7   :  { %1910 = vmatpush1.bf16.msra.mxu0 %v7132_v10  ;;  %5866 = vmatpush3.bf16.msra.mxu1 %v6228_v11 }
 0x1a8   :  { %5867 = vmatprep.subr.bf16.mxu1 %v7790_v0  ;;  %1911 = vmatprep.subr.bf16.mxu0 %v7136_v13 }
 0x1ab   :  { %1912 = vmatpush1.bf16.msra.mxu0 %v7139_v14  ;;  %5868 = vmatpush3.bf16.msra.mxu1 %v6232_v15 }
 0x1ac   :  { %5869 = vmatprep.subr.bf16.mxu1 %v7790_v0  ;;  %1913 = vmatprep.subr.bf16.mxu0 %v7143_v16 }
 0x1af   :  { %1914 = vmatpush1.bf16.msra.mxu0 %v7146_v17  ;;  %5870 = vmatpush3.bf16.msra.mxu1 %v6236_v19 }
 0x1b0   :  { %5871 = vmatprep.subr.bf16.mxu1 %v7790_v0  ;;  %1915 = vmatprep.subr.bf16.mxu0 %v7150_v22 }
 0x1b3   :  { %1916 = vmatpush1.bf16.msra.mxu0 %v7153_v23  ;;  %5872 = vmatpush3.bf16.msra.mxu1 %v6240_v24 }
 0x1b4   :  { %5873 = vmatprep.subr.bf16.mxu1 %v7790_v0  ;;  %1917 = vmatprep.subr.bf16.mxu0 %v7157_v25 }
 0x1b7   :  { %1918 = vmatpush1.bf16.msra.mxu0 %v7160_v26  ;;  %5874 = vmatpush3.bf16.msra.mxu1 %v6244_v27  ;;  %v1701_v27 = vrot.slane %v1182_v51, 2 }
 0x1b8   :  { %5875 = vmatprep.subr.bf16.mxu1 %v7790_v0  ;;  %1919 = vmatprep.subr.bf16.mxu0 %v7164_v28 }
 0x1bb   :  { %1920 = vmatpush1.bf16.msra.mxu0 %v7167_v30  ;;  %5876 = vmatpush3.bf16.msra.mxu1 %v6248_v31 }
 0x1bc   :  { %5881 = vmatprep.subr.bf16.mxu1 %v7790_v0  ;;  %2173 = vmatprep.subr.bf16.mxu0 %v7171_v32 }
 0x23d   :  { %v1378_v35 = vpop.f32.mrf.mxu0  ;;  %v1419_v36 = vpop.f32.mrf.mxu1 }
 0x23e   :  { %v1425_v37 = vadd.f32 %v1378_v35, %v1179_v34  ;;  %v1442_v55 = vadd.f32 %v7064_v50, %v1419_v36 }
 0x23f   :  { %v1380_v38 = vpop.f32.mrf.mxu0  ;;  %v5839_v39 = vpop.f32.mrf.mxu1 }
 0x240   :  { %v5271_v40 = vmul.f32 -1.442695, %v1425_v37  ;;  %v1435_v45 = vadd.f32 %v1433_v44, %v1380_v38  ;;  %v7186_v44 = vld [vmem:[#allocation14 + $0xa8] ss:$12 sps:$4 sm:$0xff]  }
 0x241   :  { %v1382_v41 = vpop.f32.mrf.mxu0  ;;  %v1422_v42 = vpop.f32.mrf.mxu1 }
 0x242   :  { %6477 = vpow2.f32 %v5271_v40  ;;  %v5272_v46 = vmul.f32 -1.442695, %v1435_v45  ;;  %v7179_v41 = vsel %vm1171_vm4, 1.0, %v7790_v0  ;;  %v6252_v45 = vld [vmem:[#allocation14 + $0xb0] ss:$12 sps:$4 sm:$0xff]  }
 0x243   :  { %v1383_v43 = vpop.f32.mrf.mxu0  ;;  %v5840_v29 = vpop.f32.mrf.mxu1 }
 0x244   :  { %6479 = vpow2.f32 %v5272_v46 }
 0x24f   :  { %v6478_v47 = vpop.eup %6477 }
 0x250   :  { %v1429_v48 = vadd.f32 1.0, %v6478_v47 }
 0x251   :  { %v6480_v54 = vpop.eup %6479 }
 0x252   :  { %6481 = vrcp.f32 %v1429_v48  ;;  %v1439_v15 = vadd.f32 1.0, %v6480_v54 }
 0x25d   :  { %v1646_v52 = vpop.f32.mrf.mxu0  ;;  %v1687_v53 = vpop.f32.mrf.mxu1 }
 0x25e   :  { %v1693_v56 = vadd.f32 %v1646_v52, %v1182_v51  ;;  %v1710_v47 = vadd.f32 %v7083_v21, %v1687_v53  ;;  %v7193_v52 = vld [vmem:[#allocation14 + $0x94] ss:$12 sps:$4 sm:$0xff]   ;;  %v6256_v53 = vld [vmem:[#allocation14 + $0x98] ss:$12 sps:$4 sm:$0xff]  }
 0x25f   :  { %v6482_v58 = vpop.eup %6481  ;;  %v1648_v59 = vpop.f32.mrf.mxu0 }
 0x260   :  { %v5859_v61 = vpop.f32.mrf.mxu1  ;;  %v1443_v62 = vmul.f32 %v6482_v58, %v1442_v55  ;;  %v5297_v2 = vmul.f32 -1.442695, %v1693_v56  ;;  %v1703_v31 = vadd.f32 %v1701_v27, %v1648_v59  ;;  %v1712_v56 = vrot.slane %v1182_v51, 4  ;;  %v7206_v51 = vld [vmem:[#allocation14 + $0x78] ss:$12 sps:$4 sm:$0xff]  }
 0x261   :  { %v1650_v5 = vpop.f32.mrf.mxu0  ;;  %v7200_v61 = vld [vmem:[#allocation14 + $0x7c] ss:$12 sps:$4 sm:$0xff]  }
 0x262   :  { %v1690_v8 = vpop.f32.mrf.mxu1  ;;  %v1446_v11 = vadd.f32 %v1444_v63, %v1443_v62  ;;  %6483 = vpow2.f32 %v5297_v2  ;;  %v5298_v33 = vmul.f32 -1.442695, %v1703_v31  ;;  %v6260_v62 = vld [vmem:[#allocation14 + $0x80] ss:$12 sps:$4 sm:$0xff]   ;;  %v7210_v63 = vld [vmem:[#allocation14 + $0x64] ss:$12 sps:$4 sm:$0xff]  }
 0x263   :  { %v1651_v19 = vpop.f32.mrf.mxu0  ;;  %v7213_v2 = vld [vmem:[#allocation14 + $0x60] ss:$12 sps:$4 sm:$0xff]   ;;  %v6264_v5 = vld [vmem:[#allocation14 + $0x68] ss:$12 sps:$4 sm:$0xff]   ;;  %v7227_v27 = vld [vmem:[#allocation14 + $0x30] ss:$12 sps:$4 sm:$0xff]  }
 0x264   :  { %v5860_v24 = vpop.f32.mrf.mxu1  ;;  %6485 = vtanh.f32 %v1446_v11  ;;  %v7217_v8 = vld [vmem:[#allocation14 + $0x4c] ss:$12 sps:$4 sm:$0xff]   ;;  %v7220_v11 = vld [vmem:[#allocation14 + $0x48] ss:$12 sps:$4 sm:$0xff]  }
 0x265   :  { %6487 = vrcp.f32 %v1439_v15  ;;  %v6268_v15 = vld [vmem:[#allocation14 + $0x50] ss:$12 sps:$4 sm:$0xff]   ;;  %v7224_v19 = vld [vmem:[#allocation14 + $0x34] ss:$12 sps:$4 sm:$0xff]   ;;  %v6272_v31 = vld [vmem:[#allocation14 + $0x38] ss:$12 sps:$4 sm:$0xff]  }
 0x266   :  { %6489 = vpow2.f32 %v5298_v33 }
 0x26f   :  { %v6484_v35 = vpop.eup %6483 }
 0x270   :  { %v1697_v36 = vadd.f32 1.0, %v6484_v35  ;;  %v7232_v35 = vld [vmem:[#allocation14 + $0x1c] ss:$12 sps:$4 sm:$0xff]  }
 0x271   :  { %v6486_v37 = vpop.eup %6485 }
 0x272   :  { %v1448_v38 = vsub.f32 %v7078_v20, %v6486_v37  ;;  %6491 = vrcp.f32 %v1697_v36  ;;  %v6488_v34 = vpop.eup %6487 }
 0x273   :  { %v6490_v46 = vpop.eup %6489 }
 0x274   :  { %v1449_v39 = vmul.f32 %v6488_v34, %v1448_v38  ;;  %v1707_v59 = vadd.f32 1.0, %v6490_v46  ;;  %v7236_v38 = vld [vmem:[#allocation14 + $0x18] ss:$12 sps:$4 sm:$0xff]   ;;  %v6276_v34 = vld [vmem:[#allocation14 + $0x20] ss:$12 sps:$4 sm:$0xff]  }
 0x275   :  { %v6280_v46 = vld [vmem:[#allocation14 + $0x8] ss:$12 sps:$4 sm:$0xff]  }
 0x276   :  { %v1450_v40 = vadd.f32 %v6486_v37, %v1449_v39 }
 0x278   :  { %v1719_v42 = vsub.f32 %v1450_v40, %v7078_v20  ;;  %v7240_v40 = vld [vmem:[#allocation14 + $0x4] ss:$12 sps:$4 sm:$0xff]  }
 0x27a   :  { %v1720_v43 = vmul.f32 %v7179_v41, %v1719_v42  ;;  %v7243_v42 = vsel %vm1174_vm5, 1.0, %v7790_v0 }
 0x27c   :  { %v7184_v29 = vadd.f32 %v1720_v43, %v7078_v20  ;;  %v7196_v20 = vld [vmem:[#allocation14 + $0x90] ss:$12 sps:$4 sm:$0xff]  }
 0x27e   :  { %v1725_v48 = vmul.f32 %v7179_v41, %v7184_v29  ;;  %v1744_v49 = vpack.c.bf16 %v7184_v29, %v7184_v29 }
 0x27f   :  { %v6492_v54 = vpop.eup %6491 }
 0x280   :  { %v1711_v55 = vmul.f32 %v6492_v54, %v1710_v47  ;;  %1727 = vst [vmem:[#allocation16 + $0x2] sm:$0x3] %v1725_v48  ;;  %1938 = vmatmul.mubr.bf16.vlgmr.msra.gmra.mxu0 %v1744_v49  ;;  %5878 = vmatmul.mubr.bf16.vlgmr.msra.gmra.mxu1 %v1744_v49 }
 0x281   :  { %2174 = vmatpush1.bf16.msra.mxu0 %v7186_v44  ;;  %5882 = vmatpush3.bf16.msra.mxu1 %v6252_v45  ;;  %v7247_v45 = vld [vmem:[#allocation14] ss:$12 sps:$4 sm:$0xff]  }
 0x282   :  { %v1714_v58 = vadd.f32 %v1712_v56, %v1711_v55  ;;  %2175 = vmatprep.subr.bf16.mxu0 %v7193_v52  ;;  %5883 = vmatprep.subr.bf16.mxu1 %v7790_v0 }
 0x283   :  { %2205 = vmatprep.mubr.bf16.mxu0 %v7788_v1  ;;  %5897 = vmatprep.mubr.msk.bf16.mxu1 %vm6820_vm0, %v7790_v0 }
 0x284   :  { %6493 = vtanh.f32 %v1714_v58 }
 0x285   :  { %2176 = vmatpush1.bf16.msra.mxu0 %v7196_v20  ;;  %5884 = vmatpush3.bf16.msra.mxu1 %v6256_v53  ;;  %6495 = vrcp.f32 %v1707_v59 }
 0x286   :  { %2177 = vmatprep.subr.bf16.mxu0 %v7200_v61  ;;  %5885 = vmatprep.subr.bf16.mxu1 %v7790_v0 }
 0x289   :  { %2178 = vmatpush1.bf16.msra.mxu0 %v7206_v51  ;;  %5886 = vmatpush3.bf16.msra.mxu1 %v6260_v62 }
 0x28a   :  { %2179 = vmatprep.subr.bf16.mxu0 %v7210_v63  ;;  %5887 = vmatprep.subr.bf16.mxu1 %v7790_v0 }
 0x28d   :  { %2180 = vmatpush1.bf16.msra.mxu0 %v7213_v2  ;;  %5888 = vmatpush3.bf16.msra.mxu1 %v6264_v5 }
 0x28e   :  { %2181 = vmatprep.subr.bf16.mxu0 %v7217_v8  ;;  %5889 = vmatprep.subr.bf16.mxu1 %v7790_v0 }
 0x291   :  { %v6494_v24 = vpop.eup %6493  ;;  %2182 = vmatpush1.bf16.msra.mxu0 %v7220_v11  ;;  %5890 = vmatpush3.bf16.msra.mxu1 %v6268_v15 }
 0x292   :  { %v1716_v33 = vsub.f32 %v7106_v60, %v6494_v24  ;;  %2183 = vmatprep.subr.bf16.mxu0 %v7224_v19  ;;  %5891 = vmatprep.subr.bf16.mxu1 %v7790_v0  ;;  %v6496_v36 = vpop.eup %6495 }
 0x294   :  { %v1717_v37 = vmul.f32 %v6496_v36, %v1716_v33 }
 0x295   :  { %2184 = vmatpush1.bf16.msra.mxu0 %v7227_v27  ;;  %5892 = vmatpush3.bf16.msra.mxu1 %v6272_v31 }
 0x296   :  { %v1718_v39 = vadd.f32 %v6494_v24, %v1717_v37  ;;  %2185 = vmatprep.subr.bf16.mxu0 %v7232_v35  ;;  %5893 = vmatprep.subr.bf16.mxu1 %v7790_v0  ;;  %v1742_v24 = vld [vmem:[#allocation3 + $0xf] sm:$0x7] }
 0x297   :  { %v1743_v31 = vunpack.c.l.bf16 %v1742_v24 }
 0x298   :  { %v1722_v43 = vsub.f32 %v1718_v39, %v7106_v60 }
 0x299   :  { %2186 = vmatpush1.bf16.msra.mxu0 %v7236_v38  ;;  %5894 = vmatpush3.bf16.msra.mxu1 %v6276_v34 }
 0x29a   :  { %2187 = vmatprep.subr.bf16.mxu0 %v7240_v40  ;;  %5895 = vmatprep.subr.bf16.mxu1 %v7790_v0  ;;  %v1723_v47 = vmul.f32 %v7243_v42, %v1722_v43 }
 0x29c   :  { %v7253_v48 = vadd.f32 %v1723_v47, %v7106_v60  ;;  %v6281_v60 = vld [vmem:[#allocation13 + $0xb0] ss:$12 sps:$4 sm:$0xff]  }
 0x29d   :  { %2188 = vmatpush1.bf16.msra.mxu0 %v7247_v45  ;;  %5896 = vmatpush3.bf16.msra.mxu1 %v6280_v46 }
 0x29e   :  { %v1728_v49 = vmul.f32 %v7243_v42, %v7253_v48  ;;  %v2012_v54 = vpack.c.bf16 %v7253_v48, %v7253_v48  ;;  %2466 = vmatprep.subr.bf16.mxu0 %v7116_v3  ;;  %5901 = vmatprep.subr.bf16.mxu1 %v7790_v0  ;;  %v6282_v3 = vld [vmem:[#allocation13 + $0x98] ss:$12 sps:$4 sm:$0xff]  }
 0x2a0   :  { %v1729_v55 = vpack.c.bf16 %v1728_v49, %v1728_v49  ;;  %2206 = vmatmul.mubr.bf16.vlgmr.msra.gmra.mxu0 %v2012_v54  ;;  %5898 = vmatmul.mubr.bf16.vlgmr.msra.gmra.mxu1 %v2012_v54 }
 0x2a1   :  { %2467 = vmatpush1.bf16.msra.mxu0 %v7118_v4  ;;  %2498 = vmatprep.mubr.bf16.mxu0 %v7788_v1  ;;  %v6283_v4 = vld [vmem:[#allocation13 + $0x80] ss:$12 sps:$4 sm:$0xff]  }
 0x2a2   :  { %1731 = vst [vmem:[#allocation4 + $0x6] sm:$0x1] %v1729_v55  ;;  %2468 = vmatprep.subr.bf16.mxu0 %v7122_v6  ;;  %5917 = vmatprep.mubr.msk.bf16.mxu1 %vm6820_vm0, %v7790_v0  ;;  %v6284_v6 = vld [vmem:[#allocation13 + $0x68] ss:$12 sps:$4 sm:$0xff]  }
 0x2a3   :  { %5902 = vmatpush3.bf16.msra.mxu1 %v6281_v60 }
 0x2a4   :  { %5903 = vmatprep.subr.bf16.mxu1 %v7790_v0 }
 0x2a5   :  { %2469 = vmatpush1.bf16.msra.mxu0 %v7125_v7  ;;  %v6285_v7 = vld [vmem:[#allocation13 + $0x50] ss:$12 sps:$4 sm:$0xff]  }
 0x2a6   :  { %2470 = vmatprep.subr.bf16.mxu0 %v7129_v9  ;;  %v6286_v9 = vld [vmem:[#allocation13 + $0x38] ss:$12 sps:$4 sm:$0xff]  }
 0x2a7   :  { %5904 = vmatpush3.bf16.msra.mxu1 %v6282_v3 }
 0x2a8   :  { %5905 = vmatprep.subr.bf16.mxu1 %v7790_v0 }
 0x2a9   :  { %2471 = vmatpush1.bf16.msra.mxu0 %v7132_v10  ;;  %v6287_v10 = vld [vmem:[#allocation13 + $0x20] ss:$12 sps:$4 sm:$0xff]  }
 0x2aa   :  { %2472 = vmatprep.subr.bf16.mxu0 %v7136_v13  ;;  %v6288_v13 = vld [vmem:[#allocation13 + $0x8] ss:$12 sps:$4 sm:$0xff]  }
 0x2ab   :  { %5906 = vmatpush3.bf16.msra.mxu1 %v6283_v4 }
 0x2ac   :  { %5907 = vmatprep.subr.bf16.mxu1 %v7790_v0 }
 0x2ad   :  { %2473 = vmatpush1.bf16.msra.mxu0 %v7139_v14  ;;  %v1739_v14 = vld [vmem:[#allocation2 + $0x6] sm:$0x7] }
 0x2ae   :  { %2474 = vmatprep.subr.bf16.mxu0 %v7143_v16  ;;  %v1740_v16 = vunpack.c.l.bf16 %v1739_v14 }
 0x2af   :  { %5908 = vmatpush3.bf16.msra.mxu1 %v6284_v6 }
 0x2b0   :  { %5909 = vmatprep.subr.bf16.mxu1 %v7790_v0  ;;  %v1994_v58 = vrot.slane %v1740_v16, 2  ;;  %v2005_v54 = vrot.slane %v1740_v16, 4 }
 0x2b1   :  { %2475 = vmatpush1.bf16.msra.mxu0 %v7146_v17 }
 0x2b2   :  { %2476 = vmatprep.subr.bf16.mxu0 %v7150_v22 }
 0x2b3   :  { %5910 = vmatpush3.bf16.msra.mxu1 %v6285_v7 }
 0x2b4   :  { %5911 = vmatprep.subr.bf16.mxu1 %v7790_v0 }
 0x2b5   :  { %2477 = vmatpush1.bf16.msra.mxu0 %v7153_v23 }
 0x2b6   :  { %2478 = vmatprep.subr.bf16.mxu0 %v7157_v25 }
 0x2b7   :  { %5912 = vmatpush3.bf16.msra.mxu1 %v6286_v9 }
 0x2b8   :  { %5913 = vmatprep.subr.bf16.mxu1 %v7790_v0 }
 0x2b9   :  { %2479 = vmatpush1.bf16.msra.mxu0 %v7160_v26 }
 0x2ba   :  { %2480 = vmatprep.subr.bf16.mxu0 %v7164_v28 }
 0x2bb   :  { %5914 = vmatpush3.bf16.msra.mxu1 %v6287_v10  ;;  %v2262_v10 = vrot.slane %v1743_v31, 2 }
 0x2bc   :  { %5915 = vmatprep.subr.bf16.mxu1 %v7790_v0 }
 0x2bd   :  { %2481 = vmatpush1.bf16.msra.mxu0 %v7167_v30 }
 0x2be   :  { %2734 = vmatprep.subr.bf16.mxu0 %v7171_v32 }
 0x2bf   :  { %5916 = vmatpush3.bf16.msra.mxu1 %v6288_v13 }
 0x2c0   :  { %5921 = vmatprep.subr.bf16.mxu1 %v7790_v0 }
 0x340   :  { %v1939_v17 = vpop.f32.mrf.mxu0  ;;  %v1980_v22 = vpop.f32.mrf.mxu1 }
 0x341   :  { %v1986_v23 = vadd.f32 %v1939_v17, %v1740_v16  ;;  %v2003_v34 = vadd.f32 %v7064_v50, %v1980_v22 }
 0x342   :  { %v1941_v25 = vpop.f32.mrf.mxu0  ;;  %v5879_v26 = vpop.f32.mrf.mxu1 }
 0x343   :  { %v5325_v28 = vmul.f32 -1.442695, %v1986_v23  ;;  %v1996_v59 = vadd.f32 %v1994_v58, %v1941_v25 }
 0x344   :  { %v1943_v30 = vpop.f32.mrf.mxu0  ;;  %v1983_v32 = vpop.f32.mrf.mxu1 }
 0x345   :  { %6497 = vpow2.f32 %v5325_v28  ;;  %v5326_v62 = vmul.f32 -1.442695, %v1996_v59  ;;  %v7293_v28 = vsel %vm1732_vm6, 1.0, %v7790_v0 }
 0x346   :  { %v1944_v56 = vpop.f32.mrf.mxu0  ;;  %v5880_v53 = vpop.f32.mrf.mxu1 }
 0x347   :  { %6499 = vpow2.f32 %v5326_v62  ;;  %v6289_v53 = vld [vmem:[#allocation14 + $0xb0] ss:$12 sps:$4 sm:$0xff]  }
 0x352   :  { %v6498_v5 = vpop.eup %6497 }
 0x353   :  { %v1990_v15 = vadd.f32 1.0, %v6498_v5 }
 0x354   :  { %v6500_v37 = vpop.eup %6499 }
 0x355   :  { %6501 = vrcp.f32 %v1990_v15  ;;  %v2000_v6 = vadd.f32 1.0, %v6500_v37 }
 0x360   :  { %v2207_v33 = vpop.f32.mrf.mxu0  ;;  %v2248_v36 = vpop.f32.mrf.mxu1 }
 0x361   :  { %v2254_v39 = vadd.f32 %v2207_v33, %v1743_v31  ;;  %v2271_v59 = vadd.f32 %v7083_v21, %v2248_v36  ;;  %v2273_v33 = vrot.slane %v1743_v31, 4  ;;  %v6291_v21 = vld [vmem:[#allocation14 + $0x80] ss:$12 sps:$4 sm:$0xff]   ;;  %v6296_v36 = vld [vmem:[#allocation14 + $0x8] ss:$12 sps:$4 sm:$0xff]  }
 0x362   :  { %v6502_v43 = vpop.eup %6501  ;;  %v2209_v46 = vpop.f32.mrf.mxu0 }
 0x363   :  { %v5899_v47 = vpop.f32.mrf.mxu1  ;;  %v2004_v49 = vmul.f32 %v6502_v43, %v2003_v34  ;;  %v5351_v55 = vmul.f32 -1.442695, %v2254_v39  ;;  %v2264_v13 = vadd.f32 %v2262_v10, %v2209_v46  ;;  %v7354_v43 = vld [vmem:[#allocation13 + $0x94] ss:$12 sps:$4 sm:$0xff]   ;;  %v7357_v46 = vld [vmem:[#allocation13 + $0x90] ss:$12 sps:$4 sm:$0xff]  }
 0x364   :  { %v2211_v60 = vpop.f32.mrf.mxu0  ;;  %v6304_v47 = vld [vmem:[#allocation13 + $0x98] ss:$12 sps:$4 sm:$0xff]   ;;  %v7382_v10 = vld [vmem:[#allocation13 + $0x34] ss:$12 sps:$4 sm:$0xff]  }
 0x365   :  { %v2251_v3 = vpop.f32.mrf.mxu1  ;;  %v2007_v4 = vadd.f32 %v2005_v54, %v2004_v49  ;;  %6503 = vpow2.f32 %v5351_v55  ;;  %v5352_v14 = vmul.f32 -1.442695, %v2264_v13  ;;  %v7361_v49 = vld [vmem:[#allocation13 + $0x7c] ss:$12 sps:$4 sm:$0xff]   ;;  %v7364_v54 = vld [vmem:[#allocation13 + $0x78] ss:$12 sps:$4 sm:$0xff]  }
 0x366   :  { %v2212_v7 = vpop.f32.mrf.mxu0  ;;  %v6308_v55 = vld [vmem:[#allocation13 + $0x80] ss:$12 sps:$4 sm:$0xff]   ;;  %v7368_v60 = vld [vmem:[#allocation13 + $0x64] ss:$12 sps:$4 sm:$0xff]  }
 0x367   :  { %v5900_v9 = vpop.f32.mrf.mxu1  ;;  %6505 = vtanh.f32 %v2007_v4  ;;  %v7371_v3 = vld [vmem:[#allocation13 + $0x60] ss:$12 sps:$4 sm:$0xff]   ;;  %v6312_v4 = vld [vmem:[#allocation13 + $0x68] ss:$12 sps:$4 sm:$0xff]   ;;  %v7385_v13 = vld [vmem:[#allocation13 + $0x30] ss:$12 sps:$4 sm:$0xff]  }
 0x368   :  { %6507 = vrcp.f32 %v2000_v6  ;;  %v7375_v6 = vld [vmem:[#allocation13 + $0x4c] ss:$12 sps:$4 sm:$0xff]   ;;  %v7378_v7 = vld [vmem:[#allocation13 + $0x48] ss:$12 sps:$4 sm:$0xff]   ;;  %v6316_v9 = vld [vmem:[#allocation13 + $0x50] ss:$12 sps:$4 sm:$0xff]  }
 0x369   :  { %6509 = vpow2.f32 %v5352_v14  ;;  %v6320_v14 = vld [vmem:[#allocation13 + $0x38] ss:$12 sps:$4 sm:$0xff]  }
 0x372   :  { %v6504_v50 = vpop.eup %6503 }
 0x373   :  { %v2258_v17 = vadd.f32 1.0, %v6504_v50  ;;  %v7389_v50 = vld [vmem:[#allocation13 + $0x1c] ss:$12 sps:$4 sm:$0xff]  }
 0x374   :  { %v6506_v22 = vpop.eup %6505 }
 0x375   :  { %v2009_v23 = vsub.f32 %v7184_v29, %v6506_v22  ;;  %6511 = vrcp.f32 %v2258_v17  ;;  %v6508_v16 = vpop.eup %6507  ;;  %v7392_v17 = vld [vmem:[#allocation13 + $0x18] ss:$12 sps:$4 sm:$0xff]  }
 0x376   :  { %v6510_v58 = vpop.eup %6509 }
 0x377   :  { %v2010_v25 = vmul.f32 %v6508_v16, %v2009_v23  ;;  %v2268_v34 = vadd.f32 1.0, %v6510_v58  ;;  %v7396_v23 = vld [vmem:[#allocation13 + $0x4] ss:$12 sps:$4 sm:$0xff]   ;;  %v7399_v16 = vld [vmem:[#allocation13] ss:$12 sps:$4 sm:$0xff]  }
 0x379   :  { %v2011_v26 = vadd.f32 %v6506_v22, %v2010_v25  ;;  %v6324_v22 = vld [vmem:[#allocation13 + $0x20] ss:$12 sps:$4 sm:$0xff]   ;;  %v6328_v25 = vld [vmem:[#allocation13 + $0x8] ss:$12 sps:$4 sm:$0xff]  }
 0x37b   :  { %v2280_v30 = vsub.f32 %v2011_v26, %v7184_v29  ;;  %v7403_v26 = vld [vmem:[#allocation14 + $0xac] ss:$12 sps:$4 sm:$0xff]  }
 0x37d   :  { %v2281_v32 = vmul.f32 %v7293_v28, %v2280_v30  ;;  %v2300_v30 = vld [vmem:[#allocation2 + $0x9] sm:$0x7] }
 0x37f   :  { %v7298_v56 = vadd.f32 %v2281_v32, %v7184_v29  ;;  %v6290_v29 = vld [vmem:[#allocation14 + $0x98] ss:$12 sps:$4 sm:$0xff]   ;;  %v2301_v32 = vunpack.c.l.bf16 %v2300_v30 }
 0x381   :  { %v2286_v62 = vmul.f32 %v7293_v28, %v7298_v56  ;;  %v2305_v5 = vpack.c.bf16 %v7298_v56, %v7298_v56 }
 0x382   :  { %v6512_v15 = vpop.eup %6511 }
 0x383   :  { %v2272_v24 = vmul.f32 %v6512_v15, %v2271_v59  ;;  %2288 = vst [vmem:[#allocation16 + $0x4] sm:$0x3] %v2286_v62  ;;  %2499 = vmatmul.mubr.bf16.vlgmr.msra.gmra.mxu0 %v2305_v5  ;;  %5918 = vmatmul.mubr.bf16.vlgmr.msra.gmra.mxu1 %v2305_v5 }
 0x384   :  { %2735 = vmatpush1.bf16.msra.mxu0 %v7186_v44  ;;  %5922 = vmatpush3.bf16.msra.mxu1 %v6289_v53  ;;  %v6292_v44 = vld [vmem:[#allocation14 + $0x68] ss:$12 sps:$4 sm:$0xff]  }
 0x385   :  { %v2275_v37 = vadd.f32 %v2273_v33, %v2272_v24  ;;  %2736 = vmatprep.subr.bf16.mxu0 %v7193_v52  ;;  %5923 = vmatprep.subr.bf16.mxu1 %v7790_v0  ;;  %v6293_v52 = vld [vmem:[#allocation14 + $0x50] ss:$12 sps:$4 sm:$0xff]  }
 0x386   :  { %2766 = vmatprep.mubr.bf16.mxu0 %v7788_v1  ;;  %5937 = vmatprep.mubr.msk.bf16.mxu1 %vm6820_vm0, %v7790_v0 }
 0x387   :  { %6513 = vtanh.f32 %v2275_v37 }
 0x388   :  { %2737 = vmatpush1.bf16.msra.mxu0 %v7196_v20  ;;  %5924 = vmatpush3.bf16.msra.mxu1 %v6290_v29  ;;  %6515 = vrcp.f32 %v2268_v34  ;;  %v2555_v34 = vrot.slane %v2301_v32, 2 }
 0x389   :  { %2738 = vmatprep.subr.bf16.mxu0 %v7200_v61  ;;  %5925 = vmatprep.subr.bf16.mxu1 %v7790_v0  ;;  %v6294_v61 = vld [vmem:[#allocation14 + $0x38] ss:$12 sps:$4 sm:$0xff]  }
 0x38c   :  { %2739 = vmatpush1.bf16.msra.mxu0 %v7206_v51  ;;  %5926 = vmatpush3.bf16.msra.mxu1 %v6291_v21 }
 0x38d   :  { %2740 = vmatprep.subr.bf16.mxu0 %v7210_v63  ;;  %5927 = vmatprep.subr.bf16.mxu1 %v7790_v0 }
 0x390   :  { %2741 = vmatpush1.bf16.msra.mxu0 %v7213_v2  ;;  %5928 = vmatpush3.bf16.msra.mxu1 %v6292_v44  ;;  %v6295_v2 = vld [vmem:[#allocation14 + $0x20] ss:$12 sps:$4 sm:$0xff]  }
 0x391   :  { %2742 = vmatprep.subr.bf16.mxu0 %v7217_v8  ;;  %5929 = vmatprep.subr.bf16.mxu1 %v7790_v0 }
 0x394   :  { %v6514_v20 = vpop.eup %6513  ;;  %2743 = vmatpush1.bf16.msra.mxu0 %v7220_v11  ;;  %5930 = vmatpush3.bf16.msra.mxu1 %v6293_v52  ;;  %v7329_v11 = vsel %vm1735_vm7, 1.0, %v7790_v0 }
 0x395   :  { %v2277_v51 = vsub.f32 %v7253_v48, %v6514_v20  ;;  %2744 = vmatprep.subr.bf16.mxu0 %v7224_v19  ;;  %5931 = vmatprep.subr.bf16.mxu1 %v7790_v0  ;;  %v6516_v63 = vpop.eup %6515 }
 0x397   :  { %v2278_v31 = vmul.f32 %v6516_v63, %v2277_v51 }
 0x398   :  { %2745 = vmatpush1.bf16.msra.mxu0 %v7227_v27  ;;  %5932 = vmatpush3.bf16.msra.mxu1 %v6294_v61  ;;  %v2303_v61 = vld [vmem:[#allocation3 + $0xc] sm:$0x7] }
 0x399   :  { %v2279_v8 = vadd.f32 %v6514_v20, %v2278_v31  ;;  %2746 = vmatprep.subr.bf16.mxu0 %v7232_v35  ;;  %5933 = vmatprep.subr.bf16.mxu1 %v7790_v0  ;;  %v2304_v51 = vunpack.c.l.bf16 %v2303_v61 }
 0x39b   :  { %v2283_v19 = vsub.f32 %v2279_v8, %v7253_v48  ;;  %v7410_v8 = vld [vmem:[%s7783_s7] ss:$0 sm:$0xff]  ;;  %v2823_v30 = vrot.slane %v2304_v51, 2 }
 0x39c   :  { %2747 = vmatpush1.bf16.msra.mxu0 %v7236_v38  ;;  %5934 = vmatpush3.bf16.msra.mxu1 %v6295_v2 }
 0x39d   :  { %2748 = vmatprep.subr.bf16.mxu0 %v7240_v40  ;;  %5935 = vmatprep.subr.bf16.mxu1 %v7790_v0  ;;  %v2284_v12 = vmul.f32 %v7329_v11, %v2283_v19  ;;  %v7348_v40 = vld [vmem:[#allocation13 + $0xac] ss:$12 sps:$4 sm:$0xff]  }
 0x39f   :  { %v7337_v27 = vadd.f32 %v2284_v12, %v7253_v48  ;;  %v6300_v48 = vld [vmem:[#allocation13 + $0xb0] ss:$12 sps:$4 sm:$0xff]  }
 0x3a0   :  { %2749 = vmatpush1.bf16.msra.mxu0 %v7247_v45  ;;  %5936 = vmatpush3.bf16.msra.mxu1 %v6296_v36  ;;  %v7350_v45 = vld [vmem:[#allocation13 + $0xa8] ss:$12 sps:$4 sm:$0xff]  }
 0x3a1   :  { %v2289_v35 = vmul.f32 %v7329_v11, %v7337_v27  ;;  %v2573_v38 = vpack.c.bf16 %v7337_v27, %v7337_v27  ;;  %5941 = vmatprep.subr.bf16.mxu1 %v7790_v0  ;;  %3021 = vmatprep.subr.bf16.mxu0 %v7348_v40 }
 0x3a3   :  { %v2290_v39 = vpack.c.bf16 %v2289_v35, %v2289_v35  ;;  %2767 = vmatmul.mubr.bf16.vlgmr.msra.gmra.mxu0 %v2573_v38  ;;  %5938 = vmatmul.mubr.bf16.vlgmr.msra.gmra.mxu1 %v2573_v38 }
 0x3a4   :  { %3053 = vmatprep.mubr.bf16.mxu0 %v7788_v1  ;;  %5957 = vmatprep.mubr.msk.bf16.mxu1 %vm6820_vm0, %v7790_v0 }
 0x3a5   :  { %2292 = vst [vmem:[#allocation4 + $0x5] sm:$0x1] %v2290_v39  ;;  %3022 = vmatpush1.bf16.msra.mxu0 %v7350_v45  ;;  %5942 = vmatpush3.bf16.msra.mxu1 %v6300_v48  ;;  %v2566_v48 = vrot.slane %v2301_v32, 4 }
 0x3a6   :  { %5943 = vmatprep.subr.bf16.mxu1 %v7790_v0  ;;  %3023 = vmatprep.subr.bf16.mxu0 %v7354_v43 }
 0x3a9   :  { %3024 = vmatpush1.bf16.msra.mxu0 %v7357_v46  ;;  %5944 = vmatpush3.bf16.msra.mxu1 %v6304_v47 }
 0x3aa   :  { %5945 = vmatprep.subr.bf16.mxu1 %v7790_v0  ;;  %3025 = vmatprep.subr.bf16.mxu0 %v7361_v49 }
 0x3ad   :  { %3026 = vmatpush1.bf16.msra.mxu0 %v7364_v54  ;;  %5946 = vmatpush3.bf16.msra.mxu1 %v6308_v55 }
 0x3ae   :  { %5947 = vmatprep.subr.bf16.mxu1 %v7790_v0  ;;  %3027 = vmatprep.subr.bf16.mxu0 %v7368_v60 }
 0x3b1   :  { %3028 = vmatpush1.bf16.msra.mxu0 %v7371_v3  ;;  %5948 = vmatpush3.bf16.msra.mxu1 %v6312_v4 }
 0x3b2   :  { %5949 = vmatprep.subr.bf16.mxu1 %v7790_v0  ;;  %3029 = vmatprep.subr.bf16.mxu0 %v7375_v6 }
 0x3b5   :  { %3030 = vmatpush1.bf16.msra.mxu0 %v7378_v7  ;;  %5950 = vmatpush3.bf16.msra.mxu1 %v6316_v9 }
 0x3b6   :  { %5951 = vmatprep.subr.bf16.mxu1 %v7790_v0  ;;  %3031 = vmatprep.subr.bf16.mxu0 %v7382_v10 }
 0x3b9   :  { %3032 = vmatpush1.bf16.msra.mxu0 %v7385_v13  ;;  %5952 = vmatpush3.bf16.msra.mxu1 %v6320_v14 }
 0x3ba   :  { %5953 = vmatprep.subr.bf16.mxu1 %v7790_v0  ;;  %3033 = vmatprep.subr.bf16.mxu0 %v7389_v50 }
 0x3bd   :  { %3034 = vmatpush1.bf16.msra.mxu0 %v7392_v17  ;;  %5954 = vmatpush3.bf16.msra.mxu1 %v6324_v22 }
 0x3be   :  { %5955 = vmatprep.subr.bf16.mxu1 %v7790_v0  ;;  %3035 = vmatprep.subr.bf16.mxu0 %v7396_v23 }
 0x3c1   :  { %3036 = vmatpush1.bf16.msra.mxu0 %v7399_v16  ;;  %5956 = vmatpush3.bf16.msra.mxu1 %v6328_v25 }
 0x3c2   :  { %5961 = vmatprep.subr.bf16.mxu1 %v7790_v0  ;;  %3289 = vmatprep.subr.bf16.mxu0 %v7403_v26 }
 0x443   :  { %v2500_v53 = vpop.f32.mrf.mxu0  ;;  %v2541_v58 = vpop.f32.mrf.mxu1 }
 0x444   :  { %v2547_v59 = vadd.f32 %v2500_v53, %v2301_v32  ;;  %v2564_v19 = vadd.f32 %v7410_v8, %v2541_v58 }
 0x445   :  { %v2502_v62 = vpop.f32.mrf.mxu0  ;;  %v5919_v5 = vpop.f32.mrf.mxu1 }
 0x446   :  { %v5379_v15 = vmul.f32 -1.442695, %v2547_v59  ;;  %v2557_v21 = vadd.f32 %v2555_v34, %v2502_v62 }
 0x447   :  { %v2504_v24 = vpop.f32.mrf.mxu0  ;;  %v2544_v33 = vpop.f32.mrf.mxu1 }
 0x448   :  { %6517 = vpow2.f32 %v5379_v15  ;;  %v5380_v44 = vmul.f32 -1.442695, %v2557_v21  ;;  %v7414_v33 = vld [vmem:[#allocation8] sm:$0x3] }
 0x449   :  { %v2505_v29 = vpop.f32.mrf.mxu0  ;;  %v5920_v37 = vpop.f32.mrf.mxu1  ;;  %vm2293_vm8 = vcmp.gt.s32.totalorder %v7414_v33, 3  ;;  %vm2296_vm9 = vcmp.gt.s32.totalorder %v7414_v33, 4  ;;  %v7491_v33 = vld [vmem:[#allocation14] ss:$12 sps:$4 sm:$0xff]  }
 0x44a   :  { %6519 = vpow2.f32 %v5380_v44  ;;  %v7418_v37 = vsel %vm2293_vm8, 1.0, %v7790_v0 }
 0x455   :  { %v6518_v52 = vpop.eup %6517 }
 0x456   :  { %v2551_v20 = vadd.f32 1.0, %v6518_v52  ;;  %v7425_v52 = vld [vmem:[#allocation14 + $0xa8] ss:$12 sps:$4 sm:$0xff]  }
 0x457   :  { %v6520_v2 = vpop.eup %6519 }
 0x458   :  { %6521 = vrcp.f32 %v2551_v20  ;;  %v2561_v14 = vadd.f32 1.0, %v6520_v2  ;;  %v6332_v20 = vld [vmem:[#allocation14 + $0xb0] ss:$12 sps:$4 sm:$0xff]  }
 0x463   :  { %v2768_v63 = vpop.f32.mrf.mxu0  ;;  %v2809_v31 = vpop.f32.mrf.mxu1 }
 0x464   :  { %v2815_v36 = vadd.f32 %v2768_v63, %v2304_v51  ;;  %v7430_v63 = vld [vmem:[%s7785_s9] ss:$0 sm:$0xff] }
 0x465   :  { %v6522_v12 = vpop.eup %6521  ;;  %v2770_v35 = vpop.f32.mrf.mxu0  ;;  %v2832_v2 = vadd.f32 %v7430_v63, %v2809_v31  ;;  %v6336_v31 = vld [vmem:[#allocation14 + $0x98] ss:$12 sps:$4 sm:$0xff]  }
 0x466   :  { %v5939_v38 = vpop.f32.mrf.mxu1  ;;  %v2565_v39 = vmul.f32 %v6522_v12, %v2564_v19  ;;  %v5405_v47 = vmul.f32 -1.442695, %v2815_v36  ;;  %v2825_v53 = vadd.f32 %v2823_v30, %v2770_v35  ;;  %v7437_v12 = vld [vmem:[#allocation14 + $0x94] ss:$12 sps:$4 sm:$0xff]  }
 0x467   :  { %v2772_v55 = vpop.f32.mrf.mxu0  ;;  %v2834_v38 = vrot.slane %v2304_v51, 4  ;;  %v7450_v51 = vld [vmem:[#allocation14 + $0x78] ss:$12 sps:$4 sm:$0xff]   ;;  %v7464_v30 = vld [vmem:[#allocation14 + $0x48] ss:$12 sps:$4 sm:$0xff]  }
 0x468   :  { %v2812_v4 = vpop.f32.mrf.mxu1  ;;  %v2568_v9 = vadd.f32 %v2566_v48, %v2565_v39  ;;  %6523 = vpow2.f32 %v5405_v47  ;;  %v5406_v59 = vmul.f32 -1.442695, %v2825_v53  ;;  %v7440_v39 = vld [vmem:[#allocation14 + $0x90] ss:$12 sps:$4 sm:$0xff]  }
 0x469   :  { %v2773_v22 = vpop.f32.mrf.mxu0  ;;  %v7444_v55 = vld [vmem:[#allocation14 + $0x7c] ss:$12 sps:$4 sm:$0xff]   ;;  %v6340_v4 = vld [vmem:[#allocation14 + $0x80] ss:$12 sps:$4 sm:$0xff]  }
 0x46a   :  { %v5940_v25 = vpop.f32.mrf.mxu1  ;;  %6525 = vtanh.f32 %v2568_v9  ;;  %v7454_v9 = vld [vmem:[#allocation14 + $0x64] ss:$12 sps:$4 sm:$0xff]   ;;  %v6344_v22 = vld [vmem:[#allocation14 + $0x68] ss:$12 sps:$4 sm:$0xff]  }
 0x46b   :  { %6527 = vrcp.f32 %v2561_v14  ;;  %v7457_v14 = vld [vmem:[#allocation14 + $0x60] ss:$12 sps:$4 sm:$0xff]   ;;  %v6348_v53 = vld [vmem:[#allocation14 + $0x50] ss:$12 sps:$4 sm:$0xff]  }
 0x46c   :  { %6529 = vpow2.f32 %v5406_v59  ;;  %v7461_v25 = vld [vmem:[#allocation14 + $0x4c] ss:$12 sps:$4 sm:$0xff]   ;;  %v7468_v59 = vld [vmem:[#allocation14 + $0x34] ss:$12 sps:$4 sm:$0xff]  }
 0x475   :  { %v6524_v58 = vpop.eup %6523 }
 0x476   :  { %v2819_v62 = vadd.f32 1.0, %v6524_v58 }
 0x477   :  { %v6526_v5 = vpop.eup %6525 }
 0x478   :  { %v2570_v15 = vsub.f32 %v7298_v56, %v6526_v5  ;;  %6531 = vrcp.f32 %v2819_v62  ;;  %v6528_v32 = vpop.eup %6527  ;;  %v7471_v62 = vld [vmem:[#allocation14 + $0x30] ss:$12 sps:$4 sm:$0xff]  }
 0x479   :  { %v6530_v61 = vpop.eup %6529 }
 0x47a   :  { %v2571_v24 = vmul.f32 %v6528_v32, %v2570_v15  ;;  %v2829_v47 = vadd.f32 1.0, %v6530_v61  ;;  %v7476_v32 = vld [vmem:[#allocation14 + $0x1c] ss:$12 sps:$4 sm:$0xff]   ;;  %v7484_v61 = vld [vmem:[#allocation14 + $0x4] ss:$12 sps:$4 sm:$0xff]  }
 0x47c   :  { %v2572_v29 = vadd.f32 %v6526_v5, %v2571_v24  ;;  %v6352_v5 = vld [vmem:[#allocation14 + $0x38] ss:$12 sps:$4 sm:$0xff]  }
 0x47e   :  { %v2841_v34 = vsub.f32 %v2572_v29, %v7298_v56 }
 0x480   :  { %v2842_v21 = vmul.f32 %v7418_v37, %v2841_v34  ;;  %v7480_v34 = vld [vmem:[#allocation14 + $0x18] ss:$12 sps:$4 sm:$0xff]  }
 0x482   :  { %v7423_v44 = vadd.f32 %v2842_v21, %v7298_v56  ;;  %v6356_v21 = vld [vmem:[#allocation14 + $0x20] ss:$12 sps:$4 sm:$0xff]  }
 0x484   :  { %v2847_v19 = vmul.f32 %v7418_v37, %v7423_v44  ;;  %v2860_v36 = vpack.c.bf16 %v7423_v44, %v7423_v44 }
 0x485   :  { %v6532_v56 = vpop.eup %6531 }
 0x486   :  { %v2833_v35 = vmul.f32 %v6532_v56, %v2832_v2  ;;  %2849 = vst [vmem:[#allocation16 + $0x6] sm:$0x3] %v2847_v19  ;;  %3054 = vmatmul.mubr.bf16.vlgmr.msra.gmra.mxu0 %v2860_v36  ;;  %5958 = vmatmul.mubr.bf16.vlgmr.msra.gmra.mxu1 %v2860_v36  ;;  %v7487_v2 = vsel %vm2296_vm9, 1.0, %v7790_v0  ;;  %v6360_v36 = vld [vmem:[#allocation14 + $0x8] ss:$12 sps:$4 sm:$0xff]  }
 0x487   :  { %3290 = vmatpush1.bf16.msra.mxu0 %v7425_v52  ;;  %5962 = vmatpush3.bf16.msra.mxu1 %v6332_v20 }
 0x488   :  { %v2836_v48 = vadd.f32 %v2834_v38, %v2833_v35  ;;  %3291 = vmatprep.subr.bf16.mxu0 %v7437_v12  ;;  %5963 = vmatprep.subr.bf16.mxu1 %v7790_v0 }
 0x489   :  { %3321 = vmatprep.mubr.bf16.mxu0 %v7788_v1  ;;  %5977 = vmatprep.mubr.msk.bf16.mxu1 %vm6820_vm0, %v7790_v0 }
 0x48a   :  { %6533 = vtanh.f32 %v2836_v48 }
 0x48b   :  { %3292 = vmatpush1.bf16.msra.mxu0 %v7440_v39  ;;  %5964 = vmatpush3.bf16.msra.mxu1 %v6336_v31  ;;  %6535 = vrcp.f32 %v2829_v47 }
 0x48c   :  { %3293 = vmatprep.subr.bf16.mxu0 %v7444_v55  ;;  %5965 = vmatprep.subr.bf16.mxu1 %v7790_v0 }
 0x48f   :  { %3294 = vmatpush1.bf16.msra.mxu0 %v7450_v51  ;;  %5966 = vmatpush3.bf16.msra.mxu1 %v6340_v4 }
 0x490   :  { %3295 = vmatprep.subr.bf16.mxu0 %v7454_v9  ;;  %5967 = vmatprep.subr.bf16.mxu1 %v7790_v0 }
 0x493   :  { %3296 = vmatpush1.bf16.msra.mxu0 %v7457_v14  ;;  %5968 = vmatpush3.bf16.msra.mxu1 %v6344_v22 }
 0x494   :  { %3297 = vmatprep.subr.bf16.mxu0 %v7461_v25  ;;  %5969 = vmatprep.subr.bf16.mxu1 %v7790_v0 }
 0x497   :  { %v6534_v58 = vpop.eup %6533  ;;  %3298 = vmatpush1.bf16.msra.mxu0 %v7464_v30  ;;  %5970 = vmatpush3.bf16.msra.mxu1 %v6348_v53 }
 0x498   :  { %v2838_v15 = vsub.f32 %v7337_v27, %v6534_v58  ;;  %3299 = vmatprep.subr.bf16.mxu0 %v7468_v59  ;;  %5971 = vmatprep.subr.bf16.mxu1 %v7790_v0  ;;  %v6536_v24 = vpop.eup %6535 }
 0x49a   :  { %v2839_v29 = vmul.f32 %v6536_v24, %v2838_v15 }
 0x49b   :  { %3300 = vmatpush1.bf16.msra.mxu0 %v7471_v62  ;;  %5972 = vmatpush3.bf16.msra.mxu1 %v6352_v5 }
 0x49c   :  { %v2840_v20 = vadd.f32 %v6534_v58, %v2839_v29  ;;  %3301 = vmatprep.subr.bf16.mxu0 %v7476_v32  ;;  %5973 = vmatprep.subr.bf16.mxu1 %v7790_v0  ;;  %v2858_v29 = vld [vmem:[#allocation3 + $0x9] sm:$0x7] }
 0x49e   :  { %v2844_v19 = vsub.f32 %v2840_v20, %v7337_v27 }
 0x49f   :  { %3302 = vmatpush1.bf16.msra.mxu0 %v7480_v34  ;;  %5974 = vmatpush3.bf16.msra.mxu1 %v6356_v21  ;;  %v2859_v21 = vunpack.c.l.bf16 %v2858_v29 }
 0x4a0   :  { %3303 = vmatprep.subr.bf16.mxu0 %v7484_v61  ;;  %5975 = vmatprep.subr.bf16.mxu1 %v7790_v0  ;;  %v2845_v56 = vmul.f32 %v7487_v2, %v2844_v19 }
 0x4a2   :  { %v7497_v35 = vadd.f32 %v2845_v56, %v7337_v27  ;;  %v6361_v27 = vld [vmem:[#allocation13 + $0xb0] ss:$12 sps:$4 sm:$0xff]  }
 0x4a3   :  { %3304 = vmatpush1.bf16.msra.mxu0 %v7491_v33  ;;  %5976 = vmatpush3.bf16.msra.mxu1 %v6360_v36 }
 0x4a4   :  { %v2850_v38 = vmul.f32 %v7487_v2, %v7497_v35  ;;  %v3128_v31 = vpack.c.bf16 %v7497_v35, %v7497_v35  ;;  %3576 = vmatprep.subr.bf16.mxu0 %v7348_v40  ;;  %5981 = vmatprep.subr.bf16.mxu1 %v7790_v0  ;;  %v6362_v40 = vld [vmem:[#allocation13 + $0x98] ss:$12 sps:$4 sm:$0xff]  }
 0x4a6   :  { %v2851_v48 = vpack.c.bf16 %v2850_v38, %v2850_v38  ;;  %3322 = vmatmul.mubr.bf16.vlgmr.msra.gmra.mxu0 %v3128_v31  ;;  %5978 = vmatmul.mubr.bf16.vlgmr.msra.gmra.mxu1 %v3128_v31 }
 0x4a7   :  { %3577 = vmatpush1.bf16.msra.mxu0 %v7350_v45  ;;  %3608 = vmatprep.mubr.bf16.mxu0 %v7788_v1  ;;  %v6363_v45 = vld [vmem:[#allocation13 + $0x80] ss:$12 sps:$4 sm:$0xff]  }
 0x4a8   :  { %2853 = vst [vmem:[#allocation4 + $0x4] sm:$0x1] %v2851_v48  ;;  %3578 = vmatprep.subr.bf16.mxu0 %v7354_v43  ;;  %5997 = vmatprep.mubr.msk.bf16.mxu1 %vm6820_vm0, %v7790_v0  ;;  %v6364_v43 = vld [vmem:[#allocation13 + $0x68] ss:$12 sps:$4 sm:$0xff]  }
 0x4a9   :  { %5982 = vmatpush3.bf16.msra.mxu1 %v6361_v27 }
 0x4aa   :  { %5983 = vmatprep.subr.bf16.mxu1 %v7790_v0 }
 0x4ab   :  { %3579 = vmatpush1.bf16.msra.mxu0 %v7357_v46  ;;  %v6365_v46 = vld [vmem:[#allocation13 + $0x50] ss:$12 sps:$4 sm:$0xff]  }
 0x4ac   :  { %3580 = vmatprep.subr.bf16.mxu0 %v7361_v49  ;;  %v6366_v49 = vld [vmem:[#allocation13 + $0x38] ss:$12 sps:$4 sm:$0xff]  }
 0x4ad   :  { %5984 = vmatpush3.bf16.msra.mxu1 %v6362_v40 }
 0x4ae   :  { %5985 = vmatprep.subr.bf16.mxu1 %v7790_v0 }
 0x4af   :  { %3581 = vmatpush1.bf16.msra.mxu0 %v7364_v54  ;;  %v6367_v54 = vld [vmem:[#allocation13 + $0x20] ss:$12 sps:$4 sm:$0xff]  }
 0x4b0   :  { %3582 = vmatprep.subr.bf16.mxu0 %v7368_v60  ;;  %v6368_v60 = vld [vmem:[#allocation13 + $0x8] ss:$12 sps:$4 sm:$0xff]  }
 0x4b1   :  { %5986 = vmatpush3.bf16.msra.mxu1 %v6363_v45 }
 0x4b2   :  { %5987 = vmatprep.subr.bf16.mxu1 %v7790_v0 }
 0x4b3   :  { %3583 = vmatpush1.bf16.msra.mxu0 %v7371_v3  ;;  %v2855_v3 = vld [vmem:[#allocation2 + $0xc] sm:$0x7] }
 0x4b4   :  { %3584 = vmatprep.subr.bf16.mxu0 %v7375_v6  ;;  %v2856_v6 = vunpack.c.l.bf16 %v2855_v3 }
 0x4b5   :  { %5988 = vmatpush3.bf16.msra.mxu1 %v6364_v43 }
 0x4b6   :  { %5989 = vmatprep.subr.bf16.mxu1 %v7790_v0  ;;  %v3110_v53 = vrot.slane %v2856_v6, 2  ;;  %v3121_v45 = vrot.slane %v2856_v6, 4 }
 0x4b7   :  { %3585 = vmatpush1.bf16.msra.mxu0 %v7378_v7 }
 0x4b8   :  { %3586 = vmatprep.subr.bf16.mxu0 %v7382_v10 }
 0x4b9   :  { %5990 = vmatpush3.bf16.msra.mxu1 %v6365_v46 }
 0x4ba   :  { %5991 = vmatprep.subr.bf16.mxu1 %v7790_v0 }
 0x4bb   :  { %3587 = vmatpush1.bf16.msra.mxu0 %v7385_v13 }
 0x4bc   :  { %3588 = vmatprep.subr.bf16.mxu0 %v7389_v50 }
 0x4bd   :  { %5992 = vmatpush3.bf16.msra.mxu1 %v6366_v49 }
 0x4be   :  { %5993 = vmatprep.subr.bf16.mxu1 %v7790_v0 }
 0x4bf   :  { %3589 = vmatpush1.bf16.msra.mxu0 %v7392_v17 }
 0x4c0   :  { %3590 = vmatprep.subr.bf16.mxu0 %v7396_v23 }
 0x4c1   :  { %5994 = vmatpush3.bf16.msra.mxu1 %v6367_v54 }
 0x4c2   :  { %5995 = vmatprep.subr.bf16.mxu1 %v7790_v0 }
 0x4c3   :  { %3591 = vmatpush1.bf16.msra.mxu0 %v7399_v16 }
 0x4c4   :  { %3844 = vmatprep.subr.bf16.mxu0 %v7403_v26 }
 0x4c5   :  { %5996 = vmatpush3.bf16.msra.mxu1 %v6368_v60 }
 0x4c6   :  { %6001 = vmatprep.subr.bf16.mxu1 %v7790_v0 }
 0x546   :  { %v3055_v7 = vpop.f32.mrf.mxu0  ;;  %v3096_v10 = vpop.f32.mrf.mxu1 }
 0x547   :  { %v3102_v13 = vadd.f32 %v3055_v7, %v2856_v6  ;;  %v3119_v56 = vadd.f32 %v7410_v8, %v3096_v10 }
 0x548   :  { %v3057_v50 = vpop.f32.mrf.mxu0  ;;  %v5959_v17 = vpop.f32.mrf.mxu1 }
 0x549   :  { %v5431_v23 = vmul.f32 -1.442695, %v3102_v13  ;;  %v3112_v58 = vadd.f32 %v3110_v53, %v3057_v50  ;;  %v3378_v13 = vrot.slane %v2859_v21, 2 }
 0x54a   :  { %v3059_v16 = vpop.f32.mrf.mxu0  ;;  %v3099_v47 = vpop.f32.mrf.mxu1 }
 0x54b   :  { %6537 = vpow2.f32 %v5431_v23  ;;  %v5432_v5 = vmul.f32 -1.442695, %v3112_v58 }
 0x54c   :  { %v3060_v4 = vpop.f32.mrf.mxu0  ;;  %v5960_v22 = vpop.f32.mrf.mxu1 }
 0x54d   :  { %6539 = vpow2.f32 %v5432_v5 }
 0x558   :  { %v6538_v15 = vpop.eup %6537 }
 0x559   :  { %v3106_v24 = vadd.f32 1.0, %v6538_v15  ;;  %v6369_v15 = vld [vmem:[#allocation14 + $0xb0] ss:$12 sps:$4 sm:$0xff]  }
 0x55a   :  { %v6540_v36 = vpop.eup %6539 }
 0x55b   :  { %6541 = vrcp.f32 %v3106_v24  ;;  %v3116_v60 = vadd.f32 1.0, %v6540_v36 }
 0x566   :  { %v3323_v20 = vpop.f32.mrf.mxu0  ;;  %v3364_v19 = vpop.f32.mrf.mxu1 }
 0x567   :  { %v3370_v38 = vadd.f32 %v3323_v20, %v2859_v21  ;;  %v3387_v29 = vadd.f32 %v7430_v63, %v3364_v19 }
 0x568   :  { %v6542_v31 = vpop.eup %6541  ;;  %v3325_v48 = vpop.f32.mrf.mxu0 }
 0x569   :  { %v5979_v27 = vpop.f32.mrf.mxu1  ;;  %v3120_v40 = vmul.f32 %v6542_v31, %v3119_v56  ;;  %v5457_v43 = vmul.f32 -1.442695, %v3370_v38  ;;  %v3380_v50 = vadd.f32 %v3378_v13, %v3325_v48  ;;  %v3389_v31 = vrot.slane %v2859_v21, 4  ;;  %v6371_v21 = vld [vmem:[#allocation14 + $0x80] ss:$12 sps:$4 sm:$0xff]  }
 0x56a   :  { %v3327_v46 = vpop.f32.mrf.mxu0 }
 0x56b   :  { %v3367_v49 = vpop.f32.mrf.mxu1  ;;  %v3123_v54 = vadd.f32 %v3121_v45, %v3120_v40  ;;  %6543 = vpow2.f32 %v5457_v43  ;;  %v5458_v17 = vmul.f32 -1.442695, %v3380_v50  ;;  %v6372_v43 = vld [vmem:[#allocation14 + $0x68] ss:$12 sps:$4 sm:$0xff]   ;;  %v6375_v50 = vld [vmem:[#allocation14 + $0x20] ss:$12 sps:$4 sm:$0xff]  }
 0x56c   :  { %v3328_v3 = vpop.f32.mrf.mxu0  ;;  %v6373_v49 = vld [vmem:[#allocation14 + $0x50] ss:$12 sps:$4 sm:$0xff]  }
 0x56d   :  { %v5980_v7 = vpop.f32.mrf.mxu1  ;;  %6545 = vtanh.f32 %v3123_v54 }
 0x56e   :  { %6547 = vrcp.f32 %v3116_v60  ;;  %v6374_v60 = vld [vmem:[#allocation14 + $0x38] ss:$12 sps:$4 sm:$0xff]  }
 0x56f   :  { %6549 = vpow2.f32 %v5458_v17 }
 0x578   :  { %v6544_v10 = vpop.eup %6543 }
 0x579   :  { %v3374_v23 = vadd.f32 1.0, %v6544_v10 }
 0x57a   :  { %v6546_v16 = vpop.eup %6545 }
 0x57b   :  { %v3125_v47 = vsub.f32 %v7423_v44, %v6546_v16  ;;  %6551 = vrcp.f32 %v3374_v23  ;;  %v6548_v6 = vpop.eup %6547  ;;  %v6376_v23 = vld [vmem:[#allocation14 + $0x8] ss:$12 sps:$4 sm:$0xff]  }
 0x57c   :  { %v6550_v24 = vpop.eup %6549 }
 0x57d   :  { %v3126_v4 = vmul.f32 %v6548_v6, %v3125_v47  ;;  %v3384_v27 = vadd.f32 1.0, %v6550_v24 }
 0x57f   :  { %v3127_v22 = vadd.f32 %v6546_v16, %v3126_v4 }
 0x581   :  { %v3396_v53 = vsub.f32 %v3127_v22, %v7423_v44 }
 0x583   :  { %v3397_v58 = vmul.f32 %v7487_v2, %v3396_v53 }
 0x585   :  { %v7538_v5 = vadd.f32 %v3397_v58, %v7423_v44  ;;  %v6370_v44 = vld [vmem:[#allocation14 + $0x98] ss:$12 sps:$4 sm:$0xff]  }
 0x586   :  { %v5075_v58 = vld [vmem:[#allocation16 + $0x6] sm:$0x3] }
 0x587   :  { %v3402_v20 = vmul.f32 %v7487_v2, %v7538_v5  ;;  %v3415_v36 = vpack.c.bf16 %v7538_v5, %v7538_v5  ;;  %v5084_v2 = vld [vmem:[#allocation4 + $0x4] sm:$0x1] }
 0x588   :  { %v6552_v56 = vpop.eup %6551  ;;  %v5092_v19 = vunpack.c.l.bf16 %v5084_v2  ;;  %v7607_v2 = vld [vmem:[#allocation13 + $0x60] ss:$12 sps:$4 sm:$0xff]  }
 0x589   :  { %v3388_v38 = vmul.f32 %v6552_v56, %v3387_v29  ;;  %3404 = vst [vmem:[#allocation16 + $0x8] sm:$0x3] %v3402_v20  ;;  %3609 = vmatmul.mubr.bf16.vlgmr.msra.gmra.mxu0 %v3415_v36  ;;  %5998 = vmatmul.mubr.bf16.vlgmr.msra.gmra.mxu1 %v3415_v36  ;;  %v7586_v29 = vld [vmem:[#allocation13 + $0xa8] ss:$12 sps:$4 sm:$0xff]   ;;  %v6380_v20 = vld [vmem:[#allocation13 + $0xb0] ss:$12 sps:$4 sm:$0xff]  }
 0x58a   :  { %3845 = vmatpush1.bf16.msra.mxu0 %v7425_v52  ;;  %6002 = vmatpush3.bf16.msra.mxu1 %v6369_v15  ;;  %v7590_v36 = vld [vmem:[#allocation13 + $0x94] ss:$12 sps:$4 sm:$0xff]   ;;  %v7593_v56 = vld [vmem:[#allocation13 + $0x90] ss:$12 sps:$4 sm:$0xff]  }
 0x58b   :  { %v3391_v48 = vadd.f32 %v3389_v31, %v3388_v38  ;;  %3846 = vmatprep.subr.bf16.mxu0 %v7437_v12  ;;  %6003 = vmatprep.subr.bf16.mxu1 %v7790_v0  ;;  %v6384_v38 = vld [vmem:[#allocation13 + $0x98] ss:$12 sps:$4 sm:$0xff]   ;;  %v7597_v31 = vld [vmem:[#allocation13 + $0x7c] ss:$12 sps:$4 sm:$0xff]  }
 0x58c   :  { %3876 = vmatprep.mubr.bf16.mxu0 %v7788_v1  ;;  %6017 = vmatprep.mubr.msk.bf16.mxu1 %vm6820_vm0, %v7790_v0 }
 0x58d   :  { %6553 = vtanh.f32 %v3391_v48  ;;  %v6388_v48 = vld [vmem:[#allocation13 + $0x80] ss:$12 sps:$4 sm:$0xff]  }
 0x58e   :  { %3847 = vmatpush1.bf16.msra.mxu0 %v7440_v39  ;;  %6004 = vmatpush3.bf16.msra.mxu1 %v6370_v44  ;;  %6555 = vrcp.f32 %v3384_v27  ;;  %v7600_v44 = vld [vmem:[#allocation13 + $0x78] ss:$12 sps:$4 sm:$0xff]  }
 0x58f   :  { %3848 = vmatprep.subr.bf16.mxu0 %v7444_v55  ;;  %6005 = vmatprep.subr.bf16.mxu1 %v7790_v0  ;;  %v7604_v27 = vld [vmem:[#allocation13 + $0x64] ss:$12 sps:$4 sm:$0xff]  }
 0x590   :  { %v5076_v40 = vld [vmem:[#allocation16 + $0x8] sm:$0x3] }
 0x591   :  { %v5100_v45 = vadd.f32 %v5092_v19, %v5076_v40  ;;  %v7611_v19 = vld [vmem:[#allocation13 + $0x4c] ss:$12 sps:$4 sm:$0xff]   ;;  %v7614_v40 = vld [vmem:[#allocation13 + $0x48] ss:$12 sps:$4 sm:$0xff]  }
 0x592   :  { %3849 = vmatpush1.bf16.msra.mxu0 %v7450_v51  ;;  %6006 = vmatpush3.bf16.msra.mxu1 %v6371_v21  ;;  %v6392_v21 = vld [vmem:[#allocation13 + $0x68] ss:$12 sps:$4 sm:$0xff]  }
 0x593   :  { %3850 = vmatprep.subr.bf16.mxu0 %v7454_v9  ;;  %6007 = vmatprep.subr.bf16.mxu1 %v7790_v0  ;;  %v5108_v46 = vmul.f32 0.5, %v5100_v45  ;;  %v6396_v45 = vld [vmem:[#allocation13 + $0x50] ss:$12 sps:$4 sm:$0xff]  }
 0x595   :  { %5116 = vst [vmem:[#allocation16 + $0x8] sm:$0x3] %v5108_v46  ;;  %v7621_v46 = vld [vmem:[#allocation13 + $0x30] ss:$12 sps:$4 sm:$0xff]  }
 0x596   :  { %3851 = vmatpush1.bf16.msra.mxu0 %v7457_v14  ;;  %6008 = vmatpush3.bf16.msra.mxu1 %v6372_v43  ;;  %v7618_v43 = vld [vmem:[#allocation13 + $0x34] ss:$12 sps:$4 sm:$0xff]  }
 0x597   :  { %3852 = vmatprep.subr.bf16.mxu0 %v7461_v25  ;;  %6009 = vmatprep.subr.bf16.mxu1 %v7790_v0 }
 0x59a   :  { %v6554_v54 = vpop.eup %6553  ;;  %3853 = vmatpush1.bf16.msra.mxu0 %v7464_v30  ;;  %6010 = vmatpush3.bf16.msra.mxu1 %v6373_v49  ;;  %v6400_v49 = vld [vmem:[#allocation13 + $0x38] ss:$12 sps:$4 sm:$0xff]  }
 0x59b   :  { %v3393_v3 = vsub.f32 %v7497_v35, %v6554_v54  ;;  %3854 = vmatprep.subr.bf16.mxu0 %v7468_v59  ;;  %6011 = vmatprep.subr.bf16.mxu1 %v7790_v0  ;;  %v6556_v7 = vpop.eup %6555 }
 0x59d   :  { %v3394_v13 = vmul.f32 %v6556_v7, %v3393_v3  ;;  %v6404_v3 = vld [vmem:[#allocation13 + $0x20] ss:$12 sps:$4 sm:$0xff]   ;;  %v7632_v7 = vld [vmem:[#allocation13 + $0x4] ss:$12 sps:$4 sm:$0xff]  }
 0x59e   :  { %3855 = vmatpush1.bf16.msra.mxu0 %v7471_v62  ;;  %6012 = vmatpush3.bf16.msra.mxu1 %v6374_v60  ;;  %v7628_v60 = vld [vmem:[#allocation13 + $0x18] ss:$12 sps:$4 sm:$0xff]  }
 0x59f   :  { %v3395_v17 = vadd.f32 %v6554_v54, %v3394_v13  ;;  %3856 = vmatprep.subr.bf16.mxu0 %v7476_v32  ;;  %6013 = vmatprep.subr.bf16.mxu1 %v7790_v0  ;;  %v7625_v54 = vld [vmem:[#allocation13 + $0x1c] ss:$12 sps:$4 sm:$0xff]   ;;  %v7635_v13 = vld [vmem:[#allocation13] ss:$12 sps:$4 sm:$0xff]  }
 0x5a1   :  { %v3399_v10 = vsub.f32 %v3395_v17, %v7497_v35  ;;  %v3410_v17 = vld [vmem:[#allocation2 + $0xf] sm:$0x7] }
 0x5a2   :  { %3857 = vmatpush1.bf16.msra.mxu0 %v7480_v34  ;;  %6014 = vmatpush3.bf16.msra.mxu1 %v6375_v50  ;;  %v6408_v50 = vld [vmem:[#allocation13 + $0x8] ss:$12 sps:$4 sm:$0xff]  }
 0x5a3   :  { %3858 = vmatprep.subr.bf16.mxu0 %v7484_v61  ;;  %6015 = vmatprep.subr.bf16.mxu1 %v7790_v0  ;;  %v3400_v16 = vmul.f32 %v7418_v37, %v3399_v10  ;;  %v3411_v10 = vunpack.c.l.bf16 %v3410_v17 }
 0x5a5   :  { %v7573_v47 = vadd.f32 %v3400_v16, %v7497_v35 }
 0x5a6   :  { %3859 = vmatpush1.bf16.msra.mxu0 %v7491_v33  ;;  %6016 = vmatpush3.bf16.msra.mxu1 %v6376_v23 }
 0x5a7   :  { %v3405_v6 = vmul.f32 %v7418_v37, %v7573_v47  ;;  %v3683_v4 = vpack.c.bf16 %v7573_v47, %v7573_v47  ;;  %6021 = vmatprep.subr.bf16.mxu1 %v7790_v0  ;;  %v7584_v37 = vld [vmem:[#allocation13 + $0xac] ss:$12 sps:$4 sm:$0xff]  }
 0x5a8   :  { %4131 = vmatprep.subr.bf16.mxu0 %v7584_v37 }
 0x5a9   :  { %v3406_v22 = vpack.c.bf16 %v3405_v6, %v3405_v6  ;;  %3877 = vmatmul.mubr.bf16.vlgmr.msra.gmra.mxu0 %v3683_v4  ;;  %6018 = vmatmul.mubr.bf16.vlgmr.msra.gmra.mxu1 %v3683_v4 }
 0x5aa   :  { %4163 = vmatprep.mubr.bf16.mxu0 %v7788_v1  ;;  %6037 = vmatprep.mubr.msk.bf16.mxu1 %vm6820_vm0, %v7790_v0 }
 0x5ab   :  { %3408 = vst [vmem:[#allocation4 + $0x3] sm:$0x1] %v3406_v22  ;;  %4132 = vmatpush1.bf16.msra.mxu0 %v7586_v29  ;;  %6022 = vmatpush3.bf16.msra.mxu1 %v6380_v20  ;;  %v3665_v20 = vrot.slane %v3411_v10, 2 }
 0x5ac   :  { %6023 = vmatprep.subr.bf16.mxu1 %v7790_v0  ;;  %4133 = vmatprep.subr.bf16.mxu0 %v7590_v36 }
 0x5af   :  { %4134 = vmatpush1.bf16.msra.mxu0 %v7593_v56  ;;  %6024 = vmatpush3.bf16.msra.mxu1 %v6384_v38 }
 0x5b0   :  { %6025 = vmatprep.subr.bf16.mxu1 %v7790_v0  ;;  %4135 = vmatprep.subr.bf16.mxu0 %v7597_v31 }
 0x5b2   :  { %v5083_v35 = vld [vmem:[#allocation4 + $0x3] sm:$0x1] }
 0x5b3   :  { %v5091_v53 = vunpack.c.l.bf16 %v5083_v35  ;;  %4136 = vmatpush1.bf16.msra.mxu0 %v7600_v44  ;;  %6026 = vmatpush3.bf16.msra.mxu1 %v6388_v48 }
 0x5b4   :  { %6027 = vmatprep.subr.bf16.mxu1 %v7790_v0  ;;  %4137 = vmatprep.subr.bf16.mxu0 %v7604_v27 }
 0x5b5   :  { %v5099_v15 = vadd.f32 %v5091_v53, %v5075_v58 }
 0x5b7   :  { %v5107_v24 = vmul.f32 0.5, %v5099_v15  ;;  %4138 = vmatpush1.bf16.msra.mxu0 %v7607_v2  ;;  %6028 = vmatpush3.bf16.msra.mxu1 %v6392_v21 }
 0x5b8   :  { %6029 = vmatprep.subr.bf16.mxu1 %v7790_v0  ;;  %4139 = vmatprep.subr.bf16.mxu0 %v7611_v19 }
 0x5b9   :  { %5115 = vst [vmem:[#allocation16 + $0x6] sm:$0x3] %v5107_v24 }
 0x5bb   :  { %4140 = vmatpush1.bf16.msra.mxu0 %v7614_v40  ;;  %6030 = vmatpush3.bf16.msra.mxu1 %v6396_v45  ;;  %v3413_v45 = vld [vmem:[#allocation3 + $0x6] sm:$0x7] }
 0x5bc   :  { %6031 = vmatprep.subr.bf16.mxu1 %v7790_v0  ;;  %4141 = vmatprep.subr.bf16.mxu0 %v7618_v43 }
 0x5bf   :  { %4142 = vmatpush1.bf16.msra.mxu0 %v7621_v46  ;;  %6032 = vmatpush3.bf16.msra.mxu1 %v6400_v49  ;;  %v3414_v49 = vunpack.c.l.bf16 %v3413_v45 }
 0x5c0   :  { %6033 = vmatprep.subr.bf16.mxu1 %v7790_v0  ;;  %4143 = vmatprep.subr.bf16.mxu0 %v7625_v54 }
 0x5c1   :  { %v3933_v45 = vrot.slane %v3414_v49, 2 }
 0x5c3   :  { %4144 = vmatpush1.bf16.msra.mxu0 %v7628_v60  ;;  %6034 = vmatpush3.bf16.msra.mxu1 %v6404_v3 }
 0x5c4   :  { %6035 = vmatprep.subr.bf16.mxu1 %v7790_v0  ;;  %4145 = vmatprep.subr.bf16.mxu0 %v7632_v7 }
 0x5c7   :  { %4146 = vmatpush1.bf16.msra.mxu0 %v7635_v13  ;;  %6036 = vmatpush3.bf16.msra.mxu1 %v6408_v50 }
 0x5c8   :  { %4399 = vmatprep.subr.bf16.mxu0 %v7403_v26  ;;  %6041 = vmatprep.subr.bf16.mxu1 %v7790_v0 }
 0x649   :  { %v3610_v23 = vpop.f32.mrf.mxu0  ;;  %v3651_v16 = vpop.f32.mrf.mxu1 }
 0x64a   :  { %v3657_v6 = vadd.f32 %v3610_v23, %v3411_v10  ;;  %v3674_v23 = vadd.f32 %v7410_v8, %v3651_v16 }
 0x64b   :  { %v3612_v4 = vpop.f32.mrf.mxu0  ;;  %v5999_v22 = vpop.f32.mrf.mxu1 }
 0x64c   :  { %v5483_v35 = vmul.f32 -1.442695, %v3657_v6  ;;  %v3667_v38 = vadd.f32 %v3665_v20, %v3612_v4 }
 0x64d   :  { %v3614_v53 = vpop.f32.mrf.mxu0  ;;  %v3654_v58 = vpop.f32.mrf.mxu1 }
 0x64e   :  { %6557 = vpow2.f32 %v5483_v35  ;;  %v5484_v48 = vmul.f32 -1.442695, %v3667_v38 }
 0x64f   :  { %v3615_v15 = vpop.f32.mrf.mxu0  ;;  %v6000_v24 = vpop.f32.mrf.mxu1 }
 0x650   :  { %6559 = vpow2.f32 %v5484_v48  ;;  %v3676_v15 = vrot.slane %v3411_v10, 4 }
 0x65b   :  { %v6558_v21 = vpop.eup %6557 }
 0x65c   :  { %v3661_v26 = vadd.f32 1.0, %v6558_v21 }
 0x65d   :  { %v6560_v17 = vpop.eup %6559 }
 0x65e   :  { %6561 = vrcp.f32 %v3661_v26  ;;  %v3671_v21 = vadd.f32 1.0, %v6560_v17 }
 0x669   :  { %v3878_v3 = vpop.f32.mrf.mxu0  ;;  %v3919_v50 = vpop.f32.mrf.mxu1 }
 0x66a   :  { %v3925_v6 = vadd.f32 %v3878_v3, %v3414_v49 }
 0x66b   :  { %v6562_v22 = vpop.eup %6561  ;;  %v3880_v53 = vpop.f32.mrf.mxu0 }
 0x66c   :  { %v6019_v35 = vpop.f32.mrf.mxu1  ;;  %v3675_v58 = vmul.f32 %v6562_v22, %v3674_v23  ;;  %v5509_v24 = vmul.f32 -1.442695, %v3925_v6  ;;  %v3935_v1 = vadd.f32 %v3933_v45, %v3880_v53  ;;  %v6412_v45 = vld [vmem:[#allocation14 + $0x68] ss:$12 sps:$4 sm:$0xff]  }
 0x66d   :  { %v3882_v4 = vpop.f32.mrf.mxu0 }
 0x66e   :  { %v3922_v20 = vpop.f32.mrf.mxu1  ;;  %v3678_v38 = vadd.f32 %v3676_v15, %v3675_v58  ;;  %6563 = vpow2.f32 %v5509_v24  ;;  %v5510_v0 = vmul.f32 -1.442695, %v3935_v1  ;;  %v6409_v15 = vld [vmem:[#allocation14 + $0xb0] ss:$12 sps:$4 sm:$0xff]   ;;  %v3942_v1 = vadd.f32 %v7430_v63, %v3919_v50 }
 0x66f   :  { %v3883_v48 = vpop.f32.mrf.mxu0  ;;  %v7792_v63 = vmov 0.0   ;;  %v5085_v50 = vld [vmem:[#allocation4 + $0x5] sm:$0x1] }
 0x670   :  { %v6020_v26 = vpop.f32.mrf.mxu1  ;;  %6565 = vtanh.f32 %v3678_v38  ;;  %v3944_v38 = vrot.slane %v3414_v49, 4  ;;  %v6411_v49 = vld [vmem:[#allocation14 + $0x80] ss:$12 sps:$4 sm:$0xff]  }
 0x671   :  { %6567 = vrcp.f32 %v3671_v21 }
 0x672   :  { %6569 = vpow2.f32 %v5510_v0 }
 0x67b   :  { %v6564_v8 = vpop.eup %6563 }
 0x67c   :  { %v3929_v16 = vadd.f32 1.0, %v6564_v8 }
 0x67d   :  { %v6566_v3 = vpop.eup %6565 }
 0x67e   :  { %v3680_v23 = vsub.f32 %v7538_v5, %v6566_v3  ;;  %6571 = vrcp.f32 %v3929_v16  ;;  %v6568_v10 = vpop.eup %6567 }
 0x67f   :  { %v6570_v53 = vpop.eup %6569 }
 0x680   :  { %v3681_v6 = vmul.f32 %v6568_v10, %v3680_v23  ;;  %v3939_v48 = vadd.f32 1.0, %v6570_v53  ;;  %v6416_v23 = vld [vmem:[#allocation14 + $0x8] ss:$12 sps:$4 sm:$0xff]  }
 0x682   :  { %v3682_v22 = vadd.f32 %v6566_v3, %v3681_v6 }
 0x684   :  { %v3951_v17 = vsub.f32 %v3682_v22, %v7538_v5 }
 0x686   :  { %v3952_v35 = vmul.f32 %v7329_v11, %v3951_v17 }
 0x688   :  { %v7646_v58 = vadd.f32 %v3952_v35, %v7538_v5  ;;  %v6410_v5 = vld [vmem:[#allocation14 + $0x98] ss:$12 sps:$4 sm:$0xff]  }
 0x68a   :  { %v3957_v0 = vmul.f32 %v7329_v11, %v7646_v58  ;;  %v3970_v24 = vpack.c.bf16 %v7646_v58, %v7646_v58  ;;  %v7793_v11 = vmov 0  }
 0x68b   :  { %v6572_v4 = vpop.eup %6571 }
 0x68c   :  { %v3943_v20 = vmul.f32 %v6572_v4, %v3942_v1  ;;  %3959 = vst [vmem:[#allocation16 + $0xa] sm:$0x3] %v3957_v0  ;;  %4164 = vmatmul.mubr.bf16.vlgmr.msra.gmra.mxu0 %v3970_v24  ;;  %6038 = vmatmul.mubr.bf16.vlgmr.msra.gmra.mxu1 %v3970_v24 }
 0x68d   :  { %4400 = vmatpush1.bf16.msra.mxu0 %v7425_v52  ;;  %6042 = vmatpush3.bf16.msra.mxu1 %v6409_v15  ;;  %v5093_v52 = vunpack.c.l.bf16 %v5085_v50 }
 0x68e   :  { %v3946_v21 = vadd.f32 %v3944_v38, %v3943_v20  ;;  %4401 = vmatprep.subr.bf16.mxu0 %v7437_v12  ;;  %6043 = vmatprep.subr.bf16.mxu1 %v7792_v63  ;;  %v3968_v38 = vld [vmem:[#allocation3 + $0x3] sm:$0x7] }
 0x68f   :  { %4431 = vmatprep.mubr.bf16.mxu0 %v7793_v11  ;;  %6057 = vmatprep.mubr.msk.bf16.mxu1 %vm6820_vm0, %v7792_v63 }
 0x690   :  { %6573 = vtanh.f32 %v3946_v21 }
 0x691   :  { %4402 = vmatpush1.bf16.msra.mxu0 %v7440_v39  ;;  %6044 = vmatpush3.bf16.msra.mxu1 %v6410_v5  ;;  %6575 = vrcp.f32 %v3939_v48  ;;  %v6413_v39 = vld [vmem:[#allocation14 + $0x50] ss:$12 sps:$4 sm:$0xff]   ;;  %v3969_v5 = vunpack.c.l.bf16 %v3968_v38 }
 0x692   :  { %4403 = vmatprep.subr.bf16.mxu0 %v7444_v55  ;;  %6045 = vmatprep.subr.bf16.mxu1 %v7792_v63 }
 0x693   :  { %v5077_v12 = vld [vmem:[#allocation16 + $0xa] sm:$0x3] }
 0x694   :  { %v5101_v26 = vadd.f32 %v5093_v52, %v5077_v12 }
 0x695   :  { %4404 = vmatpush1.bf16.msra.mxu0 %v7450_v51  ;;  %6046 = vmatpush3.bf16.msra.mxu1 %v6411_v49  ;;  %v6414_v51 = vld [vmem:[#allocation14 + $0x38] ss:$12 sps:$4 sm:$0xff]   ;;  %v7719_v49 = vld [vmem:[%s7783_s7] ss:$0 sm:$0xff] }
 0x696   :  { %4405 = vmatprep.subr.bf16.mxu0 %v7454_v9  ;;  %6047 = vmatprep.subr.bf16.mxu1 %v7792_v63  ;;  %v5109_v8 = vmul.f32 0.5, %v5101_v26 }
 0x698   :  { %5117 = vst [vmem:[#allocation16 + $0xa] sm:$0x3] %v5109_v8 }
 0x699   :  { %4406 = vmatpush1.bf16.msra.mxu0 %v7457_v14  ;;  %6048 = vmatpush3.bf16.msra.mxu1 %v6412_v45  ;;  %v6415_v14 = vld [vmem:[#allocation14 + $0x20] ss:$12 sps:$4 sm:$0xff]  }
 0x69a   :  { %4407 = vmatprep.subr.bf16.mxu0 %v7461_v25  ;;  %6049 = vmatprep.subr.bf16.mxu1 %v7792_v63 }
 0x69d   :  { %v6574_v55 = vpop.eup %6573  ;;  %4408 = vmatpush1.bf16.msra.mxu0 %v7464_v30  ;;  %6050 = vmatpush3.bf16.msra.mxu1 %v6413_v39 }
 0x69e   :  { %v3948_v16 = vsub.f32 %v7573_v47, %v6574_v55  ;;  %4409 = vmatprep.subr.bf16.mxu0 %v7468_v59  ;;  %6051 = vmatprep.subr.bf16.mxu1 %v7792_v63  ;;  %v6576_v9 = vpop.eup %6575 }
 0x6a0   :  { %v3949_v3 = vmul.f32 %v6576_v9, %v3948_v16 }
 0x6a1   :  { %4410 = vmatpush1.bf16.msra.mxu0 %v7471_v62  ;;  %6052 = vmatpush3.bf16.msra.mxu1 %v6414_v51 }
 0x6a2   :  { %v3950_v25 = vadd.f32 %v6574_v55, %v3949_v3  ;;  %4411 = vmatprep.subr.bf16.mxu0 %v7476_v32  ;;  %6053 = vmatprep.subr.bf16.mxu1 %v7792_v63 }
 0x6a4   :  { %v3954_v30 = vsub.f32 %v3950_v25, %v7573_v47 }
 0x6a5   :  { %4412 = vmatpush1.bf16.msra.mxu0 %v7480_v34  ;;  %6054 = vmatpush3.bf16.msra.mxu1 %v6415_v14 }
 0x6a6   :  { %4413 = vmatprep.subr.bf16.mxu0 %v7484_v61  ;;  %6055 = vmatprep.subr.bf16.mxu1 %v7792_v63  ;;  %v3955_v59 = vmul.f32 %v7293_v28, %v3954_v30 }
 0x6a8   :  { %v7681_v62 = vadd.f32 %v3955_v59, %v7573_v47  ;;  %v5074_v47 = vld [vmem:[#allocation16 + $0x4] sm:$0x3] }
 0x6a9   :  { %4414 = vmatpush1.bf16.msra.mxu0 %v7491_v33  ;;  %6056 = vmatpush3.bf16.msra.mxu1 %v6416_v23  ;;  %v4488_v23 = vrot.slane %v3969_v5, 2 }
 0x6aa   :  { %v3960_v32 = vmul.f32 %v7293_v28, %v7681_v62  ;;  %v4238_v34 = vpack.c.bf16 %v7681_v62, %v7681_v62  ;;  %4685 = vmatprep.subr.bf16.mxu0 %v7584_v37  ;;  %6061 = vmatprep.subr.bf16.mxu1 %v7792_v63 }
 0x6ac   :  { %v3961_v61 = vpack.c.bf16 %v3960_v32, %v3960_v32  ;;  %4432 = vmatmul.mubr.bf16.vlgmr.msra.gmra.mxu0 %v4238_v34  ;;  %6058 = vmatmul.mubr.bf16.vlgmr.msra.gmra.mxu1 %v4238_v34 }
 0x6ad   :  { %4686 = vmatpush1.bf16.msra.mxu0 %v7586_v29  ;;  %4717 = vmatprep.mubr.bf16.mxu0 %v7793_v11 }
 0x6ae   :  { %3963 = vst [vmem:[#allocation4 + $0x2] sm:$0x1] %v3961_v61  ;;  %4687 = vmatprep.subr.bf16.mxu0 %v7590_v36  ;;  %6077 = vmatprep.mubr.msk.bf16.mxu1 %vm6820_vm0, %v7792_v63  ;;  %v6417_v36 = vld [vmem:[#allocation13 + $0xb0] ss:$12 sps:$4 sm:$0xff]  }
 0x6af   :  { %6062 = vmatpush3.bf16.msra.mxu1 %v6417_v36 }
 0x6b0   :  { %6063 = vmatprep.subr.bf16.mxu1 %v7792_v63 }
 0x6b1   :  { %4688 = vmatpush1.bf16.msra.mxu0 %v7593_v56  ;;  %v6418_v56 = vld [vmem:[#allocation13 + $0x98] ss:$12 sps:$4 sm:$0xff]  }
 0x6b2   :  { %4689 = vmatprep.subr.bf16.mxu0 %v7597_v31  ;;  %v6419_v31 = vld [vmem:[#allocation13 + $0x80] ss:$12 sps:$4 sm:$0xff]  }
 0x6b3   :  { %6064 = vmatpush3.bf16.msra.mxu1 %v6418_v56 }
 0x6b4   :  { %6065 = vmatprep.subr.bf16.mxu1 %v7792_v63 }
 0x6b5   :  { %4690 = vmatpush1.bf16.msra.mxu0 %v7600_v44  ;;  %v5082_v28 = vld [vmem:[#allocation4 + $0x2] sm:$0x1]  ;;  %v6420_v44 = vld [vmem:[#allocation13 + $0x68] ss:$12 sps:$4 sm:$0xff]  }
 0x6b6   :  { %4691 = vmatprep.subr.bf16.mxu0 %v7604_v27  ;;  %v5090_v33 = vunpack.c.l.bf16 %v5082_v28  ;;  %v6421_v27 = vld [vmem:[#allocation13 + $0x50] ss:$12 sps:$4 sm:$0xff]  }
 0x6b7   :  { %6066 = vmatpush3.bf16.msra.mxu1 %v6419_v31 }
 0x6b8   :  { %v5098_v37 = vadd.f32 %v5090_v33, %v5074_v47  ;;  %6067 = vmatprep.subr.bf16.mxu1 %v7792_v63 }
 0x6b9   :  { %4692 = vmatpush1.bf16.msra.mxu0 %v7607_v2  ;;  %v6422_v2 = vld [vmem:[#allocation13 + $0x38] ss:$12 sps:$4 sm:$0xff]  }
 0x6ba   :  { %4693 = vmatprep.subr.bf16.mxu0 %v7611_v19  ;;  %v5106_v29 = vmul.f32 0.5, %v5098_v37  ;;  %v6423_v19 = vld [vmem:[#allocation13 + $0x20] ss:$12 sps:$4 sm:$0xff]  }
 0x6bb   :  { %6068 = vmatpush3.bf16.msra.mxu1 %v6420_v44  ;;  %v6425_v44 = vld [vmem:[#allocation14 + $0xa8] ss:$12 sps:$4 sm:$0xff]  }
 0x6bc   :  { %5114 = vst [vmem:[#allocation16 + $0x4] sm:$0x3] %v5106_v29  ;;  %6069 = vmatprep.subr.bf16.mxu1 %v7792_v63 }
 0x6bd   :  { %4694 = vmatpush1.bf16.msra.mxu0 %v7614_v40  ;;  %v6424_v40 = vld [vmem:[#allocation13 + $0x8] ss:$12 sps:$4 sm:$0xff]  }
 0x6be   :  { %4695 = vmatprep.subr.bf16.mxu0 %v7618_v43  ;;  %v6427_v43 = vld [vmem:[#allocation14 + $0xac] ss:$12 sps:$4 sm:$0xff]  }
 0x6bf   :  { %6070 = vmatpush3.bf16.msra.mxu1 %v6421_v27  ;;  %v6428_v27 = vld [vmem:[#allocation14 + $0xb0] ss:$12 sps:$4 sm:$0xff]  }
 0x6c0   :  { %6071 = vmatprep.subr.bf16.mxu1 %v7792_v63 }
 0x6c1   :  { %4696 = vmatpush1.bf16.msra.mxu0 %v7621_v46  ;;  %v3965_v46 = vld [vmem:[#allocation2 + $0x12] sm:$0x7] }
 0x6c2   :  { %4697 = vmatprep.subr.bf16.mxu0 %v7625_v54  ;;  %v3966_v54 = vunpack.c.l.bf16 %v3965_v46 }
 0x6c3   :  { %6072 = vmatpush3.bf16.msra.mxu1 %v6422_v2 }
 0x6c4   :  { %6073 = vmatprep.subr.bf16.mxu1 %v7792_v63  ;;  %v4220_v1 = vrot.slane %v3966_v54, 2  ;;  %v4231_v55 = vrot.slane %v3966_v54, 4 }
 0x6c5   :  { %4698 = vmatpush1.bf16.msra.mxu0 %v7628_v60 }
 0x6c6   :  { %4699 = vmatprep.subr.bf16.mxu0 %v7632_v7 }
 0x6c7   :  { %6074 = vmatpush3.bf16.msra.mxu1 %v6423_v19  ;;  %v7731_v19 = vld [vmem:[%s7785_s9] ss:$0 sm:$0xff]  ;;  %s6823_s9 = smov [#allocation17]  }
 0x6c8   :  { %6075 = vmatprep.subr.bf16.mxu1 %v7792_v63  ;;  %s5141_s19 = sshll.u32 %s6823_s9, 4  ;;  %s5142_s19 = int_to_ptr.vmem [resolvable:$true] %s5141_s19 }
 0x6c9   :  { %4700 = vmatpush1.bf16.msra.mxu0 %v7635_v13  ;;  %s6757_s3 = scalar_lea.vmem %s5142_s19, 32  ;;  %p6762_p3 = scmp.lt.s32.totalorder %s5142_s19, %s5142_s19 }
 0x6ca   :  { %4953 = vmatprep.subr.bf16.mxu0 %v6427_v43  ;;  %p6758_p2 = scmp.ne.s32.totalorder %s5142_s19, %s6757_s3  ;;  %p6763_p4 = scmp.lt.s32.totalorder %s6757_s3, %s6757_s3 }
 0x6cb   :  { %6076 = vmatpush3.bf16.msra.mxu1 %v6424_v40 }
 0x6cc   :  { %6081 = vmatprep.subr.bf16.mxu1 %v7792_v63  ;;  %p6764_p5 = por %p6763_p4, %p6762_p3 }
 0x6ce   :  { %p6765_p6 = pnand %p6764_p5, %p6758_p2 }
 0x74c   :  { %v4165_v60 = vpop.f32.mrf.mxu0  ;;  %v4206_v7 = vpop.f32.mrf.mxu1 }
 0x74d   :  { %v4212_v13 = vadd.f32 %v4165_v60, %v3966_v54  ;;  %v4229_v52 = vadd.f32 %v7719_v49, %v4206_v7  ;;  %v6431_v54 = vld [vmem:[#allocation14 + $0x94] ss:$12 sps:$4 sm:$0xff]   ;;  %v4499_v7 = vrot.slane %v3969_v5, 4 }
 0x74e   :  { %v4167_v10 = vpop.f32.mrf.mxu0  ;;  %v6039_v6 = vpop.f32.mrf.mxu1 }
 0x74f   :  { %v5535_v22 = vmul.f32 -1.442695, %v4212_v13  ;;  %v4222_v0 = vadd.f32 %v4220_v1, %v4167_v10  ;;  %v6429_v13 = vld [vmem:[#allocation14 + $0x90] ss:$12 sps:$4 sm:$0xff]   ;;  %v6432_v10 = vld [vmem:[#allocation14 + $0x98] ss:$12 sps:$4 sm:$0xff]  }
 0x750   :  { %v4169_v17 = vpop.f32.mrf.mxu0  ;;  %v4209_v35 = vpop.f32.mrf.mxu1 }
 0x751   :  { %6577 = vpow2.f32 %v5535_v22  ;;  %v5536_v24 = vmul.f32 -1.442695, %v4222_v0  ;;  %v5086_v17 = vld [vmem:[#allocation4 + $0x6] sm:$0x1]  ;;  %v6433_v35 = vld [vmem:[#allocation14 + $0x78] ss:$12 sps:$4 sm:$0xff]  }
 0x752   :  { %v4170_v15 = vpop.f32.mrf.mxu0  ;;  %v6040_v53 = vpop.f32.mrf.mxu1  ;;  %v5094_v1 = vunpack.c.l.bf16 %v5086_v17 }
 0x753   :  { %6579 = vpow2.f32 %v5536_v24  ;;  %v6436_v15 = vld [vmem:[#allocation14 + $0x80] ss:$12 sps:$4 sm:$0xff]   ;;  %v6439_v53 = vld [vmem:[#allocation14 + $0x64] ss:$12 sps:$4 sm:$0xff]  }
 0x75e   :  { %v6578_v4 = vpop.eup %6577 }
 0x75f   :  { %v4216_v20 = vadd.f32 1.0, %v6578_v4  ;;  %v6440_v4 = vld [vmem:[#allocation14 + $0x68] ss:$12 sps:$4 sm:$0xff]  }
 0x760   :  { %v6580_v50 = vpop.eup %6579 }
 0x761   :  { %6581 = vrcp.f32 %v4216_v20  ;;  %v4226_v14 = vadd.f32 1.0, %v6580_v50  ;;  %v6443_v20 = vld [vmem:[#allocation14 + $0x4c] ss:$12 sps:$4 sm:$0xff]  }
 0x76c   :  { %v4433_v21 = vpop.f32.mrf.mxu0  ;;  %v4474_v48 = vpop.f32.mrf.mxu1 }
 0x76d   :  { %v4480_v12 = vadd.f32 %v4433_v21, %v3969_v5  ;;  %v4497_v40 = vadd.f32 %v7731_v19, %v4474_v48  ;;  %v6441_v5 = vld [vmem:[#allocation14 + $0x48] ss:$12 sps:$4 sm:$0xff]   ;;  %v6444_v21 = vld [vmem:[#allocation14 + $0x50] ss:$12 sps:$4 sm:$0xff]  }
 0x76e   :  { %v6582_v26 = vpop.eup %6581  ;;  %v4435_v45 = vpop.f32.mrf.mxu0  ;;  %v6447_v48 = vld [vmem:[#allocation14 + $0x34] ss:$12 sps:$4 sm:$0xff]  }
 0x76f   :  { %v6059_v8 = vpop.f32.mrf.mxu1  ;;  %v4230_v39 = vmul.f32 %v6582_v26, %v4229_v52  ;;  %v5561_v51 = vmul.f32 -1.442695, %v4480_v12  ;;  %v4490_v59 = vadd.f32 %v4488_v23, %v4435_v45  ;;  %v6445_v52 = vld [vmem:[#allocation14 + $0x30] ss:$12 sps:$4 sm:$0xff]   ;;  %v6448_v12 = vld [vmem:[#allocation14 + $0x38] ss:$12 sps:$4 sm:$0xff]  }
 0x770   :  { %v4437_v16 = vpop.f32.mrf.mxu0  ;;  %v6451_v45 = vld [vmem:[#allocation14 + $0x1c] ss:$12 sps:$4 sm:$0xff]  }
 0x771   :  { %v4477_v9 = vpop.f32.mrf.mxu1  ;;  %v4233_v3 = vadd.f32 %v4231_v55, %v4230_v39  ;;  %6583 = vpow2.f32 %v5561_v51  ;;  %v5562_v32 = vmul.f32 -1.442695, %v4490_v59  ;;  %v6449_v55 = vld [vmem:[#allocation14 + $0x18] ss:$12 sps:$4 sm:$0xff]   ;;  %v6452_v51 = vld [vmem:[#allocation14 + $0x20] ss:$12 sps:$4 sm:$0xff]  }
 0x772   :  { %v4438_v25 = vpop.f32.mrf.mxu0  ;;  %v6455_v9 = vld [vmem:[#allocation14 + $0x4] ss:$12 sps:$4 sm:$0xff]  }
 0x773   :  { %v6060_v30 = vpop.f32.mrf.mxu1  ;;  %6585 = vtanh.f32 %v4233_v3  ;;  %v6456_v25 = vld [vmem:[#allocation14 + $0x8] ss:$12 sps:$4 sm:$0xff]  }
 0x774   :  { %6587 = vrcp.f32 %v4226_v14  ;;  %v6453_v14 = vld [vmem:[#allocation14] ss:$12 sps:$4 sm:$0xff]  }
 0x775   :  { %6589 = vpow2.f32 %v5562_v32 }
 0x77e   :  { %v6584_v34 = vpop.eup %6583 }
 0x77f   :  { %v4484_v61 = vadd.f32 1.0, %v6584_v34 }
 0x780   :  { %v6586_v28 = vpop.eup %6585 }
 0x781   :  { %v4235_v33 = vsub.f32 %v7646_v58, %v6586_v28  ;;  %6591 = vrcp.f32 %v4484_v61  ;;  %v6588_v47 = vpop.eup %6587 }
 0x782   :  { %v6590_v2 = vpop.eup %6589 }
 0x783   :  { %v4236_v37 = vmul.f32 %v6588_v47, %v4235_v33  ;;  %v4494_v22 = vadd.f32 1.0, %v6590_v2 }
 0x785   :  { %v4237_v29 = vadd.f32 %v6586_v28, %v4236_v37 }
 0x787   :  { %v4506_v36 = vsub.f32 %v4237_v29, %v7646_v58 }
 0x789   :  { %v4507_v56 = vmul.f32 %v7243_v42, %v4506_v36 }
 0x78b   :  { %v7726_v31 = vadd.f32 %v4507_v56, %v7646_v58 }
 0x78d   :  { %v4512_v43 = vmul.f32 %v7243_v42, %v7726_v31  ;;  %v4524_v46 = vpack.c.bf16 %v7726_v31, %v7726_v31  ;;  %v6435_v42 = vld [vmem:[#allocation14 + $0x7c] ss:$12 sps:$4 sm:$0xff]  }
 0x78e   :  { %v6592_v60 = vpop.eup %6591 }
 0x78f   :  { %v4498_v58 = vmul.f32 %v6592_v60, %v4497_v40  ;;  %4514 = vst [vmem:[#allocation16 + $0xc] sm:$0x3] %v4512_v43  ;;  %4718 = vmatmul.mubr.bf16.vlgmr.msra.gmra.mxu0 %v4524_v46  ;;  %6078 = vmatmul.mubr.bf16.vlgmr.msra.gmra.mxu1 %v4524_v46 }
 0x790   :  { %4954 = vmatpush1.bf16.msra.mxu0 %v6425_v44  ;;  %6082 = vmatpush3.bf16.msra.mxu1 %v6428_v27 }
 0x791   :  { %v4501_v6 = vadd.f32 %v4499_v7, %v4498_v58  ;;  %4955 = vmatprep.subr.bf16.mxu0 %v6431_v54  ;;  %6083 = vmatprep.subr.bf16.mxu1 %v7792_v63 }
 0x792   :  { %4985 = vmatprep.mubr.bf16.mxu0 %v7793_v11  ;;  %6097 = vmatprep.mubr.msk.bf16.mxu1 %vm6820_vm0, %v7792_v63  ;;  %v6437_v11 = vld [vmem:[#allocation14 + $0x60] ss:$12 sps:$4 sm:$0xff]  }
 0x793   :  { %6593 = vtanh.f32 %v4501_v6 }
 0x794   :  { %4956 = vmatpush1.bf16.msra.mxu0 %v6429_v13  ;;  %6084 = vmatpush3.bf16.msra.mxu1 %v6432_v10  ;;  %6595 = vrcp.f32 %v4494_v22  ;;  %v4522_v10 = vld [vmem:[#allocation3] sm:$0x7] }
 0x795   :  { %4957 = vmatprep.subr.bf16.mxu0 %v6435_v42  ;;  %6085 = vmatprep.subr.bf16.mxu1 %v7792_v63  ;;  %v4523_v6 = vunpack.c.l.bf16 %v4522_v10 }
 0x796   :  { %v5078_v0 = vld [vmem:[#allocation16 + $0xc] sm:$0x3] }
 0x797   :  { %v5102_v24 = vadd.f32 %v5094_v1, %v5078_v0 }
 0x798   :  { %4958 = vmatpush1.bf16.msra.mxu0 %v6433_v35  ;;  %6086 = vmatpush3.bf16.msra.mxu1 %v6436_v15 }
 0x799   :  { %4959 = vmatprep.subr.bf16.mxu0 %v6439_v53  ;;  %6087 = vmatprep.subr.bf16.mxu1 %v7792_v63  ;;  %v5110_v38 = vmul.f32 0.5, %v5102_v24 }
 0x79b   :  { %5118 = vst [vmem:[#allocation16 + $0xc] sm:$0x3] %v5110_v38 }
 0x79c   :  { %4960 = vmatpush1.bf16.msra.mxu0 %v6437_v11  ;;  %6088 = vmatpush3.bf16.msra.mxu1 %v6440_v4 }
 0x79d   :  { %4961 = vmatprep.subr.bf16.mxu0 %v6443_v20  ;;  %6089 = vmatprep.subr.bf16.mxu1 %v7792_v63 }
 0x7a0   :  { %v6594_v50 = vpop.eup %6593  ;;  %4962 = vmatpush1.bf16.msra.mxu0 %v6441_v5  ;;  %6090 = vmatpush3.bf16.msra.mxu1 %v6444_v21 }
 0x7a1   :  { %v4503_v26 = vsub.f32 %v7681_v62, %v6594_v50  ;;  %4963 = vmatprep.subr.bf16.mxu0 %v6447_v48  ;;  %6091 = vmatprep.subr.bf16.mxu1 %v7792_v63  ;;  %v6596_v8 = vpop.eup %6595 }
 0x7a3   :  { %v4504_v39 = vmul.f32 %v6596_v8, %v4503_v26 }
 0x7a4   :  { %4964 = vmatpush1.bf16.msra.mxu0 %v6445_v52  ;;  %6092 = vmatpush3.bf16.msra.mxu1 %v6448_v12  ;;  %v5042_v52 = vrot.slane %v4523_v6, 2 }
 0x7a5   :  { %v4505_v16 = vadd.f32 %v6594_v50, %v4504_v39  ;;  %4965 = vmatprep.subr.bf16.mxu0 %v6451_v45  ;;  %6093 = vmatprep.subr.bf16.mxu1 %v7792_v63 }
 0x7a7   :  { %v4509_v3 = vsub.f32 %v4505_v16, %v7681_v62 }
 0x7a8   :  { %4966 = vmatpush1.bf16.msra.mxu0 %v6449_v55  ;;  %6094 = vmatpush3.bf16.msra.mxu1 %v6452_v51 }
 0x7a9   :  { %4967 = vmatprep.subr.bf16.mxu0 %v6455_v9  ;;  %6095 = vmatprep.subr.bf16.mxu1 %v7792_v63  ;;  %v4510_v30 = vmul.f32 %v7179_v41, %v4509_v3  ;;  %v5073_v63 = vld [vmem:[#allocation16 + $0x2] sm:$0x3] }
 0x7ab   :  { %v7752_v23 = vadd.f32 %v4510_v30, %v7681_v62  ;;  %v4520_v62 = vld [vmem:[#allocation2 + $0x15] sm:$0x7] }
 0x7ac   :  { %4968 = vmatpush1.bf16.msra.mxu0 %v6453_v14  ;;  %6096 = vmatpush3.bf16.msra.mxu1 %v6456_v25  ;;  %v4521_v37 = vunpack.c.l.bf16 %v4520_v62 }
 0x7ad   :  { %v4515_v59 = vmul.f32 %v7179_v41, %v7752_v23  ;;  %v4792_v32 = vpack.c.bf16 %v7752_v23, %v7752_v23 }
 0x7ae   :  { %v4774_v54 = vrot.slane %v4521_v37, 2  ;;  %v4785_v11 = vrot.slane %v4521_v37, 4 }
 0x7af   :  { %v4516_v34 = vpack.c.bf16 %v4515_v59, %v4515_v59  ;;  %4986 = vmatmul.mubr.bf16.vlgmr.msra.gmra.mxu0 %v4792_v32  ;;  %6098 = vmatmul.mubr.bf16.vlgmr.msra.gmra.mxu1 %v4792_v32 }
 0x7b1   :  { %4518 = vst [vmem:[#allocation4 + $0x1] sm:$0x1] %v4516_v34 }
 0x7b8   :  { %v5081_v61 = vld [vmem:[#allocation4 + $0x1] sm:$0x1] }
 0x7b9   :  { %v5089_v28 = vunpack.c.l.bf16 %v5081_v61  ;;  %v5053_v61 = vrot.slane %v4523_v6, 4 }
 0x7bb   :  { %v5097_v33 = vadd.f32 %v5089_v28, %v5073_v63 }
 0x7bd   :  { %v5105_v47 = vmul.f32 0.5, %v5097_v33  ;;  %v5087_v33 = vld [vmem:[#allocation4 + $0x7] sm:$0x1] }
 0x7bf   :  { %5113 = vst [vmem:[#allocation16 + $0x2] sm:$0x3] %v5105_v47  ;;  %v5095_v47 = vunpack.c.l.bf16 %v5087_v33 }
 0x84f   :  { %v4719_v29 = vpop.f32.mrf.mxu0  ;;  %v4760_v36 = vpop.f32.mrf.mxu1 }
 0x850   :  { %v4766_v56 = vadd.f32 %v4719_v29, %v4521_v37  ;;  %v4783_v35 = vadd.f32 %v7719_v49, %v4760_v36 }
 0x851   :  { %v4721_v44 = vpop.f32.mrf.mxu0  ;;  %v6079_v41 = vpop.f32.mrf.mxu1 }
 0x852   :  { %v5587_v27 = vmul.f32 -1.442695, %v4766_v56  ;;  %v4776_v60 = vadd.f32 %v4774_v54, %v4721_v44 }
 0x853   :  { %v4723_v2 = vpop.f32.mrf.mxu0  ;;  %v4763_v40 = vpop.f32.mrf.mxu1 }
 0x854   :  { %6597 = vpow2.f32 %v5587_v27  ;;  %v5588_v58 = vmul.f32 -1.442695, %v4776_v60 }
 0x855   :  { %v4724_v43 = vpop.f32.mrf.mxu0  ;;  %v6080_v46 = vpop.f32.mrf.mxu1 }
 0x856   :  { %6599 = vpow2.f32 %v5588_v58 }
 0x861   :  { %v6598_v7 = vpop.eup %6597 }
 0x862   :  { %v4770_v13 = vadd.f32 1.0, %v6598_v7 }
 0x863   :  { %v6600_v17 = vpop.eup %6599 }
 0x864   :  { %6601 = vrcp.f32 %v4770_v13  ;;  %v4780_v21 = vadd.f32 1.0, %v6600_v17 }
 0x86f   :  { %v4987_v22 = vpop.f32.mrf.mxu0  ;;  %v5028_v42 = vpop.f32.mrf.mxu1 }
 0x870   :  { %v5034_v15 = vadd.f32 %v4987_v22, %v4523_v6  ;;  %v5051_v59 = vadd.f32 %v7731_v19, %v5028_v42 }
 0x871   :  { %v6602_v53 = vpop.eup %6601  ;;  %v4989_v1 = vpop.f32.mrf.mxu0 }
 0x872   :  { %v6099_v0 = vpop.f32.mrf.mxu1  ;;  %v4784_v24 = vmul.f32 %v6602_v53, %v4783_v35  ;;  %v5613_v4 = vmul.f32 -1.442695, %v5034_v15  ;;  %v5044_v12 = vadd.f32 %v5042_v52, %v4989_v1 }
 0x873   :  { %v4991_v20 = vpop.f32.mrf.mxu0 }
 0x874   :  { %v5031_v38 = vpop.f32.mrf.mxu1  ;;  %v4787_v5 = vadd.f32 %v4785_v11, %v4784_v24  ;;  %6603 = vpow2.f32 %v5613_v4  ;;  %v5614_v26 = vmul.f32 -1.442695, %v5044_v12 }
 0x875   :  { %v4992_v48 = vpop.f32.mrf.mxu0 }
 0x876   :  { %v6100_v50 = vpop.f32.mrf.mxu1  ;;  %6605 = vtanh.f32 %v4787_v5 }
 0x877   :  { %6607 = vrcp.f32 %v4780_v21 }
 0x878   :  { %6609 = vpow2.f32 %v5614_v26 }
 0x881   :  { %v6604_v49 = vpop.eup %6603 }
 0x882   :  { %v5038_v45 = vadd.f32 1.0, %v6604_v49 }
 0x883   :  { %v6606_v8 = vpop.eup %6605 }
 0x884   :  { %v4789_v39 = vsub.f32 %v7726_v31, %v6606_v8  ;;  %6611 = vrcp.f32 %v5038_v45  ;;  %v6608_v55 = vpop.eup %6607 }
 0x885   :  { %v6610_v25 = vpop.eup %6609 }
 0x886   :  { %v4790_v51 = vmul.f32 %v6608_v55, %v4789_v39  ;;  %v5048_v63 = vadd.f32 1.0, %v6610_v25 }
 0x888   :  { %v4791_v16 = vadd.f32 %v6606_v8, %v4790_v51 }
 0x88a   :  { %v5060_v9 = vsub.f32 %v4791_v16, %v7726_v31 }
 0x88c   :  { %v5061_v3 = vmul.f32 %v7102_v57, %v5060_v9 }
 0x88e   :  { %v5062_v14 = vadd.f32 %v5061_v3, %v7726_v31 }
 0x890   :  { %v5066_v30 = vmul.f32 %v7102_v57, %v5062_v14 }
 0x891   :  { %v6612_v32 = vpop.eup %6611 }
 0x892   :  { %5068 = vst [vmem:[#allocation16 + $0xe] sm:$0x3] %v5066_v30  ;;  %v5052_v34 = vmul.f32 %v6612_v32, %v5051_v59 }
 0x894   :  { %v5055_v28 = vadd.f32 %v5053_v61, %v5052_v34 }
 0x896   :  { %6613 = vtanh.f32 %v5055_v28 }
 0x897   :  { %6615 = vrcp.f32 %v5048_v63 }
 0x899   :  { %v5079_v62 = vld [vmem:[#allocation16 + $0xe] sm:$0x3] }
 0x89a   :  { %v5103_v37 = vadd.f32 %v5095_v47, %v5079_v62 }
 0x89c   :  { %v5111_v29 = vmul.f32 0.5, %v5103_v37 }
 0x89e   :  { %5119 = vst [vmem:[#allocation16 + $0xe] sm:$0x3] %v5111_v29 }
 0x8a3   :  { %v6614_v31 = vpop.eup %6613 }
 0x8a4   :  { %v5057_v36 = vsub.f32 %v7752_v23, %v6614_v31  ;;  %v6616_v57 = vpop.eup %6615 }
 0x8a6   :  { %v5058_v56 = vmul.f32 %v6616_v57, %v5057_v36 }
 0x8a8   :  { %v5059_v19 = vadd.f32 %v6614_v31, %v5058_v56 }
 0x8aa   :  { %v5063_v44 = vsub.f32 %v5059_v19, %v7752_v23 }
 0x8ac   :  { %v5064_v41 = vmul.f32 %v7075_v18, %v5063_v44 }
 0x8ae   :  { %v5065_v27 = vadd.f32 %v5064_v41, %v7752_v23 }
 0x8b0   :  { %v5069_v2 = vmul.f32 %v7075_v18, %v5065_v27  ;;  %v5120_v40 = vadd.f32 %v5065_v27, %v5062_v14 }
 0x8b2   :  { %v5070_v43 = vpack.c.bf16 %v5069_v2, %v5069_v2  ;;  %v5121_v46 = vmul.f32 0.5, %v5120_v40 }
 0x8b4   :  { %5071 = vst [vmem:[#allocation4] sm:$0x1] %v5070_v43  ;;  %5122 = vst [vmem:[#allocation17] sm:$0x3] %v5121_v46 }
 0x8b5   :  { %6768 = shalt.err (!%p6765_p6)
}
 0x8b6   :  { %5144 = dma.vmem_to_hbm [thread:$0]  %s5142_s19, 32, %s7787_s11, [#allocation18]   ;;  %v5072_v18 = vld [vmem:[#allocation16] sm:$0x3] }
 0x8b7   :  { %s6824_s0 = smov [#allocation16]  }
 0x8b8   :  { %s5128_s22 = sshll.u32 %s6824_s0, 4  ;;  %s5129_s22 = int_to_ptr.vmem [resolvable:$true] %s5128_s22 }
 0x8b9   :  { %s6777_s23 = scalar_lea.vmem %s5129_s22, 256  ;;  %p6782_p8 = scmp.lt.s32.totalorder %s5129_s22, %s5129_s22 }
 0x8ba   :  { %p6778_p7 = scmp.ne.s32.totalorder %s5129_s22, %s6777_s23  ;;  %p6783_p9 = scmp.lt.s32.totalorder %s6777_s23, %s6777_s23 }
 0x8bb   :  { %v5080_v23 = vld [vmem:[#allocation4] sm:$0x1] }
 0x8bc   :  { %v5088_v54 = vunpack.c.l.bf16 %v5080_v23  ;;  %p6784_p10 = por %p6783_p9, %p6782_p8 }
 0x8be   :  { %v5096_v60 = vadd.f32 %v5088_v54, %v5072_v18  ;;  %p6785_p11 = pnand %p6784_p10, %p6778_p7 }
 0x8c0   :  { %v5104_v58 = vmul.f32 0.5, %v5096_v60 }
 0x8c2   :  { %5112 = vst [vmem:[#allocation16] sm:$0x3] %v5104_v58 }
 0x8c3   :  { %6788 = shalt.err (!%p6785_p11)
}
 0x8c4   :  { %s6825_s24 = smov 32   ;;  %s6826_s25 = smov 2  }
 0x8c5   :  { %5134 = dma.vmem_to_hbm [thread:$0]  %s5129_s22, 256, %s7786_s10, [#allocation7], %s6825_s24, %s6825_s24, %s6826_s25  }
 0x8c6   :  { %6805 = dma.done.wait [#allocation7], 256  }
 0x8c7   :  { %6806 = vsyncadd [#allocation7], 4294967040 }
 0x8c8   :  { %6807 = dma.done.wait [#allocation18], 32  }
 0x8c9   :  { %6808 = vsyncadd [#allocation18], 4294967264 }
 0x8ca   :  { %5151 = vsyncpa [#allocation6], 1 }
 0x8cb   :  { %5152 = vsyncpa [#allocation9], 1 }
 0x8cc   :  { %5153 = vsyncpa [#allocation12], 1 }
 0x8cd   :  { %5154 = vsyncpa [#allocation15], 1 }
 0x8ce   :  { %5155 = vsyncpa [#allocation7], 1 }
 0x8cf   :  { %5156 = vsyncpa [#allocation18], 1 }

</bundles_post_ra>
